<compile_context>
chip_gen: v6e
topology: v6e:2x2x1
jax: 0.10.0
libtpu: 0.0.40
codegen_flags: <defaults>
</compile_context>

<pallas_src>
import functools

import jax
import jax.numpy as jnp
from jax.experimental import pallas as pl
from jax.experimental.pallas import tpu as pltpu


# --------------------------------------------------------------------------
# Static layout of the packed parameter slabs
# --------------------------------------------------------------------------

# vector-parameter slab columns (shape (c_max, _V_COLS))
(_VC_BIP_B, _VC_SCALE, _VC_SHIFT, _VC_KW_INH, _VC_KB_INH,
 _VC_KW_EXC, _VC_KB_EXC, _VC_AMA_B) = range(8)
_VC_K_EXC = 8      # columns 8..12 : ka, kfi, kfr, ksi, ksr (per channel, exc)
_VC_INH_B = 13     # row 0         : bipolar_inh conv bias
_VC_K_INH = 14     # rows 0..4     : ka, kfi, kfr, ksi, ksr (inh, chan=1)
_V_COLS = 16


def _conv_layout(chans, img_shape, ksizes):
    """Static description of every conv: (cout, cin, kh, kw, K, column offset)."""
    c_in = img_shape[0]
    c0, c1 = chans
    k0, k1 = ksizes
    n_bip = max((k0 - 1) // 2, 1)
    n_ama = max((k1 - 1) // 2, 1)

    entries = []

    def add(cout, cin, kh, kw):
        entries.append(dict(cout=cout, cin=cin, kh=kh, kw=kw, K=cin * kh * kw))

    add(c0, c_in, 3, 3)                       # bipolar stacked conv, layer 0
    for _ in range(n_bip - 1):
        add(c0, c0, 3, 3)                     # bipolar stacked conv, layers 1..
    add(1, c_in, k0, k0)                      # bipolar_inh conv
    add(c1, c0, 3, 3)                         # amacrine stacked conv, layer 0
    for _ in range(n_ama - 1):
        add(c1, c1, 3, 3)                     # amacrine stacked conv, layers 1..
    add(1, c1, k1, k1)                        # ganglion conv (no bias)

    off = 0
    for e in entries:                         # lane-aligned column blocks
        e["off"] = off
        off += ((e["K"] + 127) // 128) * 128
    return entries, off, n_bip, n_ama


def _pick_b_tile(B, max_tile=8):
    """Largest batch tile that divides B while keeping >= 2 grid steps (v7x)."""
    best = 1
    for t in range(1, max_tile + 1):
        if B % t == 0 and (B // t >= 2 or (B == 1 and t == 1)):
            best = t
    return best


# --------------------------------------------------------------------------
# The fused forward kernel (one grid step == b_tile batch elements)
# --------------------------------------------------------------------------

def _make_kernel(*, layout, n_bip, n_ama, b_tile, c_in, c0, c1, c_max,
                 k0, k1, W, n_frame, tail, n_g, dt):

    def _conv_full(buf, cin, w, bias, kh, kw, n_out):
        """K-stacked valid conv: one MXU matmul (C_out, kh*kw*cin)@(kh*kw*cin, n_out)."""
        rhs = jnp.concatenate(
            [buf[0:cin, di * W + dj: di * W + dj + n_out]
             for di in range(kh) for dj in range(kw)], axis=0)
        out = jnp.dot(w, rhs, preferred_element_type=jnp.float32)
        return out if bias is None else out + bias

    def _conv_rowwise(buf, cin, w, bias, kh, kw, n_out):
        """C_out==1 valid conv: kh MXU matmuls of (1, kw*cin)@(kw*cin, n_out)."""
        rw = kw * cin
        acc = None
        for di in range(kh):
            rhs = jnp.concatenate(
                [buf[0:cin, di * W + dj: di * W + dj + n_out]
                 for dj in range(kw)], axis=0)
            term = jnp.dot(w[:, di * rw:(di + 1) * rw], rhs,
                           preferred_element_type=jnp.float32)
            acc = term if acc is None else acc + term
        return acc if bias is None else acc + bias

    def _sigmoid(x):
        # exact logistic (no approx reciprocal: kinetics states are recurrent)
        return 1.0 / (1.0 + jnp.exp(-x))

    def _softplus(x):
        # torch.nn.Softplus(beta=1, threshold=20)
        return jnp.where(x > 20.0, x, jnp.log(1.0 + jnp.exp(jnp.minimum(x, 20.0))))

    def _kinetics(u, hs_ref, out_ref, bi, ka, kfi, kfr, ksi, ksr):
        # TODO(synk): Kinetics source not provided; standard 4-state scheme
        # [R, A, I1, I2] with forward-Euler step dt; ka_offset / ksr_gain off.
        R = hs_ref[bi, 0]
        A = hs_ref[bi, 1]
        I1 = hs_ref[bi, 2]
        I2 = hs_ref[bi, 3]
        ka_u = ka * u
        R_n = R + dt * (kfr * I1 - ka_u * R)
        A_n = A + dt * (ka_u * R - kfi * A)
        I1_n = I1 + dt * (kfi * A + ksr * I2 - (kfr + ksi) * I1)
        I2_n = I2 + dt * (ksi * I1 - ksr * I2)
        out_ref[bi, 0] = R_n                  # states written directly; no stack
        out_ref[bi, 1] = A_n
        out_ref[bi, 2] = I1_n
        out_ref[bi, 3] = I2_n
        return A_n

    idx_inh = n_bip
    idx_ama0 = n_bip + 1
    idx_gang = n_bip + n_ama + 1

    def kernel(x_ref, hse_ref, hsi_ref, cw_ref, vec_ref,
               fx_ref, hse_out_ref, hsi_out_ref, buf):
        # Zero the lane tail of the activation scratch once per grid step; the
        # front n_frame lanes are overwritten by every layer that uses it.
        buf[:, n_frame:] = jnp.zeros((c_max, tail), jnp.float32)

        # unpack the per-channel vector slab (one small aligned load)
        vec = vec_ref[...]
        bip_b = vec[:c0, _VC_BIP_B:_VC_BIP_B + 1]
        scale = vec[:c0, _VC_SCALE:_VC_SCALE + 1]
        shift = vec[:c0, _VC_SHIFT:_VC_SHIFT + 1]
        kw_inh = vec[:c0, _VC_KW_INH:_VC_KW_INH + 1]
        kb_inh = vec[:c0, _VC_KB_INH:_VC_KB_INH + 1]
        kw_exc = vec[:c0, _VC_KW_EXC:_VC_KW_EXC + 1]
        kb_exc = vec[:c0, _VC_KB_EXC:_VC_KB_EXC + 1]
        ama_b = vec[:c1, _VC_AMA_B:_VC_AMA_B + 1]
        k_exc = [vec[:c0, _VC_K_EXC + j:_VC_K_EXC + j + 1] for j in range(5)]
        inh_b = vec[0:1, _VC_INH_B:_VC_INH_B + 1]
        k_inh = [vec[j:j + 1, _VC_K_INH:_VC_K_INH + 1] for j in range(5)]

        def w_of(e):
            return cw_ref[0:e["cout"], e["off"]:e["off"] + e["K"]]

        for bi in range(b_tile):
            # ---- input frame into the zero-tailed scratch
            buf[0:c_in, 0:n_frame] = x_ref[bi]

            # ---- bipolar_inh: Conv2d(c_in, 1, k0) + bias -> sigmoid (MXU)
            e = layout[idx_inh]
            inh = _sigmoid(_conv_rowwise(buf, c_in, w_of(e), inh_b, k0, k0,
                                         n_frame))                    # (1, N)

            # ---- bipolar: LinearStackedConv2d (3x3 chain, bias last) -> ScaleShift
            h = None
            for li in range(n_bip):
                e = layout[li]
                if li > 0:
                    buf[0:e["cin"], 0:n_frame] = h
                h = _conv_full(buf, e["cin"], w_of(e),
                               bip_b if li == n_bip - 1 else None,
                               3, 3, n_frame)
            bip = h * scale + shift                                    # (c0, N)

            # ---- inhibitory kinetics -> per-channel affine -> ReLU
            a_inh = _kinetics(inh, hsi_ref, hsi_out_ref, bi, *k_inh)
            inh2 = jnp.maximum(kw_inh * a_inh + kb_inh, 0.0)           # (c0, N)

            # ---- excitatory path: subtract, sigmoid, kinetics, affine, ReLU
            fx = _sigmoid(bip - inh2)
            a_exc = _kinetics(fx, hse_ref, hse_out_ref, bi, *k_exc)
            fx = jnp.maximum(kw_exc * a_exc + kb_exc, 0.0)             # (c0, N)

            # ---- amacrine: LinearStackedConv2d (3x3 chain, bias last) -> ReLU
            for li in range(n_ama):
                e = layout[idx_ama0 + li]
                buf[0:e["cin"], 0:n_frame] = fx
                fx = _conv_full(buf, e["cin"], w_of(e),
                                ama_b if li == n_ama - 1 else None,
                                3, 3, n_frame)
            fx = jnp.maximum(fx, 0.0)                                  # (c1, N)

            # ---- ganglion: Conv2d(c1, 1, k1, bias=False) -> Softplus
            #      computed over the shrunk n_g-lane window only
            e = layout[idx_gang]
            buf[0:c1, 0:n_frame] = fx
            g = _conv_rowwise(buf, c1, w_of(e), None, k1, k1, n_g)     # (1, n_g)
            fx_ref[bi] = _softplus(g)

    return kernel


# --------------------------------------------------------------------------
# Host-side wrapper (layout glue only; one pallas_call per timestep)
# --------------------------------------------------------------------------

def kinetics_forward(conv_slab, vec_slab, x, hs, *, chans, img_shape, ksizes,
                     dt, b_tile=None):
    """x: (B, C, H, W); hs: tuple of padded hidden states
    ((B, 4, c0, H*W), (B, 4, 1, H*W)) in the kernel's frame layout."""
    c_in, H, W = img_shape
    c0, c1 = chans
    k0, k1 = ksizes
    B = x.shape[0]
    layout, _, n_bip, n_ama = _conv_layout(chans, img_shape, ksizes)
    c_max = conv_slab.shape[0]

    n_frame = H * W
    h1, w1 = H - k0 + 1, W - k0 + 1
    h2, w2 = h1 - k1 + 1, w1 - k1 + 1
    h3, w3 = h2 - k1 + 1, w2 - k1 + 1
    max_shift = max(k0 - 1, k1 - 1, 2) * (W + 1)
    tail = ((max_shift + 127) // 128) * 128            # lane-aligned zero tail
    # ganglion stage lane window: smallest 128-multiple covering its valid lanes
    n_g = min((((h3 - 1) * W + w3 + 127) // 128) * 128, n_frame)

    if b_tile is None:
        b_tile = _pick_b_tile(B)
    assert B % b_tile == 0
    grid = (B // b_tile,)

    hse, hsi = hs
    x_flat = x.reshape(B, c_in, n_frame).astype(jnp.float32)

    kernel = _make_kernel(layout=layout, n_bip=n_bip, n_ama=n_ama,
                          b_tile=b_tile, c_in=c_in, c0=c0, c1=c1, c_max=c_max,
                          k0=k0, k1=k1, W=W, n_frame=n_frame, tail=tail,
                          n_g=n_g, dt=dt)

    out_shape = (
        jax.ShapeDtypeStruct((B, 1, n_g), jnp.float32),
        jax.ShapeDtypeStruct((B, 4, c0, n_frame), jnp.float32),
        jax.ShapeDtypeStruct((B, 4, 1, n_frame), jnp.float32),
    )

    fx_flat, hse_new, hsi_new = pl.pallas_call(
        kernel,
        out_shape=out_shape,
        grid=grid,
        in_specs=[
            pl.BlockSpec((b_tile, c_in, n_frame), lambda b: (b, 0, 0)),
            pl.BlockSpec((b_tile, 4, c0, n_frame), lambda b: (b, 0, 0, 0)),
            pl.BlockSpec((b_tile, 4, 1, n_frame), lambda b: (b, 0, 0, 0)),
            pl.BlockSpec(conv_slab.shape, lambda b: (0, 0)),
            pl.BlockSpec(vec_slab.shape, lambda b: (0, 0)),
        ],
        out_specs=(
            pl.BlockSpec((b_tile, 1, n_g), lambda b: (b, 0, 0)),
            pl.BlockSpec((b_tile, 4, c0, n_frame), lambda b: (b, 0, 0, 0)),
            pl.BlockSpec((b_tile, 4, 1, n_frame), lambda b: (b, 0, 0, 0)),
        ),
        scratch_shapes=[pltpu.VMEM((c_max, n_frame + tail), jnp.float32)],
        input_output_aliases={1: 1, 2: 2},   # hidden states updated in place
        compiler_params=pltpu.CompilerParams(
            dimension_semantics=("parallel",)),
    )(x_flat, hse, hsi, conv_slab, vec_slab)

    # crop the ganglion output to its valid (h3, w3) window
    out = jnp.pad(fx_flat, ((0, 0), (0, 0), (0, n_frame - n_g)))
    out = out.reshape(B, 1, H, W)[:, :, :h3, :w3]
    return out, (hse_new, hsi_new)


# --- hidden-state layout conversion (sequence boundaries ONLY, not per step) --

def embed_hidden(hs, H, W, h1, w1):
    """(B, 4, C, h1*w1) -> padded kernel layout (B, 4, C, H*W), garbage lanes = 0."""
    B, S, C, _ = hs.shape
    h = hs.astype(jnp.float32).reshape(B, S, C, h1, w1)
    h = jnp.pad(h, ((0, 0), (0, 0), (0, 0), (0, H - h1), (0, W - w1)))
    return h.reshape(B, S, C, H * W)


def extract_hidden(hp, H, W, h1, w1):
    """padded kernel layout (B, 4, C, H*W) -> (B, 4, C, h1*w1)."""
    B, S, C, _ = hp.shape
    return hp.reshape(B, S, C, H, W)[:, :, :, :h1, :w1].reshape(B, S, C, h1 * w1)


# --------------------------------------------------------------------------
# Parameter initialisation (deterministic, packed into 2 slabs)
# --------------------------------------------------------------------------

def init_params(key, *, chans, img_shape, ksizes):
    c_in, H, W = img_shape
    c0, c1 = chans
    layout, total_cols, _, _ = _conv_layout(chans, img_shape, ksizes)
    c_max = max(c_in, c0, c1, 8)

    keys = iter(jax.random.split(key, 64))

    def u(shape, lo=-0.1, hi=0.1):
        return jax.random.uniform(next(keys), shape, jnp.float32, lo, hi)

    def r01(shape):
        return jax.random.uniform(next(keys), shape, jnp.float32, 0.0, 1.0)

    def packw(w):   # (C_out, C_in, kh, kw) -> (C_out, kh*kw*C_in), tap-major
        co, ci, kh, kw = w.shape
        return jnp.transpose(w, (0, 2, 3, 1)).reshape(co, kh * kw * ci)

    conv_slab = jnp.zeros((c_max, total_cols), jnp.float32)
    for e in layout:
        w = packw(u((e["cout"], e["cin"], e["kh"], e["kw"])))
        conv_slab = conv_slab.at[:e["cout"], e["off"]:e["off"] + e["K"]].set(w)

    vec = jnp.zeros((c_max, _V_COLS), jnp.float32)
    vec = vec.at[:c0, _VC_BIP_B].set(u((c0,)))          # bipolar last-conv bias
    vec = vec.at[:c0, _VC_SCALE].set(jnp.ones((c0,)))   # ScaleShift init
    vec = vec.at[:c0, _VC_SHIFT].set(jnp.zeros((c0,)))
    vec = vec.at[:c0, _VC_KW_INH].set(r01((c0,)))       # kinetics_w_inh
    vec = vec.at[:c0, _VC_KB_INH].set(r01((c0,)))       # kinetics_b_inh
    vec = vec.at[:c0, _VC_KW_EXC].set(r01((c0,)))       # kinetics_w
    vec = vec.at[:c0, _VC_KB_EXC].set(r01((c0,)))       # kinetics_b
    vec = vec.at[:c1, _VC_AMA_B].set(u((c1,)))          # amacrine last-conv bias
    base = jnp.array([20.0, 16.0, 8.0, 2.0, 1.0], jnp.float32)  # ka,kfi,kfr,ksi,ksr
    vec = vec.at[:c0, _VC_K_EXC:_VC_K_EXC + 5].set(base[None, :] + 0.1 * r01((c0, 5)))
    vec = vec.at[0, _VC_INH_B].set(u(()))                # bipolar_inh conv bias
    vec = vec.at[0:5, _VC_K_INH].set(base + 0.1 * r01((5,)))
    return conv_slab, vec


# --------------------------------------------------------------------------
# Driver
# --------------------------------------------------------------------------

if __name__ == "__main__":
    chans = (8, 8)
    img_shape = (4, 16, 16)     # small (C, H, W) consistent with the module
    ksizes = (7, 5)
    dt = 0.01
    B = 2
    T = 3                       # timesteps, to exercise the recurrent state

    c_in, H, W = img_shape
    k0, k1 = ksizes
    h1, w1 = H - k0 + 1, W - k0 + 1
    h2, w2 = h1 - k1 + 1, w1 - k1 + 1
    h3, w3 = h2 - k1 + 1, w2 - k1 + 1
    N1 = h1 * w1

    key = jax.random.PRNGKey(0)
    pkey, xkey, hekey, hikey = jax.random.split(key, 4)
    conv_slab, vec_slab = init_params(pkey, chans=chans, img_shape=img_shape,
                                      ksizes=ksizes)

    x_seq = jax.random.uniform(xkey, (T, B) + img_shape, jnp.float32, -1.0, 1.0)
    hs_exc = jax.random.uniform(hekey, (B, 4, chans[0], N1), jnp.float32)
    hs_inh = jax.random.uniform(hikey, (B, 4, 1, N1), jnp.float32)

    # hidden state lives in the kernel's padded frame layout across timesteps;
    # conversion happens only at the sequence boundaries.
    hse = embed_hidden(hs_exc, H, W, h1, w1)
    hsi = embed_hidden(hs_inh, H, W, h1, w1)

    fwd = jax.jit(functools.partial(kinetics_forward, chans=chans,
                                    img_shape=img_shape, ksizes=ksizes, dt=dt))

    out = None
    for t in range(T):
        out, (hse, hsi) = fwd(conv_slab, vec_slab, x_seq[t], (hse, hsi))
    jax.block_until_ready(out)

    h_exc = extract_hidden(hse, H, W, h1, w1)
    h_inh = extract_hidden(hsi, H, W, h1, w1)

    assert out.shape == (B, 1, h3, w3), out.shape
    assert h_exc.shape == (B, 4, chans[0], N1), h_exc.shape
    assert h_inh.shape == (B, 4, 1, N1), h_inh.shape
    assert bool(jnp.all(jnp.isfinite(out)))
    assert bool(jnp.all(jnp.isfinite(h_exc)))
    assert bool(jnp.all(jnp.isfinite(h_inh)))
    print("KERNEL_OK")
</pallas_src>

<mosaic_0001>
module attributes {stable_mosaic.version = 11 : i64} {
  func.func @kernel(%arg0: i32, %arg1: memref<1x4x256xf32, #tpu.memory_space<vmem>>, %arg2: memref<1x4x8x256xf32, #tpu.memory_space<vmem>>, %arg3: memref<1x4x1x256xf32, #tpu.memory_space<vmem>>, %arg4: memref<8x1152xf32, #tpu.memory_space<vmem>>, %arg5: memref<8x16xf32, #tpu.memory_space<vmem>>, %arg6: memref<1x1x128xf32, #tpu.memory_space<vmem>>, %arg7: memref<1x4x8x256xf32, #tpu.memory_space<vmem>>, %arg8: memref<1x4x1x256xf32, #tpu.memory_space<vmem>>, %arg9: memref<8x384xf32, #tpu.memory_space<vmem>>) attributes {dimension_semantics = [#tpu.dimension_semantics<parallel>], iteration_bounds = array<i64: 2>, scalar_prefetch = 0 : i64, scratch_operands = 1 : i64, tpu.core_type = #tpu.core_type<tc>, window_params = [{transform_indices = @transform_0, window_bounds = array<i64: 1, 4, 256>}, {transform_indices = @transform_1, window_bounds = array<i64: 1, 4, 8, 256>}, {transform_indices = @transform_2, window_bounds = array<i64: 1, 4, 1, 256>}, {pipeline_mode = #tpu.pipeline_mode<synchronous>, transform_indices = @transform_3, window_bounds = array<i64: 8, 1152>}, {pipeline_mode = #tpu.pipeline_mode<synchronous>, transform_indices = @transform_4, window_bounds = array<i64: 8, 16>}, {transform_indices = @transform_5, window_bounds = array<i64: 1, 1, 128>}, {transform_indices = @transform_6, window_bounds = array<i64: 1, 4, 8, 256>}, {transform_indices = @transform_7, window_bounds = array<i64: 1, 4, 1, 256>}]} {
    %cst = arith.constant 0.000000e+00 : f32
    %0 = vector.broadcast %cst : f32 to vector<8x128xf32>
    %c0 = arith.constant 0 : index
    %c256 = arith.constant 256 : index
    %1 = vector.load %arg9[%c0, %c256] : memref<8x384xf32, #tpu.memory_space<vmem>>, vector<8x128xf32>
    tpu.vector_store %arg9[%c0, %c256], %0 {strides = array<i32>} : memref<8x384xf32, #tpu.memory_space<vmem>>, vector<8x128xf32>,
    %c0_0 = arith.constant 0 : index
    %c0_1 = arith.constant 0 : index
    %2 = vector.load %arg5[%c0_0, %c0_1] : memref<8x16xf32, #tpu.memory_space<vmem>>, vector<8x16xf32>
    %3 = vector.extract_strided_slice %2 {offsets = [0, 0], sizes = [8, 1], strides = [1, 1]} : vector<8x16xf32> to vector<8x1xf32>
    %4 = vector.extract_strided_slice %2 {offsets = [0, 1], sizes = [8, 1], strides = [1, 1]} : vector<8x16xf32> to vector<8x1xf32>
    %5 = vector.extract_strided_slice %2 {offsets = [0, 2], sizes = [8, 1], strides = [1, 1]} : vector<8x16xf32> to vector<8x1xf32>
    %6 = vector.extract_strided_slice %2 {offsets = [0, 3], sizes = [8, 1], strides = [1, 1]} : vector<8x16xf32> to vector<8x1xf32>
    %7 = vector.extract_strided_slice %2 {offsets = [0, 4], sizes = [8, 1], strides = [1, 1]} : vector<8x16xf32> to vector<8x1xf32>
    %8 = vector.extract_strided_slice %2 {offsets = [0, 5], sizes = [8, 1], strides = [1, 1]} : vector<8x16xf32> to vector<8x1xf32>
    %9 = vector.extract_strided_slice %2 {offsets = [0, 6], sizes = [8, 1], strides = [1, 1]} : vector<8x16xf32> to vector<8x1xf32>
    %10 = vector.extract_strided_slice %2 {offsets = [0, 7], sizes = [8, 1], strides = [1, 1]} : vector<8x16xf32> to vector<8x1xf32>
    %11 = vector.extract_strided_slice %2 {offsets = [0, 8], sizes = [8, 1], strides = [1, 1]} : vector<8x16xf32> to vector<8x1xf32>
    %12 = vector.extract_strided_slice %2 {offsets = [0, 9], sizes = [8, 1], strides = [1, 1]} : vector<8x16xf32> to vector<8x1xf32>
    %13 = vector.extract_strided_slice %2 {offsets = [0, 10], sizes = [8, 1], strides = [1, 1]} : vector<8x16xf32> to vector<8x1xf32>
    %14 = vector.extract_strided_slice %2 {offsets = [0, 11], sizes = [8, 1], strides = [1, 1]} : vector<8x16xf32> to vector<8x1xf32>
    %15 = vector.extract_strided_slice %2 {offsets = [0, 12], sizes = [8, 1], strides = [1, 1]} : vector<8x16xf32> to vector<8x1xf32>
    %16 = vector.extract_strided_slice %2 {offsets = [0, 13], sizes = [1, 1], strides = [1, 1]} : vector<8x16xf32> to vector<1x1xf32>
    %17 = vector.extract_strided_slice %2 {offsets = [0, 14], sizes = [1, 1], strides = [1, 1]} : vector<8x16xf32> to vector<1x1xf32>
    %18 = vector.extract_strided_slice %2 {offsets = [1, 14], sizes = [1, 1], strides = [1, 1]} : vector<8x16xf32> to vector<1x1xf32>
    %19 = vector.extract_strided_slice %2 {offsets = [2, 14], sizes = [1, 1], strides = [1, 1]} : vector<8x16xf32> to vector<1x1xf32>
    %20 = vector.extract_strided_slice %2 {offsets = [3, 14], sizes = [1, 1], strides = [1, 1]} : vector<8x16xf32> to vector<1x1xf32>
    %21 = vector.extract_strided_slice %2 {offsets = [4, 14], sizes = [1, 1], strides = [1, 1]} : vector<8x16xf32> to vector<1x1xf32>
    %c0_2 = arith.constant 0 : index
    %c0_3 = arith.constant 0 : index
    %c0_4 = arith.constant 0 : index
    %22 = vector.load %arg1[%c0_2, %c0_3, %c0_4] : memref<1x4x256xf32, #tpu.memory_space<vmem>>, vector<1x4x256xf32>
    %23 = vector.shape_cast %22 : vector<1x4x256xf32> to vector<4x256xf32>
    %c0_5 = arith.constant 0 : index
    %c0_6 = arith.constant 0 : index
    %24 = vector.load %arg9[%c0_5, %c0_6] : memref<8x384xf32, #tpu.memory_space<vmem>>, vector<4x256xf32>
    tpu.vector_store %arg9[%c0_5, %c0_6], %23 {strides = array<i32>} : memref<8x384xf32, #tpu.memory_space<vmem>>, vector<4x256xf32>,
    %c0_7 = arith.constant 0 : index
    %c384 = arith.constant 384 : index
    %25 = vector.load %arg4[%c0_7, %c384] : memref<8x1152xf32, #tpu.memory_space<vmem>>, vector<1x196xf32>
    %c0_8 = arith.constant 0 : index
    %c0_9 = arith.constant 0 : index
    %26 = vector.load %arg9[%c0_8, %c0_9] : memref<8x384xf32, #tpu.memory_space<vmem>>, vector<4x256xf32>
    %c0_10 = arith.constant 0 : index
    %c1 = arith.constant 1 : index
    %27 = vector.load %arg9[%c0_10, %c1] : memref<8x384xf32, #tpu.memory_space<vmem>>, vector<4x256xf32>
    %c0_11 = arith.constant 0 : index
    %c2 = arith.constant 2 : index
    %28 = vector.load %arg9[%c0_11, %c2] : memref<8x384xf32, #tpu.memory_space<vmem>>, vector<4x256xf32>
    %c0_12 = arith.constant 0 : index
    %c3 = arith.constant 3 : index
    %29 = vector.load %arg9[%c0_12, %c3] : memref<8x384xf32, #tpu.memory_space<vmem>>, vector<4x256xf32>
    %c0_13 = arith.constant 0 : index
    %c4 = arith.constant 4 : index
    %30 = vector.load %arg9[%c0_13, %c4] : memref<8x384xf32, #tpu.memory_space<vmem>>, vector<4x256xf32>
    %c0_14 = arith.constant 0 : index
    %c5 = arith.constant 5 : index
    %31 = vector.load %arg9[%c0_14, %c5] : memref<8x384xf32, #tpu.memory_space<vmem>>, vector<4x256xf32>
    %c0_15 = arith.constant 0 : index
    %c6 = arith.constant 6 : index
    %32 = vector.load %arg9[%c0_15, %c6] : memref<8x384xf32, #tpu.memory_space<vmem>>, vector<4x256xf32>
    %33 = tpu.concatenate %26, %27, %28, %29, %30, %31, %32 in 0 : vector<4x256xf32>, vector<4x256xf32>, vector<4x256xf32>, vector<4x256xf32>, vector<4x256xf32>, vector<4x256xf32>, vector<4x256xf32> -> vector<28x256xf32>
    %34 = vector.extract_strided_slice %25 {offsets = [0, 0], sizes = [1, 28], strides = [1, 1]} : vector<1x196xf32> to vector<1x28xf32>
    %cst_16 = arith.constant dense<0.000000e+00> : vector<1x256xf32>
    %35 = tpu.matmul %34, %33, %cst_16 {dimension_numbers = #tpu.dot_dimension_numbers<[1], [0], [0], [1], [0, 0, 1, 1], [], []>} : vector<1x28xf32>, vector<28x256xf32>, vector<1x256xf32> -> vector<1x256xf32>
    %c0_17 = arith.constant 0 : index
    %c16 = arith.constant 16 : index
    %36 = vector.load %arg9[%c0_17, %c16] : memref<8x384xf32, #tpu.memory_space<vmem>>, vector<4x256xf32>
    %c0_18 = arith.constant 0 : index
    %c17 = arith.constant 17 : index
    %37 = vector.load %arg9[%c0_18, %c17] : memref<8x384xf32, #tpu.memory_space<vmem>>, vector<4x256xf32>
    %c0_19 = arith.constant 0 : index
    %c18 = arith.constant 18 : index
    %38 = vector.load %arg9[%c0_19, %c18] : memref<8x384xf32, #tpu.memory_space<vmem>>, vector<4x256xf32>
    %c0_20 = arith.constant 0 : index
    %c19 = arith.constant 19 : index
    %39 = vector.load %arg9[%c0_20, %c19] : memref<8x384xf32, #tpu.memory_space<vmem>>, vector<4x256xf32>
    %c0_21 = arith.constant 0 : index
    %c20 = arith.constant 20 : index
    %40 = vector.load %arg9[%c0_21, %c20] : memref<8x384xf32, #tpu.memory_space<vmem>>, vector<4x256xf32>
    %c0_22 = arith.constant 0 : index
    %c21 = arith.constant 21 : index
    %41 = vector.load %arg9[%c0_22, %c21] : memref<8x384xf32, #tpu.memory_space<vmem>>, vector<4x256xf32>
    %c0_23 = arith.constant 0 : index
    %c22 = arith.constant 22 : index
    %42 = vector.load %arg9[%c0_23, %c22] : memref<8x384xf32, #tpu.memory_space<vmem>>, vector<4x256xf32>
    %43 = tpu.concatenate %36, %37, %38, %39, %40, %41, %42 in 0 : vector<4x256xf32>, vector<4x256xf32>, vector<4x256xf32>, vector<4x256xf32>, vector<4x256xf32>, vector<4x256xf32>, vector<4x256xf32> -> vector<28x256xf32>
    %44 = vector.extract_strided_slice %25 {offsets = [0, 28], sizes = [1, 28], strides = [1, 1]} : vector<1x196xf32> to vector<1x28xf32>
    %cst_24 = arith.constant dense<0.000000e+00> : vector<1x256xf32>
    %45 = tpu.matmul %44, %43, %cst_24 {dimension_numbers = #tpu.dot_dimension_numbers<[1], [0], [0], [1], [0, 0, 1, 1], [], []>} : vector<1x28xf32>, vector<28x256xf32>, vector<1x256xf32> -> vector<1x256xf32>
    %46 = arith.addf %35, %45 : vector<1x256xf32>
    %c0_25 = arith.constant 0 : index
    %c32 = arith.constant 32 : index
    %47 = vector.load %arg9[%c0_25, %c32] : memref<8x384xf32, #tpu.memory_space<vmem>>, vector<4x256xf32>
    %c0_26 = arith.constant 0 : index
    %c33 = arith.constant 33 : index
    %48 = vector.load %arg9[%c0_26, %c33] : memref<8x384xf32, #tpu.memory_space<vmem>>, vector<4x256xf32>
    %c0_27 = arith.constant 0 : index
    %c34 = arith.constant 34 : index
    %49 = vector.load %arg9[%c0_27, %c34] : memref<8x384xf32, #tpu.memory_space<vmem>>, vector<4x256xf32>
    %c0_28 = arith.constant 0 : index
    %c35 = arith.constant 35 : index
    %50 = vector.load %arg9[%c0_28, %c35] : memref<8x384xf32, #tpu.memory_space<vmem>>, vector<4x256xf32>
    %c0_29 = arith.constant 0 : index
    %c36 = arith.constant 36 : index
    %51 = vector.load %arg9[%c0_29, %c36] : memref<8x384xf32, #tpu.memory_space<vmem>>, vector<4x256xf32>
    %c0_30 = arith.constant 0 : index
    %c37 = arith.constant 37 : index
    %52 = vector.load %arg9[%c0_30, %c37] : memref<8x384xf32, #tpu.memory_space<vmem>>, vector<4x256xf32>
    %c0_31 = arith.constant 0 : index
    %c38 = arith.constant 38 : index
    %53 = vector.load %arg9[%c0_31, %c38] : memref<8x384xf32, #tpu.memory_space<vmem>>, vector<4x256xf32>
    %54 = tpu.concatenate %47, %48, %49, %50, %51, %52, %53 in 0 : vector<4x256xf32>, vector<4x256xf32>, vector<4x256xf32>, vector<4x256xf32>, vector<4x256xf32>, vector<4x256xf32>, vector<4x256xf32> -> vector<28x256xf32>
    %55 = vector.extract_strided_slice %25 {offsets = [0, 56], sizes = [1, 28], strides = [1, 1]} : vector<1x196xf32> to vector<1x28xf32>
    %cst_32 = arith.constant dense<0.000000e+00> : vector<1x256xf32>
    %56 = tpu.matmul %55, %54, %cst_32 {dimension_numbers = #tpu.dot_dimension_numbers<[1], [0], [0], [1], [0, 0, 1, 1], [], []>} : vector<1x28xf32>, vector<28x256xf32>, vector<1x256xf32> -> vector<1x256xf32>
    %57 = arith.addf %46, %56 : vector<1x256xf32>
    %c0_33 = arith.constant 0 : index
    %c48 = arith.constant 48 : index
    %58 = vector.load %arg9[%c0_33, %c48] : memref<8x384xf32, #tpu.memory_space<vmem>>, vector<4x256xf32>
    %c0_34 = arith.constant 0 : index
    %c49 = arith.constant 49 : index
    %59 = vector.load %arg9[%c0_34, %c49] : memref<8x384xf32, #tpu.memory_space<vmem>>, vector<4x256xf32>
    %c0_35 = arith.constant 0 : index
    %c50 = arith.constant 50 : index
    %60 = vector.load %arg9[%c0_35, %c50] : memref<8x384xf32, #tpu.memory_space<vmem>>, vector<4x256xf32>
    %c0_36 = arith.constant 0 : index
    %c51 = arith.constant 51 : index
    %61 = vector.load %arg9[%c0_36, %c51] : memref<8x384xf32, #tpu.memory_space<vmem>>, vector<4x256xf32>
    %c0_37 = arith.constant 0 : index
    %c52 = arith.constant 52 : index
    %62 = vector.load %arg9[%c0_37, %c52] : memref<8x384xf32, #tpu.memory_space<vmem>>, vector<4x256xf32>
    %c0_38 = arith.constant 0 : index
    %c53 = arith.constant 53 : index
    %63 = vector.load %arg9[%c0_38, %c53] : memref<8x384xf32, #tpu.memory_space<vmem>>, vector<4x256xf32>
    %c0_39 = arith.constant 0 : index
    %c54 = arith.constant 54 : index
    %64 = vector.load %arg9[%c0_39, %c54] : memref<8x384xf32, #tpu.memory_space<vmem>>, vector<4x256xf32>
    %65 = tpu.concatenate %58, %59, %60, %61, %62, %63, %64 in 0 : vector<4x256xf32>, vector<4x256xf32>, vector<4x256xf32>, vector<4x256xf32>, vector<4x256xf32>, vector<4x256xf32>, vector<4x256xf32> -> vector<28x256xf32>
    %66 = vector.extract_strided_slice %25 {offsets = [0, 84], sizes = [1, 28], strides = [1, 1]} : vector<1x196xf32> to vector<1x28xf32>
    %cst_40 = arith.constant dense<0.000000e+00> : vector<1x256xf32>
    %67 = tpu.matmul %66, %65, %cst_40 {dimension_numbers = #tpu.dot_dimension_numbers<[1], [0], [0], [1], [0, 0, 1, 1], [], []>} : vector<1x28xf32>, vector<28x256xf32>, vector<1x256xf32> -> vector<1x256xf32>
    %68 = arith.addf %57, %67 : vector<1x256xf32>
    %c0_41 = arith.constant 0 : index
    %c64 = arith.constant 64 : index
    %69 = vector.load %arg9[%c0_41, %c64] : memref<8x384xf32, #tpu.memory_space<vmem>>, vector<4x256xf32>
    %c0_42 = arith.constant 0 : index
    %c65 = arith.constant 65 : index
    %70 = vector.load %arg9[%c0_42, %c65] : memref<8x384xf32, #tpu.memory_space<vmem>>, vector<4x256xf32>
    %c0_43 = arith.constant 0 : index
    %c66 = arith.constant 66 : index
    %71 = vector.load %arg9[%c0_43, %c66] : memref<8x384xf32, #tpu.memory_space<vmem>>, vector<4x256xf32>
    %c0_44 = arith.constant 0 : index
    %c67 = arith.constant 67 : index
    %72 = vector.load %arg9[%c0_44, %c67] : memref<8x384xf32, #tpu.memory_space<vmem>>, vector<4x256xf32>
    %c0_45 = arith.constant 0 : index
    %c68 = arith.constant 68 : index
    %73 = vector.load %arg9[%c0_45, %c68] : memref<8x384xf32, #tpu.memory_space<vmem>>, vector<4x256xf32>
    %c0_46 = arith.constant 0 : index
    %c69 = arith.constant 69 : index
    %74 = vector.load %arg9[%c0_46, %c69] : memref<8x384xf32, #tpu.memory_space<vmem>>, vector<4x256xf32>
    %c0_47 = arith.constant 0 : index
    %c70 = arith.constant 70 : index
    %75 = vector.load %arg9[%c0_47, %c70] : memref<8x384xf32, #tpu.memory_space<vmem>>, vector<4x256xf32>
    %76 = tpu.concatenate %69, %70, %71, %72, %73, %74, %75 in 0 : vector<4x256xf32>, vector<4x256xf32>, vector<4x256xf32>, vector<4x256xf32>, vector<4x256xf32>, vector<4x256xf32>, vector<4x256xf32> -> vector<28x256xf32>
    %77 = vector.extract_strided_slice %25 {offsets = [0, 112], sizes = [1, 28], strides = [1, 1]} : vector<1x196xf32> to vector<1x28xf32>
    %cst_48 = arith.constant dense<0.000000e+00> : vector<1x256xf32>
    %78 = tpu.matmul %77, %76, %cst_48 {dimension_numbers = #tpu.dot_dimension_numbers<[1], [0], [0], [1], [0, 0, 1, 1], [], []>} : vector<1x28xf32>, vector<28x256xf32>, vector<1x256xf32> -> vector<1x256xf32>
    %79 = arith.addf %68, %78 : vector<1x256xf32>
    %c0_49 = arith.constant 0 : index
    %c80 = arith.constant 80 : index
    %80 = vector.load %arg9[%c0_49, %c80] : memref<8x384xf32, #tpu.memory_space<vmem>>, vector<4x256xf32>
    %c0_50 = arith.constant 0 : index
    %c81 = arith.constant 81 : index
    %81 = vector.load %arg9[%c0_50, %c81] : memref<8x384xf32, #tpu.memory_space<vmem>>, vector<4x256xf32>
    %c0_51 = arith.constant 0 : index
    %c82 = arith.constant 82 : index
    %82 = vector.load %arg9[%c0_51, %c82] : memref<8x384xf32, #tpu.memory_space<vmem>>, vector<4x256xf32>
    %c0_52 = arith.constant 0 : index
    %c83 = arith.constant 83 : index
    %83 = vector.load %arg9[%c0_52, %c83] : memref<8x384xf32, #tpu.memory_space<vmem>>, vector<4x256xf32>
    %c0_53 = arith.constant 0 : index
    %c84 = arith.constant 84 : index
    %84 = vector.load %arg9[%c0_53, %c84] : memref<8x384xf32, #tpu.memory_space<vmem>>, vector<4x256xf32>
    %c0_54 = arith.constant 0 : index
    %c85 = arith.constant 85 : index
    %85 = vector.load %arg9[%c0_54, %c85] : memref<8x384xf32, #tpu.memory_space<vmem>>, vector<4x256xf32>
    %c0_55 = arith.constant 0 : index
    %c86 = arith.constant 86 : index
    %86 = vector.load %arg9[%c0_55, %c86] : memref<8x384xf32, #tpu.memory_space<vmem>>, vector<4x256xf32>
    %87 = tpu.concatenate %80, %81, %82, %83, %84, %85, %86 in 0 : vector<4x256xf32>, vector<4x256xf32>, vector<4x256xf32>, vector<4x256xf32>, vector<4x256xf32>, vector<4x256xf32>, vector<4x256xf32> -> vector<28x256xf32>
    %88 = vector.extract_strided_slice %25 {offsets = [0, 140], sizes = [1, 28], strides = [1, 1]} : vector<1x196xf32> to vector<1x28xf32>
    %cst_56 = arith.constant dense<0.000000e+00> : vector<1x256xf32>
    %89 = tpu.matmul %88, %87, %cst_56 {dimension_numbers = #tpu.dot_dimension_numbers<[1], [0], [0], [1], [0, 0, 1, 1], [], []>} : vector<1x28xf32>, vector<28x256xf32>, vector<1x256xf32> -> vector<1x256xf32>
    %90 = arith.addf %79, %89 : vector<1x256xf32>
    %c0_57 = arith.constant 0 : index
    %c96 = arith.constant 96 : index
    %91 = vector.load %arg9[%c0_57, %c96] : memref<8x384xf32, #tpu.memory_space<vmem>>, vector<4x256xf32>
    %c0_58 = arith.constant 0 : index
    %c97 = arith.constant 97 : index
    %92 = vector.load %arg9[%c0_58, %c97] : memref<8x384xf32, #tpu.memory_space<vmem>>, vector<4x256xf32>
    %c0_59 = arith.constant 0 : index
    %c98 = arith.constant 98 : index
    %93 = vector.load %arg9[%c0_59, %c98] : memref<8x384xf32, #tpu.memory_space<vmem>>, vector<4x256xf32>
    %c0_60 = arith.constant 0 : index
    %c99 = arith.constant 99 : index
    %94 = vector.load %arg9[%c0_60, %c99] : memref<8x384xf32, #tpu.memory_space<vmem>>, vector<4x256xf32>
    %c0_61 = arith.constant 0 : index
    %c100 = arith.constant 100 : index
    %95 = vector.load %arg9[%c0_61, %c100] : memref<8x384xf32, #tpu.memory_space<vmem>>, vector<4x256xf32>
    %c0_62 = arith.constant 0 : index
    %c101 = arith.constant 101 : index
    %96 = vector.load %arg9[%c0_62, %c101] : memref<8x384xf32, #tpu.memory_space<vmem>>, vector<4x256xf32>
    %c0_63 = arith.constant 0 : index
    %c102 = arith.constant 102 : index
    %97 = vector.load %arg9[%c0_63, %c102] : memref<8x384xf32, #tpu.memory_space<vmem>>, vector<4x256xf32>
    %98 = tpu.concatenate %91, %92, %93, %94, %95, %96, %97 in 0 : vector<4x256xf32>, vector<4x256xf32>, vector<4x256xf32>, vector<4x256xf32>, vector<4x256xf32>, vector<4x256xf32>, vector<4x256xf32> -> vector<28x256xf32>
    %99 = vector.extract_strided_slice %25 {offsets = [0, 168], sizes = [1, 28], strides = [1, 1]} : vector<1x196xf32> to vector<1x28xf32>
    %cst_64 = arith.constant dense<0.000000e+00> : vector<1x256xf32>
    %100 = tpu.matmul %99, %98, %cst_64 {dimension_numbers = #tpu.dot_dimension_numbers<[1], [0], [0], [1], [0, 0, 1, 1], [], []>} : vector<1x28xf32>, vector<28x256xf32>, vector<1x256xf32> -> vector<1x256xf32>
    %101 = arith.addf %90, %100 : vector<1x256xf32>
    %102 = vector.broadcast %16 : vector<1x1xf32> to vector<1x256xf32>
    %103 = arith.addf %101, %102 : vector<1x256xf32>
    %cst_65 = arith.constant 0.000000e+00 : f32
    %104 = vector.broadcast %cst_65 : f32 to vector<1x256xf32>
    %105 = arith.subf %104, %103 : vector<1x256xf32>
    %106 = math.exp %105 : vector<1x256xf32>
    %cst_66 = arith.constant 1.000000e+00 : f32
    %107 = vector.broadcast %cst_66 : f32 to vector<1x256xf32>
    %108 = arith.addf %107, %106 : vector<1x256xf32>
    %cst_67 = arith.constant 1.000000e+00 : f32
    %109 = vector.broadcast %cst_67 : f32 to vector<1x256xf32>
    %110 = arith.divf %109, %108 : vector<1x256xf32>
    %c0_68 = arith.constant 0 : index
    %c0_69 = arith.constant 0 : index
    %111 = vector.load %arg4[%c0_68, %c0_69] : memref<8x1152xf32, #tpu.memory_space<vmem>>, vector<8x36xf32>
    %c0_70 = arith.constant 0 : index
    %c0_71 = arith.constant 0 : index
    %112 = vector.load %arg9[%c0_70, %c0_71] : memref<8x384xf32, #tpu.memory_space<vmem>>, vector<4x256xf32>
    %c0_72 = arith.constant 0 : index
    %c1_73 = arith.constant 1 : index
    %113 = vector.load %arg9[%c0_72, %c1_73] : memref<8x384xf32, #tpu.memory_space<vmem>>, vector<4x256xf32>
    %c0_74 = arith.constant 0 : index
    %c2_75 = arith.constant 2 : index
    %114 = vector.load %arg9[%c0_74, %c2_75] : memref<8x384xf32, #tpu.memory_space<vmem>>, vector<4x256xf32>
    %c0_76 = arith.constant 0 : index
    %c16_77 = arith.constant 16 : index
    %115 = vector.load %arg9[%c0_76, %c16_77] : memref<8x384xf32, #tpu.memory_space<vmem>>, vector<4x256xf32>
    %c0_78 = arith.constant 0 : index
    %c17_79 = arith.constant 17 : index
    %116 = vector.load %arg9[%c0_78, %c17_79] : memref<8x384xf32, #tpu.memory_space<vmem>>, vector<4x256xf32>
    %c0_80 = arith.constant 0 : index
    %c18_81 = arith.constant 18 : index
    %117 = vector.load %arg9[%c0_80, %c18_81] : memref<8x384xf32, #tpu.memory_space<vmem>>, vector<4x256xf32>
    %c0_82 = arith.constant 0 : index
    %c32_83 = arith.constant 32 : index
    %118 = vector.load %arg9[%c0_82, %c32_83] : memref<8x384xf32, #tpu.memory_space<vmem>>, vector<4x256xf32>
    %c0_84 = arith.constant 0 : index
    %c33_85 = arith.constant 33 : index
    %119 = vector.load %arg9[%c0_84, %c33_85] : memref<8x384xf32, #tpu.memory_space<vmem>>, vector<4x256xf32>
    %c0_86 = arith.constant 0 : index
    %c34_87 = arith.constant 34 : index
    %120 = vector.load %arg9[%c0_86, %c34_87] : memref<8x384xf32, #tpu.memory_space<vmem>>, vector<4x256xf32>
    %121 = tpu.concatenate %112, %113, %114, %115, %116, %117, %118, %119, %120 in 0 : vector<4x256xf32>, vector<4x256xf32>, vector<4x256xf32>, vector<4x256xf32>, vector<4x256xf32>, vector<4x256xf32>, vector<4x256xf32>, vector<4x256xf32>, vector<4x256xf32> -> vector<36x256xf32>
    %cst_88 = arith.constant dense<0.000000e+00> : vector<8x256xf32>
    %122 = tpu.matmul %111, %121, %cst_88 {dimension_numbers = #tpu.dot_dimension_numbers<[1], [0], [0], [1], [0, 0, 1, 1], [], []>} : vector<8x36xf32>, vector<36x256xf32>, vector<8x256xf32> -> vector<8x256xf32>
    %c0_89 = arith.constant 0 : index
    %c0_90 = arith.constant 0 : index
    %123 = vector.load %arg9[%c0_89, %c0_90] : memref<8x384xf32, #tpu.memory_space<vmem>>, vector<8x256xf32>
    tpu.vector_store %arg9[%c0_89, %c0_90], %122 {strides = array<i32>} : memref<8x384xf32, #tpu.memory_space<vmem>>, vector<8x256xf32>,
    %c0_91 = arith.constant 0 : index
    %c128 = arith.constant 128 : index
    %124 = vector.load %arg4[%c0_91, %c128] : memref<8x1152xf32, #tpu.memory_space<vmem>>, vector<8x72xf32>
    %c0_92 = arith.constant 0 : index
    %c0_93 = arith.constant 0 : index
    %125 = vector.load %arg9[%c0_92, %c0_93] : memref<8x384xf32, #tpu.memory_space<vmem>>, vector<8x256xf32>
    %c0_94 = arith.constant 0 : index
    %c1_95 = arith.constant 1 : index
    %126 = vector.load %arg9[%c0_94, %c1_95] : memref<8x384xf32, #tpu.memory_space<vmem>>, vector<8x256xf32>
    %c0_96 = arith.constant 0 : index
    %c2_97 = arith.constant 2 : index
    %127 = vector.load %arg9[%c0_96, %c2_97] : memref<8x384xf32, #tpu.memory_space<vmem>>, vector<8x256xf32>
    %c0_98 = arith.constant 0 : index
    %c16_99 = arith.constant 16 : index
    %128 = vector.load %arg9[%c0_98, %c16_99] : memref<8x384xf32, #tpu.memory_space<vmem>>, vector<8x256xf32>
    %c0_100 = arith.constant 0 : index
    %c17_101 = arith.constant 17 : index
    %129 = vector.load %arg9[%c0_100, %c17_101] : memref<8x384xf32, #tpu.memory_space<vmem>>, vector<8x256xf32>
    %c0_102 = arith.constant 0 : index
    %c18_103 = arith.constant 18 : index
    %130 = vector.load %arg9[%c0_102, %c18_103] : memref<8x384xf32, #tpu.memory_space<vmem>>, vector<8x256xf32>
    %c0_104 = arith.constant 0 : index
    %c32_105 = arith.constant 32 : index
    %131 = vector.load %arg9[%c0_104, %c32_105] : memref<8x384xf32, #tpu.memory_space<vmem>>, vector<8x256xf32>
    %c0_106 = arith.constant 0 : index
    %c33_107 = arith.constant 33 : index
    %132 = vector.load %arg9[%c0_106, %c33_107] : memref<8x384xf32, #tpu.memory_space<vmem>>, vector<8x256xf32>
    %c0_108 = arith.constant 0 : index
    %c34_109 = arith.constant 34 : index
    %133 = vector.load %arg9[%c0_108, %c34_109] : memref<8x384xf32, #tpu.memory_space<vmem>>, vector<8x256xf32>
    %134 = tpu.concatenate %125, %126, %127, %128, %129, %130, %131, %132, %133 in 0 : vector<8x256xf32>, vector<8x256xf32>, vector<8x256xf32>, vector<8x256xf32>, vector<8x256xf32>, vector<8x256xf32>, vector<8x256xf32>, vector<8x256xf32>, vector<8x256xf32> -> vector<72x256xf32>
    %cst_110 = arith.constant dense<0.000000e+00> : vector<8x256xf32>
    %135 = tpu.matmul %124, %134, %cst_110 {dimension_numbers = #tpu.dot_dimension_numbers<[1], [0], [0], [1], [0, 0, 1, 1], [], []>} : vector<8x72xf32>, vector<72x256xf32>, vector<8x256xf32> -> vector<8x256xf32>
    %c0_111 = arith.constant 0 : index
    %c0_112 = arith.constant 0 : index
    %136 = vector.load %arg9[%c0_111, %c0_112] : memref<8x384xf32, #tpu.memory_space<vmem>>, vector<8x256xf32>
    tpu.vector_store %arg9[%c0_111, %c0_112], %135 {strides = array<i32>} : memref<8x384xf32, #tpu.memory_space<vmem>>, vector<8x256xf32>,
    %c0_113 = arith.constant 0 : index
    %c256_114 = arith.constant 256 : index
    %137 = vector.load %arg4[%c0_113, %c256_114] : memref<8x1152xf32, #tpu.memory_space<vmem>>, vector<8x72xf32>
    %c0_115 = arith.constant 0 : index
    %c0_116 = arith.constant 0 : index
    %138 = vector.load %arg9[%c0_115, %c0_116] : memref<8x384xf32, #tpu.memory_space<vmem>>, vector<8x256xf32>
    %c0_117 = arith.constant 0 : index
    %c1_118 = arith.constant 1 : index
    %139 = vector.load %arg9[%c0_117, %c1_118] : memref<8x384xf32, #tpu.memory_space<vmem>>, vector<8x256xf32>
    %c0_119 = arith.constant 0 : index
    %c2_120 = arith.constant 2 : index
    %140 = vector.load %arg9[%c0_119, %c2_120] : memref<8x384xf32, #tpu.memory_space<vmem>>, vector<8x256xf32>
    %c0_121 = arith.constant 0 : index
    %c16_122 = arith.constant 16 : index
    %141 = vector.load %arg9[%c0_121, %c16_122] : memref<8x384xf32, #tpu.memory_space<vmem>>, vector<8x256xf32>
    %c0_123 = arith.constant 0 : index
    %c17_124 = arith.constant 17 : index
    %142 = vector.load %arg9[%c0_123, %c17_124] : memref<8x384xf32, #tpu.memory_space<vmem>>, vector<8x256xf32>
    %c0_125 = arith.constant 0 : index
    %c18_126 = arith.constant 18 : index
    %143 = vector.load %arg9[%c0_125, %c18_126] : memref<8x384xf32, #tpu.memory_space<vmem>>, vector<8x256xf32>
    %c0_127 = arith.constant 0 : index
    %c32_128 = arith.constant 32 : index
    %144 = vector.load %arg9[%c0_127, %c32_128] : memref<8x384xf32, #tpu.memory_space<vmem>>, vector<8x256xf32>
    %c0_129 = arith.constant 0 : index
    %c33_130 = arith.constant 33 : index
    %145 = vector.load %arg9[%c0_129, %c33_130] : memref<8x384xf32, #tpu.memory_space<vmem>>, vector<8x256xf32>
    %c0_131 = arith.constant 0 : index
    %c34_132 = arith.constant 34 : index
    %146 = vector.load %arg9[%c0_131, %c34_132] : memref<8x384xf32, #tpu.memory_space<vmem>>, vector<8x256xf32>
    %147 = tpu.concatenate %138, %139, %140, %141, %142, %143, %144, %145, %146 in 0 : vector<8x256xf32>, vector<8x256xf32>, vector<8x256xf32>, vector<8x256xf32>, vector<8x256xf32>, vector<8x256xf32>, vector<8x256xf32>, vector<8x256xf32>, vector<8x256xf32> -> vector<72x256xf32>
    %cst_133 = arith.constant dense<0.000000e+00> : vector<8x256xf32>
    %148 = tpu.matmul %137, %147, %cst_133 {dimension_numbers = #tpu.dot_dimension_numbers<[1], [0], [0], [1], [0, 0, 1, 1], [], []>} : vector<8x72xf32>, vector<72x256xf32>, vector<8x256xf32> -> vector<8x256xf32>
    %149 = vector.broadcast %3 : vector<8x1xf32> to vector<8x256xf32>
    %150 = arith.addf %148, %149 : vector<8x256xf32>
    %151 = vector.broadcast %4 : vector<8x1xf32> to vector<8x256xf32>
    %152 = arith.mulf %150, %151 : vector<8x256xf32>
    %153 = vector.broadcast %5 : vector<8x1xf32> to vector<8x256xf32>
    %154 = arith.addf %152, %153 : vector<8x256xf32>
    %c0_134 = arith.constant 0 : index
    %c0_135 = arith.constant 0 : index
    %c0_136 = arith.constant 0 : index
    %c0_137 = arith.constant 0 : index
    %155 = vector.load %arg3[%c0_134, %c0_135, %c0_136, %c0_137] : memref<1x4x1x256xf32, #tpu.memory_space<vmem>>, vector<1x1x1x256xf32>
    %156 = vector.shape_cast %155 : vector<1x1x1x256xf32> to vector<1x256xf32>
    %c0_138 = arith.constant 0 : index
    %c1_139 = arith.constant 1 : index
    %c0_140 = arith.constant 0 : index
    %c0_141 = arith.constant 0 : index
    %157 = vector.load %arg3[%c0_138, %c1_139, %c0_140, %c0_141] : memref<1x4x1x256xf32, #tpu.memory_space<vmem>>, vector<1x1x1x256xf32>
    %158 = vector.shape_cast %157 : vector<1x1x1x256xf32> to vector<1x256xf32>
    %c0_142 = arith.constant 0 : index
    %c2_143 = arith.constant 2 : index
    %c0_144 = arith.constant 0 : index
    %c0_145 = arith.constant 0 : index
    %159 = vector.load %arg3[%c0_142, %c2_143, %c0_144, %c0_145] : memref<1x4x1x256xf32, #tpu.memory_space<vmem>>, vector<1x1x1x256xf32>
    %160 = vector.shape_cast %159 : vector<1x1x1x256xf32> to vector<1x256xf32>
    %c0_146 = arith.constant 0 : index
    %c3_147 = arith.constant 3 : index
    %c0_148 = arith.constant 0 : index
    %c0_149 = arith.constant 0 : index
    %161 = vector.load %arg3[%c0_146, %c3_147, %c0_148, %c0_149] : memref<1x4x1x256xf32, #tpu.memory_space<vmem>>, vector<1x1x1x256xf32>
    %162 = vector.shape_cast %161 : vector<1x1x1x256xf32> to vector<1x256xf32>
    %163 = vector.broadcast %17 : vector<1x1xf32> to vector<1x256xf32>
    %164 = arith.mulf %163, %110 : vector<1x256xf32>
    %165 = vector.broadcast %19 : vector<1x1xf32> to vector<1x256xf32>
    %166 = arith.mulf %165, %160 : vector<1x256xf32>
    %167 = arith.mulf %164, %156 : vector<1x256xf32>
    %168 = arith.subf %166, %167 : vector<1x256xf32>
    %cst_150 = arith.constant 0.00999999977 : f32
    %169 = vector.broadcast %cst_150 : f32 to vector<1x256xf32>
    %170 = arith.mulf %169, %168 : vector<1x256xf32>
    %171 = arith.addf %156, %170 : vector<1x256xf32>
    %172 = arith.mulf %164, %156 : vector<1x256xf32>
    %173 = vector.broadcast %18 : vector<1x1xf32> to vector<1x256xf32>
    %174 = arith.mulf %173, %158 : vector<1x256xf32>
    %175 = arith.subf %172, %174 : vector<1x256xf32>
    %cst_151 = arith.constant 0.00999999977 : f32
    %176 = vector.broadcast %cst_151 : f32 to vector<1x256xf32>
    %177 = arith.mulf %176, %175 : vector<1x256xf32>
    %178 = arith.addf %158, %177 : vector<1x256xf32>
    %179 = vector.broadcast %18 : vector<1x1xf32> to vector<1x256xf32>
    %180 = arith.mulf %179, %158 : vector<1x256xf32>
    %181 = vector.broadcast %21 : vector<1x1xf32> to vector<1x256xf32>
    %182 = arith.mulf %181, %162 : vector<1x256xf32>
    %183 = arith.addf %180, %182 : vector<1x256xf32>
    %184 = arith.addf %19, %20 : vector<1x1xf32>
    %185 = vector.broadcast %184 : vector<1x1xf32> to vector<1x256xf32>
    %186 = arith.mulf %185, %160 : vector<1x256xf32>
    %187 = arith.subf %183, %186 : vector<1x256xf32>
    %cst_152 = arith.constant 0.00999999977 : f32
    %188 = vector.broadcast %cst_152 : f32 to vector<1x256xf32>
    %189 = arith.mulf %188, %187 : vector<1x256xf32>
    %190 = arith.addf %160, %189 : vector<1x256xf32>
    %191 = vector.broadcast %20 : vector<1x1xf32> to vector<1x256xf32>
    %192 = arith.mulf %191, %160 : vector<1x256xf32>
    %193 = vector.broadcast %21 : vector<1x1xf32> to vector<1x256xf32>
    %194 = arith.mulf %193, %162 : vector<1x256xf32>
    %195 = arith.subf %192, %194 : vector<1x256xf32>
    %cst_153 = arith.constant 0.00999999977 : f32
    %196 = vector.broadcast %cst_153 : f32 to vector<1x256xf32>
    %197 = arith.mulf %196, %195 : vector<1x256xf32>
    %198 = arith.addf %162, %197 : vector<1x256xf32>
    %c0_154 = arith.constant 0 : index
    %c0_155 = arith.constant 0 : index
    %c0_156 = arith.constant 0 : index
    %c0_157 = arith.constant 0 : index
    %199 = vector.load %arg8[%c0_154, %c0_155, %c0_156, %c0_157] : memref<1x4x1x256xf32, #tpu.memory_space<vmem>>, vector<1x1x1x256xf32>
    %200 = vector.shape_cast %199 : vector<1x1x1x256xf32> to vector<1x256xf32>
    %201 = vector.shape_cast %171 : vector<1x256xf32> to vector<1x1x1x256xf32>
    tpu.vector_store %arg8[%c0_154, %c0_155, %c0_156, %c0_157], %201 {strides = array<i32>} : memref<1x4x1x256xf32, #tpu.memory_space<vmem>>, vector<1x1x1x256xf32>,
    %c0_158 = arith.constant 0 : index
    %c1_159 = arith.constant 1 : index
    %c0_160 = arith.constant 0 : index
    %c0_161 = arith.constant 0 : index
    %202 = vector.load %arg8[%c0_158, %c1_159, %c0_160, %c0_161] : memref<1x4x1x256xf32, #tpu.memory_space<vmem>>, vector<1x1x1x256xf32>
    %203 = vector.shape_cast %202 : vector<1x1x1x256xf32> to vector<1x256xf32>
    %204 = vector.shape_cast %178 : vector<1x256xf32> to vector<1x1x1x256xf32>
    tpu.vector_store %arg8[%c0_158, %c1_159, %c0_160, %c0_161], %204 {strides = array<i32>} : memref<1x4x1x256xf32, #tpu.memory_space<vmem>>, vector<1x1x1x256xf32>,
    %c0_162 = arith.constant 0 : index
    %c2_163 = arith.constant 2 : index
    %c0_164 = arith.constant 0 : index
    %c0_165 = arith.constant 0 : index
    %205 = vector.load %arg8[%c0_162, %c2_163, %c0_164, %c0_165] : memref<1x4x1x256xf32, #tpu.memory_space<vmem>>, vector<1x1x1x256xf32>
    %206 = vector.shape_cast %205 : vector<1x1x1x256xf32> to vector<1x256xf32>
    %207 = vector.shape_cast %190 : vector<1x256xf32> to vector<1x1x1x256xf32>
    tpu.vector_store %arg8[%c0_162, %c2_163, %c0_164, %c0_165], %207 {strides = array<i32>} : memref<1x4x1x256xf32, #tpu.memory_space<vmem>>, vector<1x1x1x256xf32>,
    %c0_166 = arith.constant 0 : index
    %c3_167 = arith.constant 3 : index
    %c0_168 = arith.constant 0 : index
    %c0_169 = arith.constant 0 : index
    %208 = vector.load %arg8[%c0_166, %c3_167, %c0_168, %c0_169] : memref<1x4x1x256xf32, #tpu.memory_space<vmem>>, vector<1x1x1x256xf32>
    %209 = vector.shape_cast %208 : vector<1x1x1x256xf32> to vector<1x256xf32>
    %210 = vector.shape_cast %198 : vector<1x256xf32> to vector<1x1x1x256xf32>
    tpu.vector_store %arg8[%c0_166, %c3_167, %c0_168, %c0_169], %210 {strides = array<i32>} : memref<1x4x1x256xf32, #tpu.memory_space<vmem>>, vector<1x1x1x256xf32>,
    %211 = vector.broadcast %6 : vector<8x1xf32> to vector<8x256xf32>
    %212 = vector.broadcast %178 : vector<1x256xf32> to vector<8x256xf32>
    %213 = arith.mulf %211, %212 : vector<8x256xf32>
    %214 = vector.broadcast %7 : vector<8x1xf32> to vector<8x256xf32>
    %215 = arith.addf %213, %214 : vector<8x256xf32>
    %cst_170 = arith.constant 0.000000e+00 : f32
    %216 = vector.broadcast %cst_170 : f32 to vector<8x256xf32>
    %217 = arith.maximumf %215, %216 : vector<8x256xf32>
    %218 = arith.subf %154, %217 : vector<8x256xf32>
    %cst_171 = arith.constant 0.000000e+00 : f32
    %219 = vector.broadcast %cst_171 : f32 to vector<8x256xf32>
    %220 = arith.subf %219, %218 : vector<8x256xf32>
    %221 = math.exp %220 : vector<8x256xf32>
    %cst_172 = arith.constant 1.000000e+00 : f32
    %222 = vector.broadcast %cst_172 : f32 to vector<8x256xf32>
    %223 = arith.addf %222, %221 : vector<8x256xf32>
    %cst_173 = arith.constant 1.000000e+00 : f32
    %224 = vector.broadcast %cst_173 : f32 to vector<8x256xf32>
    %225 = arith.divf %224, %223 : vector<8x256xf32>
    %c0_174 = arith.constant 0 : index
    %c0_175 = arith.constant 0 : index
    %c0_176 = arith.constant 0 : index
    %c0_177 = arith.constant 0 : index
    %226 = vector.load %arg2[%c0_174, %c0_175, %c0_176, %c0_177] : memref<1x4x8x256xf32, #tpu.memory_space<vmem>>, vector<1x1x8x256xf32>
    %227 = vector.shape_cast %226 : vector<1x1x8x256xf32> to vector<8x256xf32>
    %c0_178 = arith.constant 0 : index
    %c1_179 = arith.constant 1 : index
    %c0_180 = arith.constant 0 : index
    %c0_181 = arith.constant 0 : index
    %228 = vector.load %arg2[%c0_178, %c1_179, %c0_180, %c0_181] : memref<1x4x8x256xf32, #tpu.memory_space<vmem>>, vector<1x1x8x256xf32>
    %229 = vector.shape_cast %228 : vector<1x1x8x256xf32> to vector<8x256xf32>
    %c0_182 = arith.constant 0 : index
    %c2_183 = arith.constant 2 : index
    %c0_184 = arith.constant 0 : index
    %c0_185 = arith.constant 0 : index
    %230 = vector.load %arg2[%c0_182, %c2_183, %c0_184, %c0_185] : memref<1x4x8x256xf32, #tpu.memory_space<vmem>>, vector<1x1x8x256xf32>
    %231 = vector.shape_cast %230 : vector<1x1x8x256xf32> to vector<8x256xf32>
    %c0_186 = arith.constant 0 : index
    %c3_187 = arith.constant 3 : index
    %c0_188 = arith.constant 0 : index
    %c0_189 = arith.constant 0 : index
    %232 = vector.load %arg2[%c0_186, %c3_187, %c0_188, %c0_189] : memref<1x4x8x256xf32, #tpu.memory_space<vmem>>, vector<1x1x8x256xf32>
    %233 = vector.shape_cast %232 : vector<1x1x8x256xf32> to vector<8x256xf32>
    %234 = vector.broadcast %11 : vector<8x1xf32> to vector<8x256xf32>
    %235 = arith.mulf %234, %225 : vector<8x256xf32>
    %236 = vector.broadcast %13 : vector<8x1xf32> to vector<8x256xf32>
    %237 = arith.mulf %236, %231 : vector<8x256xf32>
    %238 = arith.mulf %235, %227 : vector<8x256xf32>
    %239 = arith.subf %237, %238 : vector<8x256xf32>
    %cst_190 = arith.constant 0.00999999977 : f32
    %240 = vector.broadcast %cst_190 : f32 to vector<8x256xf32>
    %241 = arith.mulf %240, %239 : vector<8x256xf32>
    %242 = arith.addf %227, %241 : vector<8x256xf32>
    %243 = arith.mulf %235, %227 : vector<8x256xf32>
    %244 = vector.broadcast %12 : vector<8x1xf32> to vector<8x256xf32>
    %245 = arith.mulf %244, %229 : vector<8x256xf32>
    %246 = arith.subf %243, %245 : vector<8x256xf32>
    %cst_191 = arith.constant 0.00999999977 : f32
    %247 = vector.broadcast %cst_191 : f32 to vector<8x256xf32>
    %248 = arith.mulf %247, %246 : vector<8x256xf32>
    %249 = arith.addf %229, %248 : vector<8x256xf32>
    %250 = vector.broadcast %12 : vector<8x1xf32> to vector<8x256xf32>
    %251 = arith.mulf %250, %229 : vector<8x256xf32>
    %252 = vector.broadcast %15 : vector<8x1xf32> to vector<8x256xf32>
    %253 = arith.mulf %252, %233 : vector<8x256xf32>
    %254 = arith.addf %251, %253 : vector<8x256xf32>
    %255 = arith.addf %13, %14 : vector<8x1xf32>
    %256 = vector.broadcast %255 : vector<8x1xf32> to vector<8x256xf32>
    %257 = arith.mulf %256, %231 : vector<8x256xf32>
    %258 = arith.subf %254, %257 : vector<8x256xf32>
    %cst_192 = arith.constant 0.00999999977 : f32
    %259 = vector.broadcast %cst_192 : f32 to vector<8x256xf32>
    %260 = arith.mulf %259, %258 : vector<8x256xf32>
    %261 = arith.addf %231, %260 : vector<8x256xf32>
    %262 = vector.broadcast %14 : vector<8x1xf32> to vector<8x256xf32>
    %263 = arith.mulf %262, %231 : vector<8x256xf32>
    %264 = vector.broadcast %15 : vector<8x1xf32> to vector<8x256xf32>
    %265 = arith.mulf %264, %233 : vector<8x256xf32>
    %266 = arith.subf %263, %265 : vector<8x256xf32>
    %cst_193 = arith.constant 0.00999999977 : f32
    %267 = vector.broadcast %cst_193 : f32 to vector<8x256xf32>
    %268 = arith.mulf %267, %266 : vector<8x256xf32>
    %269 = arith.addf %233, %268 : vector<8x256xf32>
    %c0_194 = arith.constant 0 : index
    %c0_195 = arith.constant 0 : index
    %c0_196 = arith.constant 0 : index
    %c0_197 = arith.constant 0 : index
    %270 = vector.load %arg7[%c0_194, %c0_195, %c0_196, %c0_197] : memref<1x4x8x256xf32, #tpu.memory_space<vmem>>, vector<1x1x8x256xf32>
    %271 = vector.shape_cast %270 : vector<1x1x8x256xf32> to vector<8x256xf32>
    %272 = vector.shape_cast %242 : vector<8x256xf32> to vector<1x1x8x256xf32>
    tpu.vector_store %arg7[%c0_194, %c0_195, %c0_196, %c0_197], %272 {strides = array<i32>} : memref<1x4x8x256xf32, #tpu.memory_space<vmem>>, vector<1x1x8x256xf32>,
    %c0_198 = arith.constant 0 : index
    %c1_199 = arith.constant 1 : index
    %c0_200 = arith.constant 0 : index
    %c0_201 = arith.constant 0 : index
    %273 = vector.load %arg7[%c0_198, %c1_199, %c0_200, %c0_201] : memref<1x4x8x256xf32, #tpu.memory_space<vmem>>, vector<1x1x8x256xf32>
    %274 = vector.shape_cast %273 : vector<1x1x8x256xf32> to vector<8x256xf32>
    %275 = vector.shape_cast %249 : vector<8x256xf32> to vector<1x1x8x256xf32>
    tpu.vector_store %arg7[%c0_198, %c1_199, %c0_200, %c0_201], %275 {strides = array<i32>} : memref<1x4x8x256xf32, #tpu.memory_space<vmem>>, vector<1x1x8x256xf32>,
    %c0_202 = arith.constant 0 : index
    %c2_203 = arith.constant 2 : index
    %c0_204 = arith.constant 0 : index
    %c0_205 = arith.constant 0 : index
    %276 = vector.load %arg7[%c0_202, %c2_203, %c0_204, %c0_205] : memref<1x4x8x256xf32, #tpu.memory_space<vmem>>, vector<1x1x8x256xf32>
    %277 = vector.shape_cast %276 : vector<1x1x8x256xf32> to vector<8x256xf32>
    %278 = vector.shape_cast %261 : vector<8x256xf32> to vector<1x1x8x256xf32>
    tpu.vector_store %arg7[%c0_202, %c2_203, %c0_204, %c0_205], %278 {strides = array<i32>} : memref<1x4x8x256xf32, #tpu.memory_space<vmem>>, vector<1x1x8x256xf32>,
    %c0_206 = arith.constant 0 : index
    %c3_207 = arith.constant 3 : index
    %c0_208 = arith.constant 0 : index
    %c0_209 = arith.constant 0 : index
    %279 = vector.load %arg7[%c0_206, %c3_207, %c0_208, %c0_209] : memref<1x4x8x256xf32, #tpu.memory_space<vmem>>, vector<1x1x8x256xf32>
    %280 = vector.shape_cast %279 : vector<1x1x8x256xf32> to vector<8x256xf32>
    %281 = vector.shape_cast %269 : vector<8x256xf32> to vector<1x1x8x256xf32>
    tpu.vector_store %arg7[%c0_206, %c3_207, %c0_208, %c0_209], %281 {strides = array<i32>} : memref<1x4x8x256xf32, #tpu.memory_space<vmem>>, vector<1x1x8x256xf32>,
    %282 = vector.broadcast %8 : vector<8x1xf32> to vector<8x256xf32>
    %283 = arith.mulf %282, %249 : vector<8x256xf32>
    %284 = vector.broadcast %9 : vector<8x1xf32> to vector<8x256xf32>
    %285 = arith.addf %283, %284 : vector<8x256xf32>
    %cst_210 = arith.constant 0.000000e+00 : f32
    %286 = vector.broadcast %cst_210 : f32 to vector<8x256xf32>
    %287 = arith.maximumf %285, %286 : vector<8x256xf32>
    %c0_211 = arith.constant 0 : index
    %c0_212 = arith.constant 0 : index
    %288 = vector.load %arg9[%c0_211, %c0_212] : memref<8x384xf32, #tpu.memory_space<vmem>>, vector<8x256xf32>
    tpu.vector_store %arg9[%c0_211, %c0_212], %287 {strides = array<i32>} : memref<8x384xf32, #tpu.memory_space<vmem>>, vector<8x256xf32>,
    %c0_213 = arith.constant 0 : index
    %c640 = arith.constant 640 : index
    %289 = vector.load %arg4[%c0_213, %c640] : memref<8x1152xf32, #tpu.memory_space<vmem>>, vector<8x72xf32>
    %c0_214 = arith.constant 0 : index
    %c0_215 = arith.constant 0 : index
    %290 = vector.load %arg9[%c0_214, %c0_215] : memref<8x384xf32, #tpu.memory_space<vmem>>, vector<8x256xf32>
    %c0_216 = arith.constant 0 : index
    %c1_217 = arith.constant 1 : index
    %291 = vector.load %arg9[%c0_216, %c1_217] : memref<8x384xf32, #tpu.memory_space<vmem>>, vector<8x256xf32>
    %c0_218 = arith.constant 0 : index
    %c2_219 = arith.constant 2 : index
    %292 = vector.load %arg9[%c0_218, %c2_219] : memref<8x384xf32, #tpu.memory_space<vmem>>, vector<8x256xf32>
    %c0_220 = arith.constant 0 : index
    %c16_221 = arith.constant 16 : index
    %293 = vector.load %arg9[%c0_220, %c16_221] : memref<8x384xf32, #tpu.memory_space<vmem>>, vector<8x256xf32>
    %c0_222 = arith.constant 0 : index
    %c17_223 = arith.constant 17 : index
    %294 = vector.load %arg9[%c0_222, %c17_223] : memref<8x384xf32, #tpu.memory_space<vmem>>, vector<8x256xf32>
    %c0_224 = arith.constant 0 : index
    %c18_225 = arith.constant 18 : index
    %295 = vector.load %arg9[%c0_224, %c18_225] : memref<8x384xf32, #tpu.memory_space<vmem>>, vector<8x256xf32>
    %c0_226 = arith.constant 0 : index
    %c32_227 = arith.constant 32 : index
    %296 = vector.load %arg9[%c0_226, %c32_227] : memref<8x384xf32, #tpu.memory_space<vmem>>, vector<8x256xf32>
    %c0_228 = arith.constant 0 : index
    %c33_229 = arith.constant 33 : index
    %297 = vector.load %arg9[%c0_228, %c33_229] : memref<8x384xf32, #tpu.memory_space<vmem>>, vector<8x256xf32>
    %c0_230 = arith.constant 0 : index
    %c34_231 = arith.constant 34 : index
    %298 = vector.load %arg9[%c0_230, %c34_231] : memref<8x384xf32, #tpu.memory_space<vmem>>, vector<8x256xf32>
    %299 = tpu.concatenate %290, %291, %292, %293, %294, %295, %296, %297, %298 in 0 : vector<8x256xf32>, vector<8x256xf32>, vector<8x256xf32>, vector<8x256xf32>, vector<8x256xf32>, vector<8x256xf32>, vector<8x256xf32>, vector<8x256xf32>, vector<8x256xf32> -> vector<72x256xf32>
    %cst_232 = arith.constant dense<0.000000e+00> : vector<8x256xf32>
    %300 = tpu.matmul %289, %299, %cst_232 {dimension_numbers = #tpu.dot_dimension_numbers<[1], [0], [0], [1], [0, 0, 1, 1], [], []>} : vector<8x72xf32>, vector<72x256xf32>, vector<8x256xf32> -> vector<8x256xf32>
    %c0_233 = arith.constant 0 : index
    %c0_234 = arith.constant 0 : index
    %301 = vector.load %arg9[%c0_233, %c0_234] : memref<8x384xf32, #tpu.memory_space<vmem>>, vector<8x256xf32>
    tpu.vector_store %arg9[%c0_233, %c0_234], %300 {strides = array<i32>} : memref<8x384xf32, #tpu.memory_space<vmem>>, vector<8x256xf32>,
    %c0_235 = arith.constant 0 : index
    %c768 = arith.constant 768 : index
    %302 = vector.load %arg4[%c0_235, %c768] : memref<8x1152xf32, #tpu.memory_space<vmem>>, vector<8x72xf32>
    %c0_236 = arith.constant 0 : index
    %c0_237 = arith.constant 0 : index
    %303 = vector.load %arg9[%c0_236, %c0_237] : memref<8x384xf32, #tpu.memory_space<vmem>>, vector<8x256xf32>
    %c0_238 = arith.constant 0 : index
    %c1_239 = arith.constant 1 : index
    %304 = vector.load %arg9[%c0_238, %c1_239] : memref<8x384xf32, #tpu.memory_space<vmem>>, vector<8x256xf32>
    %c0_240 = arith.constant 0 : index
    %c2_241 = arith.constant 2 : index
    %305 = vector.load %arg9[%c0_240, %c2_241] : memref<8x384xf32, #tpu.memory_space<vmem>>, vector<8x256xf32>
    %c0_242 = arith.constant 0 : index
    %c16_243 = arith.constant 16 : index
    %306 = vector.load %arg9[%c0_242, %c16_243] : memref<8x384xf32, #tpu.memory_space<vmem>>, vector<8x256xf32>
    %c0_244 = arith.constant 0 : index
    %c17_245 = arith.constant 17 : index
    %307 = vector.load %arg9[%c0_244, %c17_245] : memref<8x384xf32, #tpu.memory_space<vmem>>, vector<8x256xf32>
    %c0_246 = arith.constant 0 : index
    %c18_247 = arith.constant 18 : index
    %308 = vector.load %arg9[%c0_246, %c18_247] : memref<8x384xf32, #tpu.memory_space<vmem>>, vector<8x256xf32>
    %c0_248 = arith.constant 0 : index
    %c32_249 = arith.constant 32 : index
    %309 = vector.load %arg9[%c0_248, %c32_249] : memref<8x384xf32, #tpu.memory_space<vmem>>, vector<8x256xf32>
    %c0_250 = arith.constant 0 : index
    %c33_251 = arith.constant 33 : index
    %310 = vector.load %arg9[%c0_250, %c33_251] : memref<8x384xf32, #tpu.memory_space<vmem>>, vector<8x256xf32>
    %c0_252 = arith.constant 0 : index
    %c34_253 = arith.constant 34 : index
    %311 = vector.load %arg9[%c0_252, %c34_253] : memref<8x384xf32, #tpu.memory_space<vmem>>, vector<8x256xf32>
    %312 = tpu.concatenate %303, %304, %305, %306, %307, %308, %309, %310, %311 in 0 : vector<8x256xf32>, vector<8x256xf32>, vector<8x256xf32>, vector<8x256xf32>, vector<8x256xf32>, vector<8x256xf32>, vector<8x256xf32>, vector<8x256xf32>, vector<8x256xf32> -> vector<72x256xf32>
    %cst_254 = arith.constant dense<0.000000e+00> : vector<8x256xf32>
    %313 = tpu.matmul %302, %312, %cst_254 {dimension_numbers = #tpu.dot_dimension_numbers<[1], [0], [0], [1], [0, 0, 1, 1], [], []>} : vector<8x72xf32>, vector<72x256xf32>, vector<8x256xf32> -> vector<8x256xf32>
    %314 = vector.broadcast %10 : vector<8x1xf32> to vector<8x256xf32>
    %315 = arith.addf %313, %314 : vector<8x256xf32>
    %cst_255 = arith.constant 0.000000e+00 : f32
    %316 = vector.broadcast %cst_255 : f32 to vector<8x256xf32>
    %317 = arith.maximumf %315, %316 : vector<8x256xf32>
    %c0_256 = arith.constant 0 : index
    %c0_257 = arith.constant 0 : index
    %318 = vector.load %arg9[%c0_256, %c0_257] : memref<8x384xf32, #tpu.memory_space<vmem>>, vector<8x256xf32>
    tpu.vector_store %arg9[%c0_256, %c0_257], %317 {strides = array<i32>} : memref<8x384xf32, #tpu.memory_space<vmem>>, vector<8x256xf32>,
    %c0_258 = arith.constant 0 : index
    %c896 = arith.constant 896 : index
    %319 = vector.load %arg4[%c0_258, %c896] : memref<8x1152xf32, #tpu.memory_space<vmem>>, vector<1x200xf32>
    %c0_259 = arith.constant 0 : index
    %c0_260 = arith.constant 0 : index
    %320 = vector.load %arg9[%c0_259, %c0_260] : memref<8x384xf32, #tpu.memory_space<vmem>>, vector<8x128xf32>
    %c0_261 = arith.constant 0 : index
    %c1_262 = arith.constant 1 : index
    %321 = vector.load %arg9[%c0_261, %c1_262] : memref<8x384xf32, #tpu.memory_space<vmem>>, vector<8x128xf32>
    %c0_263 = arith.constant 0 : index
    %c2_264 = arith.constant 2 : index
    %322 = vector.load %arg9[%c0_263, %c2_264] : memref<8x384xf32, #tpu.memory_space<vmem>>, vector<8x128xf32>
    %c0_265 = arith.constant 0 : index
    %c3_266 = arith.constant 3 : index
    %323 = vector.load %arg9[%c0_265, %c3_266] : memref<8x384xf32, #tpu.memory_space<vmem>>, vector<8x128xf32>
    %c0_267 = arith.constant 0 : index
    %c4_268 = arith.constant 4 : index
    %324 = vector.load %arg9[%c0_267, %c4_268] : memref<8x384xf32, #tpu.memory_space<vmem>>, vector<8x128xf32>
    %325 = tpu.concatenate %320, %321, %322, %323, %324 in 0 : vector<8x128xf32>, vector<8x128xf32>, vector<8x128xf32>, vector<8x128xf32>, vector<8x128xf32> -> vector<40x128xf32>
    %326 = vector.extract_strided_slice %319 {offsets = [0, 0], sizes = [1, 40], strides = [1, 1]} : vector<1x200xf32> to vector<1x40xf32>
    %cst_269 = arith.constant dense<0.000000e+00> : vector<1x128xf32>
    %327 = tpu.matmul %326, %325, %cst_269 {dimension_numbers = #tpu.dot_dimension_numbers<[1], [0], [0], [1], [0, 0, 1, 1], [], []>} : vector<1x40xf32>, vector<40x128xf32>, vector<1x128xf32> -> vector<1x128xf32>
    %c0_270 = arith.constant 0 : index
    %c16_271 = arith.constant 16 : index
    %328 = vector.load %arg9[%c0_270, %c16_271] : memref<8x384xf32, #tpu.memory_space<vmem>>, vector<8x128xf32>
    %c0_272 = arith.constant 0 : index
    %c17_273 = arith.constant 17 : index
    %329 = vector.load %arg9[%c0_272, %c17_273] : memref<8x384xf32, #tpu.memory_space<vmem>>, vector<8x128xf32>
    %c0_274 = arith.constant 0 : index
    %c18_275 = arith.constant 18 : index
    %330 = vector.load %arg9[%c0_274, %c18_275] : memref<8x384xf32, #tpu.memory_space<vmem>>, vector<8x128xf32>
    %c0_276 = arith.constant 0 : index
    %c19_277 = arith.constant 19 : index
    %331 = vector.load %arg9[%c0_276, %c19_277] : memref<8x384xf32, #tpu.memory_space<vmem>>, vector<8x128xf32>
    %c0_278 = arith.constant 0 : index
    %c20_279 = arith.constant 20 : index
    %332 = vector.load %arg9[%c0_278, %c20_279] : memref<8x384xf32, #tpu.memory_space<vmem>>, vector<8x128xf32>
    %333 = tpu.concatenate %328, %329, %330, %331, %332 in 0 : vector<8x128xf32>, vector<8x128xf32>, vector<8x128xf32>, vector<8x128xf32>, vector<8x128xf32> -> vector<40x128xf32>
    %334 = vector.extract_strided_slice %319 {offsets = [0, 40], sizes = [1, 40], strides = [1, 1]} : vector<1x200xf32> to vector<1x40xf32>
    %cst_280 = arith.constant dense<0.000000e+00> : vector<1x128xf32>
    %335 = tpu.matmul %334, %333, %cst_280 {dimension_numbers = #tpu.dot_dimension_numbers<[1], [0], [0], [1], [0, 0, 1, 1], [], []>} : vector<1x40xf32>, vector<40x128xf32>, vector<1x128xf32> -> vector<1x128xf32>
    %336 = arith.addf %327, %335 : vector<1x128xf32>
    %c0_281 = arith.constant 0 : index
    %c32_282 = arith.constant 32 : index
    %337 = vector.load %arg9[%c0_281, %c32_282] : memref<8x384xf32, #tpu.memory_space<vmem>>, vector<8x128xf32>
    %c0_283 = arith.constant 0 : index
    %c33_284 = arith.constant 33 : index
    %338 = vector.load %arg9[%c0_283, %c33_284] : memref<8x384xf32, #tpu.memory_space<vmem>>, vector<8x128xf32>
    %c0_285 = arith.constant 0 : index
    %c34_286 = arith.constant 34 : index
    %339 = vector.load %arg9[%c0_285, %c34_286] : memref<8x384xf32, #tpu.memory_space<vmem>>, vector<8x128xf32>
    %c0_287 = arith.constant 0 : index
    %c35_288 = arith.constant 35 : index
    %340 = vector.load %arg9[%c0_287, %c35_288] : memref<8x384xf32, #tpu.memory_space<vmem>>, vector<8x128xf32>
    %c0_289 = arith.constant 0 : index
    %c36_290 = arith.constant 36 : index
    %341 = vector.load %arg9[%c0_289, %c36_290] : memref<8x384xf32, #tpu.memory_space<vmem>>, vector<8x128xf32>
    %342 = tpu.concatenate %337, %338, %339, %340, %341 in 0 : vector<8x128xf32>, vector<8x128xf32>, vector<8x128xf32>, vector<8x128xf32>, vector<8x128xf32> -> vector<40x128xf32>
    %343 = vector.extract_strided_slice %319 {offsets = [0, 80], sizes = [1, 40], strides = [1, 1]} : vector<1x200xf32> to vector<1x40xf32>
    %cst_291 = arith.constant dense<0.000000e+00> : vector<1x128xf32>
    %344 = tpu.matmul %343, %342, %cst_291 {dimension_numbers = #tpu.dot_dimension_numbers<[1], [0], [0], [1], [0, 0, 1, 1], [], []>} : vector<1x40xf32>, vector<40x128xf32>, vector<1x128xf32> -> vector<1x128xf32>
    %345 = arith.addf %336, %344 : vector<1x128xf32>
    %c0_292 = arith.constant 0 : index
    %c48_293 = arith.constant 48 : index
    %346 = vector.load %arg9[%c0_292, %c48_293] : memref<8x384xf32, #tpu.memory_space<vmem>>, vector<8x128xf32>
    %c0_294 = arith.constant 0 : index
    %c49_295 = arith.constant 49 : index
    %347 = vector.load %arg9[%c0_294, %c49_295] : memref<8x384xf32, #tpu.memory_space<vmem>>, vector<8x128xf32>
    %c0_296 = arith.constant 0 : index
    %c50_297 = arith.constant 50 : index
    %348 = vector.load %arg9[%c0_296, %c50_297] : memref<8x384xf32, #tpu.memory_space<vmem>>, vector<8x128xf32>
    %c0_298 = arith.constant 0 : index
    %c51_299 = arith.constant 51 : index
    %349 = vector.load %arg9[%c0_298, %c51_299] : memref<8x384xf32, #tpu.memory_space<vmem>>, vector<8x128xf32>
    %c0_300 = arith.constant 0 : index
    %c52_301 = arith.constant 52 : index
    %350 = vector.load %arg9[%c0_300, %c52_301] : memref<8x384xf32, #tpu.memory_space<vmem>>, vector<8x128xf32>
    %351 = tpu.concatenate %346, %347, %348, %349, %350 in 0 : vector<8x128xf32>, vector<8x128xf32>, vector<8x128xf32>, vector<8x128xf32>, vector<8x128xf32> -> vector<40x128xf32>
    %352 = vector.extract_strided_slice %319 {offsets = [0, 120], sizes = [1, 40], strides = [1, 1]} : vector<1x200xf32> to vector<1x40xf32>
    %cst_302 = arith.constant dense<0.000000e+00> : vector<1x128xf32>
    %353 = tpu.matmul %352, %351, %cst_302 {dimension_numbers = #tpu.dot_dimension_numbers<[1], [0], [0], [1], [0, 0, 1, 1], [], []>} : vector<1x40xf32>, vector<40x128xf32>, vector<1x128xf32> -> vector<1x128xf32>
    %354 = arith.addf %345, %353 : vector<1x128xf32>
    %c0_303 = arith.constant 0 : index
    %c64_304 = arith.constant 64 : index
    %355 = vector.load %arg9[%c0_303, %c64_304] : memref<8x384xf32, #tpu.memory_space<vmem>>, vector<8x128xf32>
    %c0_305 = arith.constant 0 : index
    %c65_306 = arith.constant 65 : index
    %356 = vector.load %arg9[%c0_305, %c65_306] : memref<8x384xf32, #tpu.memory_space<vmem>>, vector<8x128xf32>
    %c0_307 = arith.constant 0 : index
    %c66_308 = arith.constant 66 : index
    %357 = vector.load %arg9[%c0_307, %c66_308] : memref<8x384xf32, #tpu.memory_space<vmem>>, vector<8x128xf32>
    %c0_309 = arith.constant 0 : index
    %c67_310 = arith.constant 67 : index
    %358 = vector.load %arg9[%c0_309, %c67_310] : memref<8x384xf32, #tpu.memory_space<vmem>>, vector<8x128xf32>
    %c0_311 = arith.constant 0 : index
    %c68_312 = arith.constant 68 : index
    %359 = vector.load %arg9[%c0_311, %c68_312] : memref<8x384xf32, #tpu.memory_space<vmem>>, vector<8x128xf32>
    %360 = tpu.concatenate %355, %356, %357, %358, %359 in 0 : vector<8x128xf32>, vector<8x128xf32>, vector<8x128xf32>, vector<8x128xf32>, vector<8x128xf32> -> vector<40x128xf32>
    %361 = vector.extract_strided_slice %319 {offsets = [0, 160], sizes = [1, 40], strides = [1, 1]} : vector<1x200xf32> to vector<1x40xf32>
    %cst_313 = arith.constant dense<0.000000e+00> : vector<1x128xf32>
    %362 = tpu.matmul %361, %360, %cst_313 {dimension_numbers = #tpu.dot_dimension_numbers<[1], [0], [0], [1], [0, 0, 1, 1], [], []>} : vector<1x40xf32>, vector<40x128xf32>, vector<1x128xf32> -> vector<1x128xf32>
    %363 = arith.addf %354, %362 : vector<1x128xf32>
    %cst_314 = arith.constant 2.000000e+01 : f32
    %364 = vector.broadcast %cst_314 : f32 to vector<1x128xf32>
    %365 = arith.cmpf ogt, %363, %364 : vector<1x128xf32>
    %cst_315 = arith.constant 2.000000e+01 : f32
    %366 = vector.broadcast %cst_315 : f32 to vector<1x128xf32>
    %367 = arith.minimumf %363, %366 : vector<1x128xf32>
    %368 = math.exp %367 : vector<1x128xf32>
    %cst_316 = arith.constant 1.000000e+00 : f32
    %369 = vector.broadcast %cst_316 : f32 to vector<1x128xf32>
    %370 = arith.addf %369, %368 : vector<1x128xf32>
    %371 = math.log %370 : vector<1x128xf32>
    %372 = arith.select %365, %363, %371 : vector<1x128xi1>, vector<1x128xf32>
    %c0_317 = arith.constant 0 : index
    %c0_318 = arith.constant 0 : index
    %c0_319 = arith.constant 0 : index
    %373 = vector.load %arg6[%c0_317, %c0_318, %c0_319] : memref<1x1x128xf32, #tpu.memory_space<vmem>>, vector<1x1x128xf32>
    %374 = vector.shape_cast %373 : vector<1x1x128xf32> to vector<1x128xf32>
    %375 = vector.shape_cast %372 : vector<1x128xf32> to vector<1x1x128xf32>
    tpu.vector_store %arg6[%c0_317, %c0_318, %c0_319], %375 {strides = array<i32>} : memref<1x1x128xf32, #tpu.memory_space<vmem>>, vector<1x1x128xf32>,
    return
  }
  func.func @transform_0(%arg0: i32) -> (i32, i32, i32) {
    %c0_i32 = arith.constant 0 : i32
    %c0_i32_0 = arith.constant 0 : i32
    %c0_i32_1 = arith.constant 0 : i32
    return %arg0, %c0_i32, %c0_i32_0 : i32, i32, i32
  }
  func.func @transform_1(%arg0: i32) -> (i32, i32, i32, i32) {
    %c0_i32 = arith.constant 0 : i32
    %c0_i32_0 = arith.constant 0 : i32
    %c0_i32_1 = arith.constant 0 : i32
    %c0_i32_2 = arith.constant 0 : i32
    return %arg0, %c0_i32, %c0_i32_0, %c0_i32_1 : i32, i32, i32, i32
  }
  func.func @transform_2(%arg0: i32) -> (i32, i32, i32, i32) {
    %c0_i32 = arith.constant 0 : i32
    %c0_i32_0 = arith.constant 0 : i32
    %c0_i32_1 = arith.constant 0 : i32
    %c0_i32_2 = arith.constant 0 : i32
    return %arg0, %c0_i32, %c0_i32_0, %c0_i32_1 : i32, i32, i32, i32
  }
  func.func @transform_3(%arg0: i32) -> (i32, i32) {
    %c0_i32 = arith.constant 0 : i32
    %c0_i32_0 = arith.constant 0 : i32
    %c0_i32_1 = arith.constant 0 : i32
    return %c0_i32, %c0_i32_0 : i32, i32
  }
  func.func @transform_4(%arg0: i32) -> (i32, i32) {
    %c0_i32 = arith.constant 0 : i32
    %c0_i32_0 = arith.constant 0 : i32
    %c0_i32_1 = arith.constant 0 : i32
    return %c0_i32, %c0_i32_0 : i32, i32
  }
  func.func @transform_5(%arg0: i32) -> (i32, i32, i32) {
    %c0_i32 = arith.constant 0 : i32
    %c0_i32_0 = arith.constant 0 : i32
    %c0_i32_1 = arith.constant 0 : i32
    return %arg0, %c0_i32, %c0_i32_0 : i32, i32, i32
  }
  func.func @transform_6(%arg0: i32) -> (i32, i32, i32, i32) {
    %c0_i32 = arith.constant 0 : i32
    %c0_i32_0 = arith.constant 0 : i32
    %c0_i32_1 = arith.constant 0 : i32
    %c0_i32_2 = arith.constant 0 : i32
    return %arg0, %c0_i32, %c0_i32_0, %c0_i32_1 : i32, i32, i32, i32
  }
  func.func @transform_7(%arg0: i32) -> (i32, i32, i32, i32) {
    %c0_i32 = arith.constant 0 : i32
    %c0_i32_0 = arith.constant 0 : i32
    %c0_i32_1 = arith.constant 0 : i32
    %c0_i32_2 = arith.constant 0 : i32
    return %arg0, %c0_i32, %c0_i32_0, %c0_i32_1 : i32, i32, i32, i32
  }
}

</mosaic_0001>

<bundles_post_ra>
// kernel: kinetics_forward.1
= control target key start
LH: loop header
LB: loop body
LE: loop exit
PB: predicated region body
PF: predicated region fallthrough
CT: control target
= control target key end

     0   :  { %s3548_s24 = smov 0   ;;  %s4702_s0 = inlined_call_operand.vmem [shape: f32[2,4,256], index: 0, kind: input, shape index: {}]   ;;  %s4703_s1 = inlined_call_operand.vmem [shape: f32[2,4,8,256], index: 1, kind: input, shape index: {}, may-alias: {1,6}]   ;;  %s4704_s2 = inlined_call_operand.vmem [shape: f32[2,4,1,256], index: 2, kind: input, shape index: {}, may-alias: {2,7}]   ;;  %s4705_s3 = inlined_call_operand.vmem [shape: f32[8,1152], index: 3, kind: input, shape index: {}]   ;;  %s4706_s4 = inlined_call_operand.vmem [shape: f32[8,16], index: 4, kind: input, shape index: {}]   ;;  %s4707_s5 = inlined_call_operand.vmem [shape: f32[2,1,128], index: 5, kind: output, shape index: {0}]   ;;  %s4708_s6 = inlined_call_operand.vmem [shape: f32[2,4,8,256], index: 6, kind: output, shape index: {1}, may-alias: {1,6}]   ;;  %s4709_s7 = inlined_call_operand.vmem [shape: f32[2,4,1,256], index: 7, kind: output, shape index: {2}, may-alias: {2,7}]  }
   0x1 LB: > { %s3142_s25 = sadd.s32 4294967295, %s3465_s24   ;;  %p3146_p0 = scmp.ge.s32.totalorder %s3465_s24, 1  ;;  %s3465_s24 = sphi %s3548_s24, %s18_s24  }
   0x2   : > { %p261_p1 = scmp.lt.s32.totalorder %s3465_s24, 3 }
   0x4   : > { %p262_p2 = pnand %p3146_p0, %p261_p1 }
   0x5   : > { %p309_p3 = scmp.lt.s32.totalorder (!%p262_p2), %s3142_s25, 1  ;;  %s3468_s30 = smov (!%p262_p2), 124  }
   0x6   : > { %265 = sbr.rel (%p262_p2) target bundleno = 2519 (0x9d7), region = 40  ;;  %s3469_s8 = smov (!%p262_p2), 122  }
   0x7   : > { %s3470_s9 = smov (!%p262_p2), 123   ;;  %s3471_s10 = smov (!%p262_p2), 126  }
   0x8   : > { %s3472_s11 = smov (!%p262_p2), 125   ;;  %s3473_s12 = smov (!%p262_p2), 127  }
   0x9   : > { %s3474_s15 = smov (!%p262_p2), 44   ;;  %s3475_s16 = smov (!%p262_p2), 94  }
   0xa   : > { %s3476_s17 = smov (!%p262_p2), 96   ;;  %s3477_s18 = smov (!%p262_p2), 95  }
   0xb   : > { %v3467_v0 = vmov 0.0   ;;  %s4713_s25 = smov (!%p309_p3, %s3142_s25), 1  ;;  %v438_v9 = vlaneseq  ;;  %v3616_v12 = vld [vmem:[%s4705_s3 + $0x18] ss:$8 sm:$0x3]  ;;  %s3478_s19 = smov 116  }
   0xc   : > { %335 = vst [vmem:[#allocation2 + $0x8] sm:$0xff] %v3467_v0  ;;  %640 = vmatprep.mubr.f32.mxu1 %v3467_v0  ;;  %563 = vmatprep.mubr.f32.mxu0 %v3467_v0  ;;  %s3562_s26 = sshll.u32 %s4713_s25, 3  ;;  %s3479_s20 = smov 111   ;;  %vm420_vm0 = vcmask 1043456   ;;  %vm417_vm1 = vcmask 998400   ;;  %vm395_vm2 = vcmask 1014784  }
   0xd   : > { %s313_s29 = scalar_lea.vmem %s4702_s0, %s3562_s26  ;;  %v3604_v10 = vshrl.u32 %v438_v9, 7  ;;  %s3480_s21 = smov 110   ;;  %vm406_vm3 = vcmask 1006592   ;;  %vm373_vm4 = vcmask 1031168   ;;  %vm384_vm5 = vcmask 1022976  }
   0xe   : > { %v337_v1 = vld [vmem:[%s313_s29] sm:$0xff]  ;;  %s3481_s22 = smov 80   ;;  %s3482_s23 = smov 48   ;;  %vm362_vm6 = vcmask 1039360   ;;  %vm492_vm7 = vcmask 228352   ;;  %vm793_vm8 = vcmask 654336  }
   0xf   : > { %341 = vst [vmem:[#allocation2 + $0x10] sm:$0xf] %v337_v1  ;;  %v339_v3 = vcombine.high %v337_v1, %v337_v1  ;;  %v3611_v11 = vsub.s32 0, %v3604_v10  ;;  %v3636_v14 = vsub.s32 1, %v3604_v10  ;;  %s3483_s27 = smov 112   ;;  %s3484_s28 = smov 100  }
  0x10   : > { %s3485_s29 = smov 64   ;;  %s3488_s13 = smov 16   ;;  %vm1041_vm9 = vcmask 392192   ;;  %vm673_vm10 = vcmask 785408   ;;  %vm1323_vm11 = vcmask 777216   ;;  %vm1334_vm12 = vcmask 769024  }
  0x11   : > { %342 = vst [vmem:[#allocation2] sm:$0xf] %v339_v3  ;;  %v3624_v13 = vrot.slane %v3616_v12, %v3611_v11  ;;  %v3644_v15 = vrot.slane %v3616_v12, %v3636_v14  ;;  %s3489_s14 = smov 88   ;;  %vm1291_vm13 = vcmask 908288   ;;  %vm1302_vm14 = vcmask 900096  }
  0x12   : > { %vm477_vm15 = vcmask 916480  }
  0x13   : > { %v3568_v2 = vld [vmem:[#allocation2 + $0x8] sm:$0xf] }
  0x14   : > { %393 = vrot.lane.b32.xlu1 %v3568_v2, %s3468_s30  ;;  %415 = vrot.lane.b32.xlu0 %v3568_v2, %s3469_s8  ;;  %v3574_v4 = vrot.slane %v3568_v2, 4 }
  0x16   : > { %v3577_v5 = vld [vmem:[#allocation2 + $0x10] sm:$0xf] }
  0x17   : > { %v3586_v7 = vrot.slane %v3577_v5, 4  ;;  %v345_v50 = vld [vmem:[#allocation2 + $0x10] sm:$0xf] }
  0x18   : > { %404 = vrot.lane.b32.xlu1 %v3574_v4, %s3470_s9  ;;  %411 = vrot.lane.b32.xlu0 %v3577_v5, %s3469_s8  ;;  %v3580_v6 = vld [vmem:[#allocation2] sm:$0xf] }
  0x19   : > { %v3592_v8 = vrot.slane %v3580_v6, 4  ;;  %v346_v49 = vld [vmem:[#allocation2] sm:$0xf] }
  0x1c   : > { %389 = vrot.lane.b32.xlu1 %v3577_v5, %s3468_s30  ;;  %413 = vrot.lane.b32.xlu0 %v3580_v6, %s3469_s8  ;;  %s3486_s8 = smov 32  }
  0x20   : > { %391 = vrot.lane.b32.xlu1 %v3580_v6, %s3468_s30  ;;  %400 = vrot.lane.b32.xlu0 %v3586_v7, %s3470_s9 }
  0x24   : > { %369 = vrot.lane.b32.xlu1 %v3580_v6, %s3471_s10  ;;  %402 = vrot.lane.b32.xlu0 %v3592_v8, %s3470_s9  ;;  %s3487_s9 = smov 72  }
  0x28   : > { %380 = vrot.lane.b32.xlu1 %v3592_v8, %s3472_s11  ;;  %371 = vrot.lane.b32.xlu0 %v3568_v2, %s3471_s10 }
  0x2c   : > { %367 = vrot.lane.b32.xlu1 %v3577_v5, %s3471_s10  ;;  %382 = vrot.lane.b32.xlu0 %v3574_v4, %s3472_s11 }
  0x30   : > { %358 = vrot.lane.b32.xlu1 %v3592_v8, %s3473_s12  ;;  %378 = vrot.lane.b32.xlu0 %v3586_v7, %s3472_s11 }
  0x34   : > { %356 = vrot.lane.b32.xlu1 %v3586_v7, %s3473_s12  ;;  %360 = vrot.lane.b32.xlu0 %v3574_v4, %s3473_s12 }
  0x38   : > { %767 = vrot.lane.b32.xlu1 %v3624_v13, %s3474_s15  ;;  %1332 = vrot.lane.b32.xlu0 %v3568_v2, %s3475_s16 }
  0x3c   : > { %1330 = vrot.lane.b32.xlu1 %v3580_v6, %s3475_s16  ;;  %1311 = vrot.lane.b32.xlu0 %v3568_v2, %s3476_s17 }
  0x40   : > { %1309 = vrot.lane.b32.xlu1 %v3580_v6, %s3476_s17  ;;  %1321 = vrot.lane.b32.xlu0 %v3574_v4, %s3477_s18 }
  0x44   : > { %1319 = vrot.lane.b32.xlu1 %v3592_v8, %s3477_s18  ;;  %1015 = vrot.lane.b32.xlu0 %v3644_v15, %s3478_s19  ;;  %s4267_s19 = scalar_lea.vmem %s4709_s7, %s3562_s26 }
  0x48   : > { %1328 = vrot.lane.b32.xlu1 %v3577_v5, %s3475_s16  ;;  %1317 = vrot.lane.b32.xlu0 %v3586_v7, %s3477_s18 }
  0x4c   : > { %1307 = vrot.lane.b32.xlu1 %v3577_v5, %s3476_s17  ;;  %1289 = vrot.lane.b32.xlu0 %v3568_v2, %s3479_s20 }
  0x50   : > { %1287 = vrot.lane.b32.xlu1 %v3580_v6, %s3479_s20  ;;  %1300 = vrot.lane.b32.xlu0 %v3574_v4, %s3480_s21 }
  0x54   : > { %1298 = vrot.lane.b32.xlu1 %v3592_v8, %s3480_s21 }
  0x58   : > { %1285 = vrot.lane.b32.xlu1 %v3577_v5, %s3479_s20 }
  0x86   : > { %v394_v16 = vpop.permute.xlu1 %393  ;;  %v416_v17 = vpop.permute.xlu0 %415 }
  0x8a   : > { %v405_v18 = vpop.permute.xlu1 %404  ;;  %v412_v21 = vpop.permute.xlu0 %411 }
  0x8b   : > { %v436_v19 = vsel %vm420_vm0, %v394_v16, %v405_v18 }
  0x8c   : > { %v3666_v20 = vpack.i.bf16 %v436_v19, %v416_v17 }
  0x8e   : > { %3358 = vrot.lane.b32.xlu1 %v3666_v20, %s3481_s22  ;;  %v390_v22 = vpop.permute.xlu1 %389  ;;  %v414_v23 = vpop.permute.xlu0 %413 }
  0x8f   : > { %v3670_v24 = vsel %vm417_vm1, %v412_v21, %v414_v23  ;;  %v3672_v25 = vsel %vm417_vm1, %v414_v23, %v416_v17  ;;  %vm1343_vm1 = vcmask 293888  }
  0x90   : > { %3159 = vmatprep.subr.msk.mxu1 %vm420_vm0, %v3672_v25 }
  0x91   : > { %3160 = vmatpush1.msk.msra.mxu1 %vm420_vm0, %v3670_v24 }
  0x92   : > { %3368 = vrot.lane.b32.xlu1 %v3666_v20, %s3482_s23  ;;  %v392_v26 = vpop.permute.xlu1 %391  ;;  %v401_v27 = vpop.permute.xlu0 %400 }
  0x93   : > { %v396_v29 = vsel %vm395_vm2, %v390_v22, %v392_v26  ;;  %v397_v30 = vsel %vm395_vm2, %v392_v26, %v394_v16 }
  0x96   : > { %v370_v28 = vpop.permute.xlu1 %369  ;;  %v403_v31 = vpop.permute.xlu0 %402 }
  0x97   : > { %v407_v32 = vsel %vm406_vm3, %v401_v27, %v403_v31  ;;  %v408_v33 = vsel %vm406_vm3, %v403_v31, %v405_v18  ;;  %vm921_vm3 = vcmask 523264  }
  0x98   : > { %v3683_v35 = vsel %vm420_vm0, %v396_v29, %v407_v32  ;;  %v3686_v36 = vsel %vm420_vm0, %v397_v30, %v408_v33 }
  0x99   : > { %602 = vmatprep.subr.mxu1 %v3686_v36 }
  0x9a   : > { %v381_v34 = vpop.permute.xlu1 %380  ;;  %603 = vmatpush1.msra.mxu1 %v3683_v35  ;;  %v372_v37 = vpop.permute.xlu0 %371 }
  0x9b   : > { %v3691_v40 = vsel %vm373_vm4, %v370_v28, %v372_v37 }
  0x9e   : > { %v368_v38 = vpop.permute.xlu1 %367  ;;  %v383_v39 = vpop.permute.xlu0 %382 }
  0x9f   : > { %v386_v41 = vsel %vm384_vm5, %v381_v34, %v383_v39  ;;  %v3700_v44 = vsel %vm373_vm4, %v368_v38, %v370_v28  ;;  %v435_v52 = vsel %vm420_vm0, %v372_v37, %v383_v39 }
  0xa0   : > { %v3696_v42 = vsel %vm420_vm0, %v3691_v40, %v386_v41 }
  0xa1   : > { %604 = vmatprep.subr.mxu1 %v3696_v42 }
  0xa2   : > { %v359_v43 = vpop.permute.xlu1 %358  ;;  %v379_v45 = vpop.permute.xlu0 %378 }
  0xa3   : > { %v385_v46 = vsel %vm384_vm5, %v379_v45, %v381_v34 }
  0xa4   : > { %v3705_v47 = vsel %vm420_vm0, %v3700_v44, %v385_v46 }
  0xa5   : > { %605 = vmatpush1.msra.mxu1 %v3705_v47 }
  0xa6   : > { %v357_v48 = vpop.permute.xlu1 %356  ;;  %v361_v51 = vpop.permute.xlu0 %360 }
  0xa7   : > { %v364_v53 = vsel %vm362_vm6, %v359_v43, %v361_v51  ;;  %v434_v54 = vsel %vm420_vm0, %v3568_v2, %v361_v51  ;;  %v363_v55 = vsel %vm362_vm6, %v357_v48, %v359_v43 }
  0xa8   : > { %v3714_v56 = vsel %vm420_vm0, %v346_v49, %v364_v53  ;;  %v3716_v57 = vpack.i.bf16 %v434_v54, %v435_v52  ;;  %v3719_v58 = vsel %vm420_vm0, %v345_v50, %v363_v55  ;;  %v3744_v59 = vsel %vm420_vm0, %v3577_v5, %v363_v55 }
  0xa9   : > { %606 = vmatprep.subr.mxu1 %v3714_v56  ;;  %v3756_v60 = vsel %vm420_vm0, %v3580_v6, %v364_v53 }
  0xaa   : > { %3373 = vrot.lane.b32.xlu1 %v3716_v57, %s3482_s23  ;;  %3363 = vrot.lane.b32.xlu0 %v3716_v57, %s3481_s22  ;;  %v3786_v61 = vpop.permute.xlu1 %767  ;;  %v3823_v3 = vpop.permute.xlu0 %1332 }
  0xab   : > { %607 = vmatpush1.msra.mxu1 %v3719_v58 }
  0xac   : > { %3161 = vmatmul.mubr.msk.f32.vlgmr.msra.gmra.mxu1 %vm492_vm7, %v3616_v12 }
  0xad   : > { %878 = vmatprep.mubr.f32.mxu1 %v3467_v0 }
  0xae   : > { %783 = vrot.lane.b32.xlu1 %v3686_v36, %s3481_s22  ;;  %789 = vrot.lane.b32.xlu0 %v3672_v25, %s3481_s22  ;;  %v3792_v62 = vpop.permute.xlu1 %1330  ;;  %v3831_v5 = vpop.permute.xlu0 %1311 }
  0xb2   : > { %777 = vrot.lane.b32.xlu1 %v3696_v42, %s3481_s22  ;;  %787 = vrot.lane.b32.xlu0 %v3670_v24, %s3481_s22  ;;  %v3801_v63 = vpop.permute.xlu1 %1309 }
  0xb6   : > { %775 = vrot.lane.b32.xlu1 %v3705_v47, %s3481_s22  ;;  %1037 = vrot.lane.b32.xlu0 %v3672_v25, %s3482_s23  ;;  %v3807_v1 = vpop.permute.xlu1 %1319 }
  0xba   : > { %769 = vrot.lane.b32.xlu1 %v3744_v59, %s3481_s22  ;;  %1035 = vrot.lane.b32.xlu0 %v3670_v24, %s3482_s23  ;;  %v3817_v2 = vpop.permute.xlu1 %1328 }
  0xbe   : > { %1029 = vrot.lane.b32.xlu1 %v3683_v35, %s3482_s23  ;;  %781 = vrot.lane.b32.xlu0 %v3683_v35, %s3481_s22 }
  0xc2   : > { %1019 = vrot.lane.b32.xlu1 %v3756_v60, %s3482_s23  ;;  %771 = vrot.lane.b32.xlu0 %v3756_v60, %s3481_s22 }
  0xc6   : > { %1277 = vrot.lane.b32.xlu1 %v3592_v8, %s3483_s27  ;;  %1031 = vrot.lane.b32.xlu0 %v3686_v36, %s3482_s23 }
  0xca   : > { %1275 = vrot.lane.b32.xlu1 %v3586_v7, %s3483_s27  ;;  %1025 = vrot.lane.b32.xlu0 %v3696_v42, %s3482_s23 }
  0xce   : > { %3378 = vrot.lane.b32.xlu1 %v3666_v20, %s3483_s27  ;;  %1023 = vrot.lane.b32.xlu0 %v3705_v47, %s3482_s23 }
  0xd2   : > { %3388 = vrot.lane.b32.xlu1 %v3666_v20, %s3476_s17  ;;  %1017 = vrot.lane.b32.xlu0 %v3744_v59, %s3482_s23 }
  0xd6   : > { %467 = vrot.lane.b32.xlu1 %v3686_v36, %s3483_s27  ;;  %1296 = vrot.lane.b32.xlu0 %v3586_v7, %s3480_s21  ;;  %v3839_v7 = vpop.permute.xlu0 %1321 }
  0xda   : > { %461 = vrot.lane.b32.xlu1 %v3696_v42, %s3483_s27  ;;  %1279 = vrot.lane.b32.xlu0 %v3574_v4, %s3483_s27  ;;  %v3825_v4 = vpop.permute.xlu1 %1307  ;;  %v3851_v12 = vpop.permute.xlu0 %1015 }
  0xde   : > { %459 = vrot.lane.b32.xlu1 %v3705_v47, %s3483_s27  ;;  %473 = vrot.lane.b32.xlu0 %v3672_v25, %s3483_s27  ;;  %v3837_v6 = vpop.permute.xlu1 %1287  ;;  %v3859_v17 = vpop.permute.xlu0 %1317 }
  0xe2   : > { %453 = vrot.lane.b32.xlu1 %v3744_v59, %s3483_s27  ;;  %471 = vrot.lane.b32.xlu0 %v3670_v24, %s3483_s27  ;;  %v3845_v8 = vpop.permute.xlu1 %1298  ;;  %v3864_v19 = vpop.permute.xlu0 %1289 }
  0xe6   : > { %442 = vrot.lane.b32.xlu1 %v3624_v13, %s3484_s28  ;;  %3383 = vrot.lane.b32.xlu0 %v3716_v57, %s3483_s27  ;;  %v3857_v16 = vpop.permute.xlu1 %1285 }
  0xea   : > { %661 = vrot.lane.b32.xlu1 %v3683_v35, %s3476_s17  ;;  %669 = vrot.lane.b32.xlu0 %v3672_v25, %s3476_s17 }
  0xee   : > { %3393 = vrot.lane.b32.xlu1 %v3716_v57, %s3476_s17  ;;  %465 = vrot.lane.b32.xlu0 %v3683_v35, %s3483_s27 }
  0xf2   : > { %651 = vrot.lane.b32.xlu1 %v3756_v60, %s3476_s17  ;;  %455 = vrot.lane.b32.xlu0 %v3756_v60, %s3483_s27 }
  0xf6   : > { %917 = vrot.lane.b32.xlu1 %v3672_v25, %s3485_s29  ;;  %667 = vrot.lane.b32.xlu0 %v3670_v24, %s3476_s17 }
  0xfa   : > { %915 = vrot.lane.b32.xlu1 %v3670_v24, %s3485_s29  ;;  %663 = vrot.lane.b32.xlu0 %v3686_v36, %s3476_s17 }
  0xfe   : > { %911 = vrot.lane.b32.xlu1 %v3686_v36, %s3485_s29  ;;  %657 = vrot.lane.b32.xlu0 %v3696_v42, %s3476_s17 }
 0x100   : > { %v3359_v18 = vpop.permute.xlu1 %3358 }
 0x101   : > { %v3360_v26 = vunpack.i.l.bf16 %v3359_v18  ;;  %v3361_v30 = vunpack.i.h.bf16 %v3359_v18 }
 0x102   : > { %905 = vrot.lane.b32.xlu1 %v3696_v42, %s3485_s29  ;;  %655 = vrot.lane.b32.xlu0 %v3705_v47, %s3476_s17 }
 0x104   : > { %v3873_v21 = vpop.permute.xlu1 %3368 }
 0x105   : > { %v3370_v46 = vunpack.i.l.bf16 %v3873_v21  ;;  %v3371_v49 = vunpack.i.h.bf16 %v3873_v21 }
 0x106   : > { %903 = vrot.lane.b32.xlu1 %v3705_v47, %s3485_s29  ;;  %649 = vrot.lane.b32.xlu0 %v3744_v59, %s3476_s17 }
 0x10a   : > { %897 = vrot.lane.b32.xlu1 %v3744_v59, %s3485_s29  ;;  %3398 = vrot.lane.b32.xlu0 %v3666_v20, %s3485_s29 }
 0x10e   : > { %3408 = vrot.lane.b32.xlu1 %v3666_v20, %s3486_s8  ;;  %647 = vrot.lane.b32.xlu0 %v3624_v13, %s3487_s9  ;;  %v3875_v20 = vpop.permute.xlu0 %1300  ;;  %s322_s9 = scalar_lea.vmem %s4704_s2, %s3562_s26  ;;  %s3211_s26 = sshll.u32 %s4713_s25, 6 }
 0x10f   : > { %s4315_s28 = scalar_lea.vmem %s4708_s6, %s3211_s26 }
 0x112   : > { %893 = vrot.lane.b32.xlu1 %v3644_v15, %s3488_s13  ;;  %909 = vrot.lane.b32.xlu0 %v3683_v35, %s3485_s29 }
 0x116   : > { %1151 = vrot.lane.b32.xlu1 %v3686_v36, %s3486_s8  ;;  %3403 = vrot.lane.b32.xlu0 %v3716_v57, %s3485_s29 }
 0x11a   : > { %1145 = vrot.lane.b32.xlu1 %v3696_v42, %s3486_s8  ;;  %899 = vrot.lane.b32.xlu0 %v3756_v60, %s3485_s29 }
 0x11c   : > { %v3881_v22 = vpop.permute.xlu1 %3373  ;;  %v3364_v23 = vpop.permute.xlu0 %3363 }
 0x11d   : > { %v3376_v18 = vunpack.i.h.bf16 %v3881_v22 }
 0x11e   : > { %1143 = vrot.lane.b32.xlu1 %v3705_v47, %s3486_s8  ;;  %1157 = vrot.lane.b32.xlu0 %v3672_v25, %s3486_s8 }
 0x120   : > { %v784_v27 = vpop.permute.xlu1 %783  ;;  %v790_v28 = vpop.permute.xlu0 %789 }
 0x121   : > { %v801_v29 = vsel %vm793_vm8, %v790_v28, %v3360_v26  ;;  %v799_v25 = vsel %vm793_vm8, %v784_v27, %v3361_v30  ;;  %v1325_v30 = vsel %vm1323_vm11, %v3807_v1, %v3839_v7  ;;  %v1293_v7 = vsel %vm1291_vm13, %v3837_v6, %v3864_v19 }
 0x122   : > { %1137 = vrot.lane.b32.xlu1 %v3744_v59, %s3486_s8  ;;  %891 = vrot.lane.b32.xlu0 %v3624_v13, %s3488_s13 }
 0x123   : > { %3165 = vmatprep.subr.msk.mxu1 %vm420_vm0, %v801_v29 }
 0x124   : > { %v778_v31 = vpop.permute.xlu1 %777  ;;  %v788_v32 = vpop.permute.xlu0 %787 }
 0x125   : > { %v800_v33 = vsel %vm793_vm8, %v788_v32, %v790_v28  ;;  %v1313_v32 = vsel %vm673_vm10, %v3825_v4, %v3801_v63 }
 0x126   : > { %1155 = vrot.lane.b32.xlu0 %v3670_v24, %s3486_s8  ;;  %3166 = vmatpush1.msk.msra.mxu1 %vm420_vm0, %v800_v33  ;;  %v3365_v24 = vunpack.i.l.bf16 %v3364_v23  ;;  %v1336_v33 = vsel %vm1334_vm12, %v3792_v62, %v3823_v3 }
 0x127   : > { %840 = vmatprep.subr.mxu1 %v799_v25  ;;  %1507 = vrot.lane.b32.xlu1 %v3467_v0, %s3475_s16  ;;  %v1324_v25 = vsel %vm1323_vm11, %v3859_v17, %v3807_v1 }
 0x128   : > { %v776_v34 = vpop.permute.xlu1 %775  ;;  %v1038_v13 = vpop.permute.xlu0 %1037 }
 0x129   : > { %v796_v42 = vsel %vm793_vm8, %v776_v34, %v778_v31  ;;  %v1049_v50 = vsel %vm1041_vm9, %v1038_v13, %v3370_v46 }
 0x12a   : > { %1149 = vrot.lane.b32.xlu0 %v3683_v35, %s3486_s8  ;;  %v797_v35 = vsel %vm793_vm8, %v778_v31, %v3365_v24 }
 0x12b   : > { %1135 = vrot.lane.b32.xlu1 %v3644_v15, %s3489_s14  ;;  %v3366_v15 = vunpack.i.h.bf16 %v3364_v23 }
 0x12c   : > { %v770_v36 = vpop.permute.xlu1 %769  ;;  %v1036_v37 = vpop.permute.xlu0 %1035 }
 0x12d   : > { %v1048_v51 = vsel %vm1041_vm9, %v1036_v37, %v1038_v13 }
 0x12e   : > { %3413 = vrot.lane.b32.xlu0 %v3716_v57, %s3486_s8  ;;  %v3375_v57 = vunpack.i.l.bf16 %v3881_v22  ;;  %v1314_v22 = vsel %vm673_vm10, %v3801_v63, %v3831_v5  ;;  %v1335_v5 = vsel %vm1334_vm12, %v3817_v2, %v3792_v62  ;;  %v1304_v63 = vsel %vm1302_vm14, %v3845_v8, %v3875_v20 }
 0x12f   : > { %1497 = vrot.lane.b32.xlu1 %v3467_v0, %s3477_s18  ;;  %v1342_v4 = vsel %vm420_vm0, %v1314_v22, %v1325_v30  ;;  %v1292_v62 = vsel %vm1291_vm13, %v3857_v16, %v3837_v6  ;;  %v1340_v17 = vsel %vm420_vm0, %v1293_v7, %v1304_v63 }
 0x130   : > { %v1030_v38 = vpop.permute.xlu1 %1029  ;;  %v782_v39 = vpop.permute.xlu0 %781 }
 0x131   : > { %v798_v41 = vsel %vm793_vm8, %v782_v39, %v784_v27 }
 0x132   : > { %1139 = vrot.lane.b32.xlu0 %v3756_v60, %s3486_s8  ;;  %841 = vmatpush1.msra.mxu1 %v798_v41 }
 0x133   : > { %842 = vmatprep.subr.mxu1 %v797_v35  ;;  %1477 = vrot.lane.b32.xlu1 %v3467_v0, %s3480_s21 }
 0x134   : > { %v1020_v43 = vpop.permute.xlu1 %1019  ;;  %v772_v45 = vpop.permute.xlu0 %771  ;;  %843 = vmatpush1.msra.mxu1 %v796_v42 }
 0x135   : > { %v795_v47 = vsel %vm793_vm8, %v772_v45, %v3366_v15  ;;  %v794_v48 = vsel %vm793_vm8, %v770_v36, %v772_v45  ;;  %v1043_v27 = vsel %vm1041_vm9, %v1020_v43, %v3376_v18 }
 0x136   : > { %844 = vmatprep.subr.mxu1 %v795_v47  ;;  %1487 = vrot.lane.b32.xlu0 %v3467_v0, %s3476_s17 }
 0x137   : > { %845 = vmatpush1.msra.mxu1 %v794_v48  ;;  %1457 = vrot.lane.b32.xlu1 %v3467_v0, %s3483_s27 }
 0x138   : > { %v1278_v52 = vpop.permute.xlu1 %1277  ;;  %v1032_v53 = vpop.permute.xlu0 %1031  ;;  %3167 = vmatmul.mubr.msk.f32.vlgmr.msra.gmra.mxu1 %vm492_vm7, %v3786_v61  ;;  %3171 = vmatprep.subr.msk.mxu1 %vm420_vm0, %v1049_v50 }
 0x139   : > { %3172 = vmatpush1.msk.msra.mxu1 %vm420_vm0, %v1048_v51  ;;  %v1047_v54 = vsel %vm1041_vm9, %v1032_v53, %v3371_v49  ;;  %v1046_v55 = vsel %vm1041_vm9, %v1030_v38, %v1032_v53  ;;  %1126 = vmatprep.mubr.f32.mxu1 %v3467_v0  ;;  %v1274_v38 = vld [vmem:[%s4705_s3] sm:$0xff] }
 0x13a   : > { %1088 = vmatprep.subr.mxu1 %v1047_v54  ;;  %1467 = vrot.lane.b32.xlu0 %v3467_v0, %s3479_s20 }
 0x13b   : > { %1089 = vmatpush1.msra.mxu1 %v1046_v55 }
 0x13c   : > { %v1276_v59 = vpop.permute.xlu1 %1275  ;;  %v1026_v60 = vpop.permute.xlu0 %1025 }
 0x13d   : > { %v1045_v61 = vsel %vm1041_vm9, %v1026_v60, %v3375_v57  ;;  %v1281_v20 = vsel %vm477_vm15, %v1276_v59, %v1278_v52 }
 0x13e   : > { %1090 = vmatprep.subr.mxu1 %v1045_v61  ;;  %1447 = vrot.lane.b32.xlu0 %v3467_v0, %s3471_s10  ;;  %v1337_v36 = vsel %vm420_vm0, %v3700_v44, %v1281_v20 }
 0x140   : > { %v3938_v21 = vpop.permute.xlu1 %3378  ;;  %v1024_v23 = vpop.permute.xlu0 %1023 }
 0x141   : > { %v1044_v26 = vsel %vm1041_vm9, %v1024_v23, %v1026_v60 }
 0x142   : > { %1091 = vmatpush1.msra.mxu1 %v1044_v26 }
 0x143   : > { %1092 = vmatprep.subr.mxu1 %v1043_v27 }
 0x144   : > { %v3942_v28 = vpop.permute.xlu1 %3388  ;;  %v1018_v29 = vpop.permute.xlu0 %1017 }
 0x145   : > { %v1042_v31 = vsel %vm1041_vm9, %v1018_v29, %v1020_v43  ;;  %v3390_v54 = vunpack.i.l.bf16 %v3942_v28  ;;  %vm1161_vm9 = vcmask 261120  }
 0x146   : > { %1093 = vmatpush1.msra.mxu1 %v1042_v31 }
 0x147   : > { %3173 = vmatmul.mubr.msk.f32.vlgmr.msra.gmra.mxu1 %vm492_vm7, %v3851_v12  ;;  %3177 = vmatprep.subr.msk.mxu1 %vm420_vm0, %v1336_v33  ;;  %v1341_v12 = vsel %vm420_vm0, %v1313_v32, %v1324_v25 }
 0x148   : > { %v468_v3 = vpop.permute.xlu1 %467  ;;  %v1297_v1 = vpop.permute.xlu0 %1296  ;;  %3178 = vmatpush1.msk.msra.mxu1 %vm420_vm0, %v1335_v5  ;;  %1415 = vmatprep.mubr.f32.mxu1 %v3467_v0 }
 0x149   : > { %v1303_v2 = vsel %vm1302_vm14, %v1297_v1, %v3845_v8  ;;  %1375 = vmatprep.subr.mxu1 %v1342_v4  ;;  %v3380_v8 = vunpack.i.l.bf16 %v3938_v21 }
 0x14a   : > { %1376 = vmatpush1.msra.mxu1 %v1341_v12  ;;  %v1339_v19 = vsel %vm420_vm0, %v1292_v62, %v1303_v2 }
 0x14b   : > { %1377 = vmatprep.subr.mxu1 %v1340_v17 }
 0x14c   : > { %v462_v34 = vpop.permute.xlu1 %461  ;;  %v1280_v13 = vpop.permute.xlu0 %1279  ;;  %1378 = vmatpush1.msra.mxu1 %v1339_v19 }
 0x14d   : > { %v1282_v6 = vsel %vm477_vm15, %v1278_v52, %v1280_v13 }
 0x14e   : > { %v1338_v16 = vsel %vm420_vm0, %v3691_v40, %v1282_v6  ;;  %v3381_v40 = vunpack.i.h.bf16 %v3938_v21  ;;  %v3391_v21 = vunpack.i.h.bf16 %v3942_v28 }
 0x14f   : > { %1379 = vmatprep.subr.mxu1 %v1338_v16 }
 0x150   : > { %v460_v37 = vpop.permute.xlu1 %459  ;;  %v474_v24 = vpop.permute.xlu0 %473  ;;  %1380 = vmatpush1.msra.mxu1 %v1337_v36  ;;  %v483_v15 = vsel %vm477_vm15, %v468_v3, %v3381_v40 }
 0x151   : > { %1381 = vmatprep.subr.mxu1 %v3714_v56  ;;  %v485_v39 = vsel %vm477_vm15, %v474_v24, %v3380_v8  ;;  %v480_v51 = vsel %vm477_vm15, %v460_v37, %v462_v34 }
 0x152   : > { %3156 = vmatprep.subr.msk.mxu0 %vm420_vm0, %v485_v39  ;;  %1382 = vmatpush1.msra.mxu1 %v3719_v58 }
 0x153   : > { %3179 = vmatmul.mubr.msk.f32.vlgmr.msra.gmra.mxu1 %vm1343_vm1, %v1274_v38  ;;  %vm895_vm1 = vcmask 130048  }
 0x154   : > { %v454_v44 = vpop.permute.xlu1 %453  ;;  %v472_v41 = vpop.permute.xlu0 %471  ;;  %1750 = vmatprep.mubr.f32.mxu1 %v3467_v0 }
 0x155   : > { %v484_v35 = vsel %vm477_vm15, %v472_v41, %v474_v24 }
 0x156   : > { %3157 = vmatpush1.msk.msra.mxu0 %vm420_vm0, %v484_v35 }
 0x157   : > { %525 = vmatprep.subr.mxu0 %v483_v15 }
 0x158   : > { %v443_v56 = vpop.permute.xlu1 %442  ;;  %v3384_v42 = vpop.permute.xlu0 %3383 }
 0x159   : > { %v3385_v46 = vunpack.i.l.bf16 %v3384_v42  ;;  %v3386_v50 = vunpack.i.h.bf16 %v3384_v42 }
 0x15b   : > { %v481_v49 = vsel %vm477_vm15, %v462_v34, %v3385_v46 }
 0x15c   : > { %v662_v43 = vpop.permute.xlu1 %661  ;;  %v670_v45 = vpop.permute.xlu0 %669 }
 0x15d   : > { %v681_v59 = vsel %vm673_vm10, %v670_v45, %v3390_v54 }
 0x160   : > { %v3394_v58 = vpop.permute.xlu1 %3393  ;;  %v466_v47 = vpop.permute.xlu0 %465 }
 0x161   : > { %v482_v48 = vsel %vm477_vm15, %v466_v47, %v468_v3  ;;  %v3395_v22 = vunpack.i.l.bf16 %v3394_v58  ;;  %v3396_v33 = vunpack.i.h.bf16 %v3394_v58 }
 0x162   : > { %526 = vmatpush1.msra.mxu0 %v482_v48 }
 0x163   : > { %527 = vmatprep.subr.mxu0 %v481_v49 }
 0x164   : > { %v652_v52 = vpop.permute.xlu1 %651  ;;  %v456_v53 = vpop.permute.xlu0 %455  ;;  %528 = vmatpush1.msra.mxu0 %v480_v51 }
 0x165   : > { %v479_v55 = vsel %vm477_vm15, %v456_v53, %v3386_v50  ;;  %v478_v57 = vsel %vm477_vm15, %v454_v44, %v456_v53  ;;  %v675_v28 = vsel %vm673_vm10, %v652_v52, %v3396_v33 }
 0x166   : > { %529 = vmatprep.subr.mxu0 %v479_v55 }
 0x167   : > { %530 = vmatpush1.msra.mxu0 %v478_v57 }
 0x168   : > { %v918_v60 = vpop.permute.xlu1 %917  ;;  %v668_v61 = vpop.permute.xlu0 %667  ;;  %3158 = vmatmul.mubr.msk.f32.vlgmr.msra.gmra.mxu0 %vm492_vm7, %v443_v56  ;;  %3162 = vmatprep.subr.msk.mxu0 %vm420_vm0, %v681_v59 }
 0x169   : > { %v680_v18 = vsel %vm673_vm10, %v668_v61, %v670_v45  ;;  %758 = vmatprep.mubr.f32.mxu0 %v3467_v0 }
 0x16a   : > { %3163 = vmatpush1.msk.msra.mxu0 %vm420_vm0, %v680_v18 }
 0x16c   : > { %v916_v23 = vpop.permute.xlu1 %915  ;;  %v664_v26 = vpop.permute.xlu0 %663 }
 0x16d   : > { %v679_v27 = vsel %vm673_vm10, %v664_v26, %v3391_v21  ;;  %v678_v29 = vsel %vm673_vm10, %v662_v43, %v664_v26  ;;  %v928_v34 = vsel %vm921_vm3, %v916_v23, %v918_v60 }
 0x16e   : > { %720 = vmatprep.subr.mxu0 %v679_v27  ;;  %v642_v27 = vpop.f32.mrf.mxu1 }
 0x16f   : > { %721 = vmatpush1.msra.mxu0 %v678_v29 }
 0x170   : > { %v912_v30 = vpop.permute.xlu1 %911  ;;  %v658_v31 = vpop.permute.xlu0 %657 }
 0x171   : > { %v677_v32 = vsel %vm673_vm10, %v658_v31, %v3395_v22  ;;  %v644_v29 = vpop.f32.mrf.mxu1 }
 0x172   : > { %722 = vmatprep.subr.mxu0 %v677_v32 }
 0x174   : > { %v906_v25 = vpop.permute.xlu1 %905  ;;  %v656_v5 = vpop.permute.xlu0 %655 }
 0x175   : > { %v676_v7 = vsel %vm673_vm10, %v656_v5, %v658_v31 }
 0x176   : > { %723 = vmatpush1.msra.mxu0 %v676_v7 }
 0x177   : > { %724 = vmatprep.subr.mxu0 %v675_v28  ;;  %v4081_v28 = vld [vmem:[#allocation2 + $0x8] sm:$0xff] }
 0x178   : > { %v904_v63 = vpop.permute.xlu1 %903  ;;  %v650_v3 = vpop.permute.xlu0 %649 }
 0x179   : > { %v674_v1 = vsel %vm673_vm10, %v650_v3, %v652_v52  ;;  %v924_v40 = vsel %vm921_vm3, %v904_v63, %v906_v25 }
 0x17a   : > { %725 = vmatpush1.msra.mxu0 %v674_v1 }
 0x17c   : > { %v898_v4 = vpop.permute.xlu1 %897  ;;  %v3399_v62 = vpop.permute.xlu0 %3398 }
 0x17d   : > { %v3400_v2 = vunpack.i.l.bf16 %v3399_v62  ;;  %v3401_v12 = vunpack.i.h.bf16 %v3399_v62 }
 0x17f   : > { %v929_v17 = vsel %vm921_vm3, %v918_v60, %v3400_v2  ;;  %v927_v13 = vsel %vm921_vm3, %v912_v30, %v3401_v12 }
 0x180   : > { %v3409_v19 = vpop.permute.xlu1 %3408  ;;  %v648_v20 = vpop.permute.xlu0 %647  ;;  %3168 = vmatprep.subr.msk.mxu0 %vm420_vm0, %v929_v17 }
 0x181   : > { %3164 = vmatmul.mubr.msk.f32.vlgmr.msra.gmra.mxu0 %vm492_vm7, %v648_v20  ;;  %v3410_v15 = vunpack.i.l.bf16 %v3409_v19  ;;  %v3411_v47 = vunpack.i.h.bf16 %v3409_v19 }
 0x182   : > { %3169 = vmatpush1.msk.msra.mxu0 %vm420_vm0, %v928_v34  ;;  %1006 = vmatprep.mubr.f32.mxu0 %v3467_v0 }
 0x183   : > { %968 = vmatprep.subr.mxu0 %v927_v13 }
 0x184   : > { %v894_v6 = vpop.permute.xlu1 %893  ;;  %v910_v16 = vpop.permute.xlu0 %909 }
 0x185   : > { %v926_v8 = vsel %vm921_vm3, %v910_v16, %v912_v30 }
 0x186   : > { %969 = vmatpush1.msra.mxu0 %v926_v8 }
 0x188   : > { %v3404_v36 = vpop.permute.xlu0 %3403  ;;  %v1152_v37 = vpop.permute.xlu1 %1151 }
 0x189   : > { %v3405_v24 = vunpack.i.l.bf16 %v3404_v36  ;;  %v3406_v38 = vunpack.i.h.bf16 %v3404_v36  ;;  %v1167_v50 = vsel %vm1161_vm9, %v1152_v37, %v3411_v47 }
 0x18b   : > { %v925_v39 = vsel %vm921_vm3, %v906_v25, %v3405_v24 }
 0x18c   : > { %v900_v44 = vpop.permute.xlu0 %899  ;;  %970 = vmatprep.subr.mxu0 %v925_v39  ;;  %v1146_v56 = vpop.permute.xlu1 %1145 }
 0x18d   : > { %971 = vmatpush1.msra.mxu0 %v924_v40  ;;  %v923_v41 = vsel %vm921_vm3, %v900_v44, %v3406_v38  ;;  %v922_v35 = vsel %vm921_vm3, %v898_v4, %v900_v44 }
 0x18e   : > { %972 = vmatprep.subr.mxu0 %v923_v41 }
 0x18f   : > { %973 = vmatpush1.msra.mxu0 %v922_v35 }
 0x190   : > { %v1158_v42 = vpop.permute.xlu0 %1157  ;;  %v1144_v46 = vpop.permute.xlu1 %1143 }
 0x191   : > { %v1169_v43 = vsel %vm1161_vm9, %v1158_v42, %v3410_v15  ;;  %v1164_v61 = vsel %vm1161_vm9, %v1144_v46, %v1146_v56 }
 0x192   : > { %3174 = vmatprep.subr.msk.mxu0 %vm420_vm0, %v1169_v43 }
 0x194   : > { %v892_v45 = vpop.permute.xlu0 %891  ;;  %v1138_v51 = vpop.permute.xlu1 %1137 }
 0x195   : > { %v896_v58 = vsel %vm895_vm1, %v892_v45, %v894_v6 }
 0x196   : > { %3170 = vmatmul.mubr.msk.f32.vlgmr.msra.gmra.mxu0 %vm492_vm7, %v896_v58 }
 0x197   : > { %1246 = vmatprep.mubr.f32.mxu0 %v3467_v0 }
 0x198   : > { %v1156_v48 = vpop.permute.xlu0 %1155 }
 0x199   : > { %v1168_v49 = vsel %vm1161_vm9, %v1156_v48, %v1158_v42  ;;  %v4041_v54 = vpop.permute.xlu1 %1507 }
 0x19a   : > { %3175 = vmatpush1.msk.msra.mxu0 %vm420_vm0, %v1168_v49  ;;  %vm1513_vm0 = vcmask 588800  }
 0x19b   : > { %1208 = vmatprep.subr.mxu0 %v1167_v50 }
 0x19c   : > { %v1150_v52 = vpop.permute.xlu0 %1149 }
 0x19d   : > { %v1166_v53 = vsel %vm1161_vm9, %v1150_v52, %v1152_v37  ;;  %v1136_v23 = vpop.permute.xlu1 %1135 }
 0x19e   : > { %1209 = vmatpush1.msra.mxu0 %v1166_v53 }
 0x1a0   : > { %v3414_v55 = vpop.permute.xlu0 %3413 }
 0x1a1   : > { %v3415_v57 = vunpack.i.l.bf16 %v3414_v55  ;;  %v3416_v59 = vunpack.i.h.bf16 %v3414_v55  ;;  %v1498_v8 = vpop.permute.xlu1 %1497 }
 0x1a3   : > { %v1165_v60 = vsel %vm1161_vm9, %v1146_v56, %v3415_v57 }
 0x1a4   : > { %v1140_v18 = vpop.permute.xlu0 %1139  ;;  %1210 = vmatprep.subr.mxu0 %v1165_v60 }
 0x1a5   : > { %1211 = vmatpush1.msra.mxu0 %v1164_v61  ;;  %v1163_v21 = vsel %vm1161_vm9, %v1140_v18, %v3416_v59  ;;  %v1162_v26 = vsel %vm1161_vm9, %v1138_v51, %v1140_v18  ;;  %v1478_v37 = vpop.permute.xlu1 %1477 }
 0x1a6   : > { %1212 = vmatprep.subr.mxu0 %v1163_v21 }
 0x1a7   : > { %1213 = vmatpush1.msra.mxu0 %v1162_v26 }
 0x1a8   : > { %3176 = vmatmul.mubr.msk.f32.vlgmr.msra.gmra.mxu0 %vm492_vm7, %v1136_v23  ;;  %v1488_v36 = vpop.permute.xlu0 %1487  ;;  %vm4271_vm7 = vcmp.lt.s32.totalorder %v438_v9, 256 }
 0x1a9   : > { %1581 = vmatprep.mubr.f32.mxu0 %v3467_v0  ;;  %v1458_v38 = vpop.permute.xlu1 %1457 }
 0x1ac   : > { %v1468_v24 = vpop.permute.xlu0 %1467 }
 0x1b0   : > { %v1448_v39 = vpop.permute.xlu0 %1447 }
 0x1f8   : > { %v880_v22 = vpop.f32.mrf.mxu1 }
 0x1fa   : > { %v882_v30 = vpop.f32.mrf.mxu1 }
 0x207   : > { %v1128_v31 = vpop.f32.mrf.mxu1 }
 0x209   : > { %v4049_v32 = vpop.f32.mrf.mxu1 }
 0x213   : > { %v4051_v33 = vpop.f32.mrf.mxu1 }
 0x214   : > { %1483 = vrot.lane.b32.xlu1 %v4051_v33, %s3476_s17  ;;  %1503 = vrot.lane.b32.xlu0 %v4051_v33, %s3475_s16 }
 0x215   : > { %v4065_v0 = vpop.f32.mrf.mxu1 }
 0x218   : > { %1463 = vrot.lane.b32.xlu1 %v4051_v33, %s3479_s20  ;;  %1493 = vrot.lane.b32.xlu0 %v4051_v33, %s3477_s18 }
 0x21c   : > { %1443 = vrot.lane.b32.xlu1 %v4051_v33, %s3471_s10  ;;  %1473 = vrot.lane.b32.xlu0 %v4051_v33, %s3480_s21 }
 0x220   : > { %1453 = vrot.lane.b32.xlu0 %v4051_v33, %s3483_s27  ;;  %1485 = vrot.lane.b32.xlu1 %v4065_v0, %s3476_s17 }
 0x224   : > { %1465 = vrot.lane.b32.xlu1 %v4065_v0, %s3479_s20  ;;  %1505 = vrot.lane.b32.xlu0 %v4065_v0, %s3475_s16 }
 0x228   : > { %v565_v25 = vpop.f32.mrf.mxu0  ;;  %1445 = vrot.lane.b32.xlu1 %v4065_v0, %s3471_s10  ;;  %1495 = vrot.lane.b32.xlu0 %v4065_v0, %s3477_s18 }
 0x229   : > { %v643_v63 = vadd.f32 %v642_v27, %v565_v25  ;;  %v1424_v25 = vld [vmem:[%s4705_s3 + $0x8] sm:$0xff] }
 0x22a   : > { %v567_v5 = vpop.f32.mrf.mxu0 }
 0x22b   : > { %v645_v7 = vadd.f32 %v644_v29, %v567_v5  ;;  %v3490_v5 = vmov 13  }
 0x22c   : > { %1475 = vrot.lane.b32.xlu0 %v4065_v0, %s3480_s21  ;;  %1437 = vrot.lane.b32.xlu1 %v4081_v28, %s3473_s12 }
 0x22d   : > { %3417 = vset.pattern.permute.xlu1 %v3490_v5 }
 0x230   : > { %1455 = vrot.lane.b32.xlu0 %v4065_v0, %s3483_s27  ;;  %1663 = vrot.lane.b32.xlu1 %v4081_v28, %s3477_s18 }
 0x234   : > { %1435 = vrot.lane.b32.xlu0 %v4065_v0, %s3473_s12  ;;  %1643 = vrot.lane.b32.xlu1 %v4081_v28, %s3480_s21 }
 0x238   : > { %1433 = vrot.lane.b32.xlu0 %v4051_v33, %s3473_s12  ;;  %1623 = vrot.lane.b32.xlu1 %v4081_v28, %s3483_s27 }
 0x23c   : > { %1673 = vrot.lane.b32.xlu0 %v4081_v28, %s3475_s16 }
 0x240   : > { %1653 = vrot.lane.b32.xlu0 %v4081_v28, %s3476_s17 }
 0x241   : > { %v760_v3 = vpop.f32.mrf.mxu0 }
 0x242   : > { %v765_v1 = vadd.f32 %v760_v3, %v643_v63 }
 0x243   : > { %v762_v4 = vpop.f32.mrf.mxu0 }
 0x244   : > { %v766_v62 = vadd.f32 %v762_v4, %v645_v7  ;;  %1633 = vrot.lane.b32.xlu0 %v4081_v28, %s3479_s20  ;;  %v885_v12 = vadd.f32 %v880_v22, %v765_v1  ;;  %v3491_v7 = vmov 14   ;;  %v3492_v1 = vmov 0  }
 0x245   : > { %3418 = vset.pattern.permute.xlu0 %v3491_v7  ;;  %v3493_v4 = vmov 3  }
 0x246   : > { %v886_v2 = vadd.f32 %v882_v30, %v766_v62  ;;  %v3494_v62 = vmov 4  }
 0x248   : > { %1613 = vrot.lane.b32.xlu0 %v4081_v28, %s3471_s10 }
 0x256   : > { %v1008_v17 = vpop.f32.mrf.mxu0 }
 0x257   : > { %v1013_v19 = vadd.f32 %v1008_v17, %v885_v12  ;;  %v3495_v12 = vmov 1   ;;  %v3496_v17 = vmov 2  }
 0x258   : > { %v1010_v20 = vpop.f32.mrf.mxu0 }
 0x259   : > { %v4105_v34 = vadd.f32 %v1010_v20, %v886_v2  ;;  %v1133_v13 = vadd.f32 %v1128_v31, %v1013_v19 }
 0x25b   : > { %v1134_v5 = vadd.f32 %v4049_v32, %v4105_v34  ;;  %v3182_v32 = vld [vmem:[%s322_s9 + $0x2] sm:$0x3] }
 0x25c   : > { %v1842_v34 = vrot.slane %v3182_v32, %v3611_v11 }
 0x268   : > { %v1248_v6 = vpop.f32.mrf.mxu0 }
 0x269   : > { %v4107_v16 = vadd.f32 %v1248_v6, %v1133_v13  ;;  %v3497_v13 = vmov 8   ;;  %v3498_v6 = vmov 9  }
 0x26a   : > { %v4134_v63 = vpop.f32.mrf.mxu0 }
 0x286   : > { %v1484_v40 = vpop.permute.xlu1 %1483  ;;  %v1504_v44 = vpop.permute.xlu0 %1503 }
 0x28a   : > { %v1464_v41 = vpop.permute.xlu1 %1463  ;;  %v1494_v35 = vpop.permute.xlu0 %1493 }
 0x28e   : > { %v1444_v15 = vpop.permute.xlu1 %1443  ;;  %v1474_v56 = vpop.permute.xlu0 %1473 }
 0x292   : > { %v1454_v42 = vpop.permute.xlu0 %1453  ;;  %v1486_v43 = vpop.permute.xlu1 %1485 }
 0x293   : > { %v1490_v51 = vsel %vm673_vm10, %v1486_v43, %v1488_v36  ;;  %v1489_v53 = vsel %vm673_vm10, %v1484_v40, %v1486_v43 }
 0x296   : > { %v1506_v45 = vpop.permute.xlu0 %1505  ;;  %v1466_v47 = vpop.permute.xlu1 %1465 }
 0x297   : > { %v1510_v46 = vsel %vm1334_vm12, %v1506_v45, %v4041_v54  ;;  %v1509_v58 = vsel %vm1334_vm12, %v1504_v44, %v1506_v45  ;;  %v1470_v59 = vsel %vm1291_vm13, %v1466_v47, %v1468_v24  ;;  %v1469_v61 = vsel %vm1291_vm13, %v1464_v41, %v1466_v47 }
 0x298   : > { %1531 = vmatprep.subr.mxu0 %v1510_v46  ;;  %v3500_v24 = vmov 6  }
 0x299   : > { %1532 = vmatpush1.msra.mxu0 %v1509_v58 }
 0x29a   : > { %v1496_v48 = vpop.permute.xlu0 %1495  ;;  %v1446_v57 = vpop.permute.xlu1 %1445 }
 0x29b   : > { %v1500_v49 = vsel %vm1323_vm11, %v1496_v48, %v1498_v8  ;;  %v1499_v50 = vsel %vm1323_vm11, %v1494_v35, %v1496_v48  ;;  %v1450_v26 = vsel %vm373_vm4, %v1446_v57, %v1448_v39  ;;  %v1449_v29 = vsel %vm373_vm4, %v1444_v15, %v1446_v57 }
 0x29c   : > { %1533 = vmatprep.subr.mxu0 %v1500_v49 }
 0x29d   : > { %1534 = vmatpush1.msra.mxu0 %v1499_v50 }
 0x29e   : > { %1535 = vmatprep.subr.mxu0 %v1490_v51  ;;  %v1476_v52 = vpop.permute.xlu0 %1475  ;;  %v1438_v23 = vpop.permute.xlu1 %1437 }
 0x29f   : > { %1536 = vmatpush1.msra.mxu0 %v1489_v53  ;;  %v1480_v54 = vsel %vm1302_vm14, %v1476_v52, %v1478_v37  ;;  %v1479_v55 = vsel %vm1302_vm14, %v1474_v56, %v1476_v52  ;;  %v3499_v37 = vmov 5  }
 0x2a0   : > { %1537 = vmatprep.subr.mxu0 %v1480_v54 }
 0x2a1   : > { %1538 = vmatpush1.msra.mxu0 %v1479_v55 }
 0x2a2   : > { %1539 = vmatprep.subr.mxu0 %v1470_v59  ;;  %v1456_v60 = vpop.permute.xlu0 %1455  ;;  %v1664_v19 = vpop.permute.xlu1 %1663 }
 0x2a3   : > { %1540 = vmatpush1.msra.mxu0 %v1469_v61  ;;  %v1460_v18 = vsel %vm477_vm15, %v1456_v60, %v1458_v38  ;;  %v1459_v21 = vsel %vm477_vm15, %v1454_v42, %v1456_v60 }
 0x2a4   : > { %1541 = vmatprep.subr.mxu0 %v1460_v18 }
 0x2a5   : > { %1542 = vmatpush1.msra.mxu0 %v1459_v21 }
 0x2a6   : > { %1543 = vmatprep.subr.mxu0 %v1450_v26  ;;  %v1436_v27 = vpop.permute.xlu0 %1435  ;;  %v1644_v8 = vpop.permute.xlu1 %1643 }
 0x2a7   : > { %1544 = vmatpush1.msra.mxu0 %v1449_v29  ;;  %v1440_v22 = vsel %vm362_vm6, %v1436_v27, %v1438_v23 }
 0x2a8   : > { %1545 = vmatprep.subr.mxu0 %v1440_v22 }
 0x2aa   : > { %v1434_v30 = vpop.permute.xlu0 %1433  ;;  %v1624_v38 = vpop.permute.xlu1 %1623 }
 0x2ab   : > { %v1439_v31 = vsel %vm362_vm6, %v1434_v30, %v1436_v27 }
 0x2ac   : > { %1546 = vmatpush1.msra.mxu0 %v1439_v31 }
 0x2ad   : > { %1547 = vmatprep.subr.mxu0 %v4065_v0  ;;  %v4175_v0 = vld [vmem:[%s4706_s4] sm:$0xff] }
 0x2ae   : > { %1548 = vmatpush1.msra.mxu0 %v4051_v33  ;;  %v1674_v2 = vpop.permute.xlu0 %1673 }
 0x2af   : > { %3180 = vmatmul.mubr.msk.f32.vlgmr.msra.gmra.mxu0 %vm1513_vm0, %v1424_v25  ;;  %v1590_v25 = vld [vmem:[%s4705_s3 + $0x10] sm:$0xff] }
 0x2b0   : > { %2283 = vmatprep.mubr.f32.mxu0 %v4081_v28 }
 0x2b2   : > { %v1654_v20 = vpop.permute.xlu0 %1653 }
 0x2b6   : > { %v1634_v36 = vpop.permute.xlu0 %1633 }
 0x2ba   : > { %v1614_v39 = vpop.permute.xlu0 %1613 }
 0x36f   : > { %v4136_v3 = vpop.f32.mrf.mxu0 }
 0x370   : > { %1659 = vrot.lane.b32.xlu0 %v4136_v3, %s3477_s18  ;;  %1669 = vrot.lane.b32.xlu1 %v4136_v3, %s3475_s16 }
 0x371   : > { %v4150_v33 = vpop.f32.mrf.mxu0 }
 0x374   : > { %1639 = vrot.lane.b32.xlu0 %v4136_v3, %s3480_s21  ;;  %1649 = vrot.lane.b32.xlu1 %v4136_v3, %s3476_s17 }
 0x378   : > { %1619 = vrot.lane.b32.xlu0 %v4136_v3, %s3483_s27  ;;  %1629 = vrot.lane.b32.xlu1 %v4136_v3, %s3479_s20 }
 0x37c   : > { %1609 = vrot.lane.b32.xlu1 %v4136_v3, %s3471_s10  ;;  %1661 = vrot.lane.b32.xlu0 %v4150_v33, %s3477_s18 }
 0x380   : > { %1641 = vrot.lane.b32.xlu0 %v4150_v33, %s3480_s21  ;;  %1671 = vrot.lane.b32.xlu1 %v4150_v33, %s3475_s16 }
 0x384   : > { %1621 = vrot.lane.b32.xlu0 %v4150_v33, %s3483_s27  ;;  %1651 = vrot.lane.b32.xlu1 %v4150_v33, %s3476_s17 }
 0x388   : > { %1601 = vrot.lane.b32.xlu0 %v4150_v33, %s3473_s12  ;;  %1631 = vrot.lane.b32.xlu1 %v4150_v33, %s3479_s20 }
 0x38c   : > { %1599 = vrot.lane.b32.xlu0 %v4136_v3, %s3473_s12  ;;  %1611 = vrot.lane.b32.xlu1 %v4150_v33, %s3471_s10 }
 0x390   : > { %1603 = vrot.lane.b32.xlu1 %v4081_v28, %s3473_s12  ;;  %1777 = vperm.xlu0 %3418, %v4175_v0  }
 0x394   : > { %1257 = vperm.xlu1 %3417, %v4175_v0   ;;  %3421 = vset.pattern.permute.xlu0 %v3495_v12 }
 0x395   : > { %1758 = vperm.xlu0 %3421, %v4175_v0  }
 0x398   : > { %3419 = vset.pattern.permute.xlu1 %v3492_v1  ;;  %v1254_v1 = vadd.f32 %v4134_v63, %v1134_v5  ;;  %v1846_v63 = vrot.slane %v3182_v32, %v3636_v14 }
 0x399   : > { %1680 = vperm.xlu1 %3419, %v4175_v0   ;;  %3424 = vset.pattern.permute.xlu0 %v3497_v13 }
 0x39a   : > { %2032 = vperm.xlu0 %3424, %v4175_v0  }
 0x39d   : > { %3420 = vset.pattern.permute.xlu1 %v3493_v4 }
 0x39e   : > { %1982 = vperm.xlu1 %3420, %v4175_v0   ;;  %3427 = vset.pattern.permute.xlu0 %v3500_v24 }
 0x39f   : > { %2118 = vperm.xlu0 %3427, %v4175_v0  }
 0x3a2   : > { %3422 = vset.pattern.permute.xlu1 %v3494_v62 }
 0x3a3   : > { %1999 = vperm.xlu1 %3422, %v4175_v0   ;;  %2200 = vrot.lane.b32.xlu0 %v4081_v28, %s3477_s18 }
 0x3a7   : > { %3423 = vset.pattern.permute.xlu1 %v3496_v17  ;;  %2180 = vrot.lane.b32.xlu0 %v4081_v28, %s3480_s21 }
 0x3a8   : > { %1764 = vperm.xlu1 %3423, %v4175_v0  }
 0x3ab   : > { %2160 = vrot.lane.b32.xlu0 %v4081_v28, %s3483_s27 }
 0x3ac   : > { %3425 = vset.pattern.permute.xlu1 %v3498_v6 }
 0x3ad   : > { %2052 = vperm.xlu1 %3425, %v4175_v0  }
 0x3b1   : > { %3426 = vset.pattern.permute.xlu1 %v3499_v37  ;;  %v3501_v37 = vmov 1966171168  }
 0x3b2   : > { %2112 = vperm.xlu1 %3426, %v4175_v0   ;;  %v1822_v24 = vunpack.c.l.s4 %v3501_v37 }
 0x3b6   : > { %2210 = vrot.lane.b32.xlu1 %v4081_v28, %s3475_s16 }
 0x3ba   : > { %2190 = vrot.lane.b32.xlu1 %v4081_v28, %s3476_s17 }
 0x3be   : > { %2170 = vrot.lane.b32.xlu1 %v4081_v28, %s3479_s20 }
 0x3c2   : > { %2150 = vrot.lane.b32.xlu1 %v4081_v28, %s3471_s10 }
 0x3e2   : > { %v1660_v40 = vpop.permute.xlu0 %1659  ;;  %v1670_v44 = vpop.permute.xlu1 %1669 }
 0x3e6   : > { %v1640_v41 = vpop.permute.xlu0 %1639  ;;  %v1650_v35 = vpop.permute.xlu1 %1649 }
 0x3ea   : > { %v1620_v15 = vpop.permute.xlu0 %1619  ;;  %v1630_v56 = vpop.permute.xlu1 %1629 }
 0x3ee   : > { %v1610_v42 = vpop.permute.xlu1 %1609  ;;  %v1662_v43 = vpop.permute.xlu0 %1661 }
 0x3ef   : > { %v1666_v48 = vsel %vm1323_vm11, %v1662_v43, %v1664_v19  ;;  %v1665_v51 = vsel %vm1323_vm11, %v1660_v40, %v1662_v43 }
 0x3f2   : > { %v1642_v45 = vpop.permute.xlu0 %1641  ;;  %v1672_v46 = vpop.permute.xlu1 %1671 }
 0x3f3   : > { %v1676_v58 = vsel %vm1334_vm12, %v1672_v46, %v1674_v2  ;;  %v1675_v47 = vsel %vm1334_vm12, %v1670_v44, %v1672_v46  ;;  %v1646_v54 = vsel %vm1302_vm14, %v1642_v45, %v1644_v8  ;;  %v1645_v57 = vsel %vm1302_vm14, %v1640_v41, %v1642_v45  ;;  %v1769_v8 = vld [vmem:[%s322_s9] sm:$0x3]  ;;  %v3184_v46 = vld [vmem:[%s322_s9 + $0x6] sm:$0x3] }
 0x3f4   : > { %1700 = vmatprep.subr.mxu1 %v1676_v58  ;;  %v1799_v40 = vrot.slane %v1769_v8, %v3611_v11 }
 0x3f5   : > { %1701 = vmatpush1.msra.mxu1 %v1675_v47 }
 0x3f6   : > { %v1622_v49 = vpop.permute.xlu0 %1621  ;;  %1702 = vmatprep.subr.mxu1 %v1666_v48  ;;  %v1652_v50 = vpop.permute.xlu1 %1651  ;;  %v1884_v48 = vrot.slane %v3184_v46, %v3611_v11 }
 0x3f7   : > { %1703 = vmatpush1.msra.mxu1 %v1665_v51  ;;  %v1656_v52 = vsel %vm673_vm10, %v1652_v50, %v1654_v20  ;;  %v1655_v53 = vsel %vm673_vm10, %v1650_v35, %v1652_v50  ;;  %v1626_v18 = vsel %vm477_vm15, %v1622_v49, %v1624_v38  ;;  %v1625_v23 = vsel %vm477_vm15, %v1620_v15, %v1622_v49 }
 0x3f8   : > { %1704 = vmatprep.subr.mxu1 %v1656_v52  ;;  %v1803_v35 = vrot.slane %v1769_v8, %v3636_v14  ;;  %v1888_v49 = vrot.slane %v3184_v46, %v3636_v14 }
 0x3f9   : > { %1705 = vmatpush1.msra.mxu1 %v1655_v53 }
 0x3fa   : > { %1706 = vmatprep.subr.mxu1 %v1646_v54  ;;  %v1632_v55 = vpop.permute.xlu1 %1631  ;;  %v1602_v59 = vpop.permute.xlu0 %1601 }
 0x3fb   : > { %1707 = vmatpush1.msra.mxu1 %v1645_v57  ;;  %v1636_v60 = vsel %vm1291_vm13, %v1632_v55, %v1634_v36  ;;  %v1635_v61 = vsel %vm1291_vm13, %v1630_v56, %v1632_v55  ;;  %v4237_v36 = vld [vmem:[%s322_s9 + $0x4] sm:$0x3]  ;;  %s318_s9 = scalar_lea.vmem %s4703_s1, %s3211_s26 }
 0x3fc   : > { %1708 = vmatprep.subr.mxu1 %v1636_v60  ;;  %v4242_v44 = vrot.slane %v4237_v36, %v3611_v11  ;;  %v4247_v15 = vrot.slane %v4237_v36, %v3636_v14 }
 0x3fd   : > { %1709 = vmatpush1.msra.mxu1 %v1635_v61 }
 0x3fe   : > { %1710 = vmatprep.subr.mxu1 %v1626_v18  ;;  %v1612_v21 = vpop.permute.xlu1 %1611  ;;  %v1600_v29 = vpop.permute.xlu0 %1599 }
 0x3ff   : > { %1711 = vmatpush1.msra.mxu1 %v1625_v23  ;;  %v1616_v26 = vsel %vm373_vm4, %v1612_v21, %v1614_v39  ;;  %v1615_v27 = vsel %vm373_vm4, %v1610_v42, %v1612_v21  ;;  %v1605_v31 = vsel %vm362_vm6, %v1600_v29, %v1602_v59  ;;  %v1823_v42 = vunpack.c.0.s8 %v1822_v24 }
 0x400   : > { %1712 = vmatprep.subr.mxu1 %v1616_v26 }
 0x401   : > { %1713 = vmatpush1.msra.mxu1 %v1615_v27  ;;  %v4254_v57 = vsub.s32 %v1823_v42, %v3604_v10 }
 0x402   : > { %v1604_v22 = vpop.permute.xlu1 %1603 }
 0x403   : > { %v1606_v30 = vsel %vm362_vm6, %v1602_v59, %v1604_v22 }
 0x404   : > { %1714 = vmatprep.subr.mxu1 %v1606_v30 }
 0x405   : > { %1715 = vmatpush1.msra.mxu1 %v1605_v31 }
 0x406   : > { %1716 = vmatprep.subr.mxu1 %v4150_v33 }
 0x407   : > { %1717 = vmatpush1.msra.mxu1 %v4136_v3 }
 0x408   : > { %3181 = vmatmul.mubr.msk.f32.vlgmr.msra.gmra.mxu1 %vm1513_vm0, %v1590_v25 }
 0x409   : > { %2452 = vmatprep.mubr.f32.mxu1 %v4081_v28 }
 0x40f   : > { %v1258_v4 = vpop.permute.xlu1 %1257 }
 0x410   : > { %v1260_v62 = vadd.f32 %v1258_v4, %v4107_v16  ;;  %v1261_v2 = vadd.f32 %v1258_v4, %v1254_v1  ;;  %v1778_v16 = vpop.permute.xlu0 %1777 }
 0x411   : > { %v1849_v38 = vmul.f32 %v1842_v34, %v1778_v16  ;;  %v1850_v39 = vmul.f32 %v1846_v63, %v1778_v16  ;;  %v1793_v51 = vmul.f32 %v4242_v44, %v1778_v16  ;;  %v1794_v53 = vmul.f32 %v4247_v15, %v1778_v16 }
 0x412   : > { %v1262_v12 = vsub.f32 0.0, %v1260_v62  ;;  %v1263_v17 = vsub.f32 0.0, %v1261_v2  ;;  %v1891_v54 = vmul.f32 %v1884_v48, %v1778_v16  ;;  %v1892_v55 = vmul.f32 %v1888_v49, %v1778_v16 }
 0x413   : > { %v1853_v43 = vrot.slane %v1849_v38, 1  ;;  %v1854_v58 = vrot.slane %v1850_v39, 1 }
 0x414   : > { %v1264_v19 = vmul.f32 1.442695, %v1262_v12  ;;  %v1266_v33 = vmul.f32 1.442695, %v1263_v17  ;;  %v1895_v21 = vrot.slane %v1891_v54, 3  ;;  %v1896_v23 = vrot.slane %v1892_v55, 3  ;;  %v1681_v9 = vpop.permute.xlu1 %1680 }
 0x415   : > { %v1941_v27 = vrot.slane %v1891_v54, 1  ;;  %v1942_v29 = vrot.slane %v1892_v55, 1 }
 0x416   : > { %3436 = vpow2.f32 %v1264_v19  ;;  %v4256_v25 = vadd.f32 %v1895_v21, %v1849_v38  ;;  %v4258_v5 = vadd.f32 %v1896_v23, %v1850_v39 }
 0x417   : > { %3438 = vpow2.f32 %v1266_v33  ;;  %v1945_v1 = vsub.f32 %v1793_v51, %v1941_v27  ;;  %v1946_v10 = vsub.f32 %v1794_v53, %v1942_v29 }
 0x419   : > { %v1947_v12 = vmul.f32 0.01, %v1945_v1  ;;  %v1948_v17 = vmul.f32 0.01, %v1946_v10  ;;  %v3188_v10 = vld [vmem:[%s318_s9 + $0x10] sm:$0xff] }
 0x423   : > { %v3437_v3 = vpop.eup %3436 }
 0x424   : > { %v3439_v20 = vpop.eup %3438  ;;  %v1268_v13 = vadd.f32 1.0, %v3437_v3  ;;  %v1951_v3 = vcombine.low %v1947_v12, %v1948_v17 }
 0x425   : > { %v1269_v6 = vadd.f32 1.0, %v3439_v20 }
 0x426   : > { %3440 = vrcp.f32 %v1268_v13 }
 0x427   : > { %3442 = vrcp.f32 %v1269_v6  ;;  %v1958_v6 = vrot.slane %v1951_v3, %v4254_v57  ;;  %v3189_v3 = vld [vmem:[%s318_s9 + $0x18] sm:$0xff] }
 0x429   : > { %v1959_v37 = vcombine.high %v1958_v6, %v1958_v6 }
 0x42b   : > { %v1966_v38 = vrot.slane %v1959_v37, %v4254_v57 }
 0x433   : > { %v3441_v41 = vpop.eup %3440 }
 0x434   : > { %v3443_v56 = vpop.eup %3442  ;;  %v1780_v45 = vmul.f32 %v3441_v41, %v1778_v16 }
 0x435   : > { %v1781_v47 = vmul.f32 %v3443_v56, %v1778_v16 }
 0x436   : > { %v1806_v50 = vmul.f32 %v1799_v40, %v1780_v45  ;;  %v1967_v40 = vcombine.high %v1966_v38, %v1966_v38  ;;  %v4310_v38 = vld [vmem:[%s318_s9 + $0x30] sm:$0xff] }
 0x437   : > { %v1807_v52 = vmul.f32 %v1803_v35, %v1781_v47  ;;  %v1759_v47 = vpop.permute.xlu0 %1758 }
 0x438   : > { %v1857_v59 = vsub.f32 %v1806_v50, %v1853_v43  ;;  %v1810_v60 = vrot.slane %v1806_v50, 6  ;;  %v1969_v41 = vadd.f32 %v3184_v46, %v1967_v40  ;;  %v4317_v40 = vld [vmem:[%s318_s9 + $0x38] sm:$0xff] }
 0x439   : > { %v1858_v61 = vsub.f32 %v1807_v52, %v1854_v58  ;;  %v1811_v18 = vrot.slane %v1807_v52, 6 }
 0x43a   : > { %v1859_v26 = vmul.f32 0.01, %v1857_v59  ;;  %v1814_v22 = vsub.f32 %v1793_v51, %v1810_v60  ;;  %3187 = vst.msk [vmem:[%s4267_s19 + $0x6] sm:$0x3] %vm4271_vm7, %v1969_v41  ;;  %v4319_v41 = vld [vmem:[%s318_s9 + $0x20] sm:$0xff] }
 0x43b   : > { %v1860_v30 = vmul.f32 0.01, %v1858_v61  ;;  %v1815_v31 = vsub.f32 %v1794_v53, %v1811_v18  ;;  %v2033_v1 = vpop.permute.xlu0 %2032 }
 0x43c   : > { %v1816_v4 = vmul.f32 0.01, %v1814_v22 }
 0x43d   : > { %v1863_v62 = vcombine.low %v1859_v26, %v1860_v30  ;;  %v1817_v2 = vmul.f32 0.01, %v1815_v31 }
 0x43f   : > { %v1870_v19 = vrot.slane %v1863_v62, %v4254_v57  ;;  %v1820_v33 = vcombine.low %v1816_v4, %v1817_v2  ;;  %v4292_v2 = vld [vmem:[%s318_s9] sm:$0xff] }
 0x441   : > { %v1877_v20 = vrot.slane %v1870_v19, %v4254_v57  ;;  %v1827_v13 = vrot.slane %v1820_v33, %v4254_v57  ;;  %v4296_v33 = vld [vmem:[%s318_s9 + $0x8] sm:$0xff] }
 0x443   : > { %v1879_v16 = vadd.f32 %v3182_v32, %v1877_v20  ;;  %v1834_v63 = vrot.slane %v1827_v13, %v4254_v57  ;;  %v1983_v32 = vpop.permute.xlu1 %1982 }
 0x445   : > { %v1835_v24 = vcombine.high %v1834_v63, %v1834_v63  ;;  %3185 = vst.msk [vmem:[%s4267_s19 + $0x2] sm:$0x3] %vm4271_vm7, %v1879_v16  ;;  %v1989_v35 = vrot.slane %v1879_v16, %v3611_v11  ;;  %v1993_v56 = vrot.slane %v1879_v16, %v3636_v14 }
 0x447   : > { %v1837_v39 = vadd.f32 %v1835_v24, %v1769_v8  ;;  %v1996_v42 = vmul.f32 %v1989_v35, %v1983_v32  ;;  %v2000_v43 = vpop.permute.xlu1 %1999  ;;  %v1997_v45 = vmul.f32 %v1993_v56, %v1983_v32  ;;  %v2119_v56 = vpop.permute.xlu0 %2118 }
 0x449   : > { %1974 = vst.msk [vmem:[%s4267_s19] sm:$0x3] %vm4271_vm7, %v1837_v39  ;;  %v2002_v8 = vadd.f32 %v2000_v43, %v1996_v42  ;;  %v2003_v51 = vadd.f32 %v2000_v43, %v1997_v45 }
 0x44b   : > { %v1765_v50 = vpop.permute.xlu1 %1764  ;;  %v2004_v53 = vmax.f32 %v2002_v8, 0.0  ;;  %v2005_v59 = vmax.f32 %v2003_v51, 0.0 }
 0x44f   : > { %v2053_v4 = vpop.permute.xlu1 %2052 }
 0x450   : > { %v4294_v17 = vmul.f32 %v3188_v10, %v2053_v4  ;;  %v4304_v16 = vmul.f32 %v3189_v3, %v2053_v4 }
 0x453   : > { %v2113_v39 = vpop.permute.xlu1 %2112 }
 0x4c8   : > { %v1752_v58 = vpop.f32.mrf.mxu1 }
 0x4c9   : > { %v1753_v48 = vadd.f32 %v1752_v58, %v1681_v9 }
 0x4ca   : > { %v1754_v49 = vpop.f32.mrf.mxu1 }
 0x4cb   : > { %v1761_v46 = vmul.f32 %v1759_v47, %v1753_v48  ;;  %v1755_v52 = vadd.f32 %v1754_v49, %v1681_v9  ;;  %v4321_v9 = vld [vmem:[%s318_s9 + $0x28] sm:$0xff]  ;;  %v2211_v49 = vpop.permute.xlu1 %2210 }
 0x4cd   : > { %v1762_v54 = vmul.f32 %v1759_v47, %v1755_v52  ;;  %v1767_v55 = vadd.f32 %v1765_v50, %v1761_v46 }
 0x4cf   : > { %v1768_v60 = vadd.f32 %v1765_v50, %v1762_v54  ;;  %v2006_v61 = vsub.f32 %v1767_v55, %v2004_v53  ;;  %v2201_v50 = vpop.permute.xlu0 %2200  ;;  %v2191_v51 = vpop.permute.xlu1 %2190 }
 0x4d1   : > { %v2007_v18 = vsub.f32 %v1768_v60, %v2005_v59  ;;  %v2008_v21 = vsub.f32 0.0, %v2006_v61 }
 0x4d3   : > { %v2009_v23 = vsub.f32 0.0, %v2007_v18  ;;  %v2010_v26 = vmul.f32 1.442695, %v2008_v21  ;;  %v2181_v46 = vpop.permute.xlu0 %2180  ;;  %v2171_v52 = vpop.permute.xlu1 %2170 }
 0x4d5   : > { %3444 = vpow2.f32 %v2010_v26  ;;  %v2012_v27 = vmul.f32 1.442695, %v2009_v23 }
 0x4d7   : > { %3446 = vpow2.f32 %v2012_v27  ;;  %v2161_v53 = vpop.permute.xlu0 %2160  ;;  %v2151_v54 = vpop.permute.xlu1 %2150 }
 0x4e2   : > { %v3445_v29 = vpop.eup %3444 }
 0x4e3   : > { %v2014_v22 = vadd.f32 1.0, %v3445_v29 }
 0x4e4   : > { %v3447_v30 = vpop.eup %3446 }
 0x4e5   : > { %v2015_v31 = vadd.f32 1.0, %v3447_v30  ;;  %3448 = vrcp.f32 %v2014_v22 }
 0x4e7   : > { %3450 = vrcp.f32 %v2015_v31 }
 0x4f2   : > { %v3449_v62 = vpop.eup %3448 }
 0x4f3   : > { %v2035_v12 = vmul.f32 %v3449_v62, %v2033_v1 }
 0x4f4   : > { %v3451_v19 = vpop.eup %3450 }
 0x4f5   : > { %v2036_v20 = vmul.f32 %v3451_v19, %v2033_v1  ;;  %v4299_v13 = vmul.f32 %v2035_v12, %v4292_v2 }
 0x4f7   : > { %v4302_v6 = vmul.f32 %v2036_v20, %v4296_v33  ;;  %v2057_v63 = vsub.f32 %v4299_v13, %v4294_v17 }
 0x4f9   : > { %v2058_v37 = vsub.f32 %v4302_v6, %v4304_v16  ;;  %v2059_v24 = vmul.f32 0.01, %v2057_v63 }
 0x4fb   : > { %v2060_v32 = vmul.f32 0.01, %v2058_v37  ;;  %v2061_v35 = vadd.f32 %v3188_v10, %v2059_v24 }
 0x4fd   : > { %v2062_v42 = vadd.f32 %v3189_v3, %v2060_v32  ;;  %v2115_v43 = vmul.f32 %v2113_v39, %v2061_v35  ;;  %3194 = vst [vmem:[%s4315_s28 + $0x10] sm:$0xff] %v2061_v35 }
 0x4ff   : > { %v2121_v45 = vadd.f32 %v2119_v56, %v2115_v43  ;;  %3195 = vst [vmem:[%s4315_s28 + $0x18] sm:$0xff] %v2062_v42  ;;  %v2116_v47 = vmul.f32 %v2113_v39, %v2062_v42 }
 0x501   : > { %v4325_v58 = vmax.f32 %v2121_v45, 0.0  ;;  %v2122_v8 = vadd.f32 %v2119_v56, %v2116_v47 }
 0x503   : > { %2196 = vrot.lane.b32.xlu1 %v4325_v58, %s3477_s18  ;;  %2206 = vrot.lane.b32.xlu0 %v4325_v58, %s3475_s16  ;;  %v4339_v48 = vmax.f32 %v2122_v8, 0.0 }
 0x507   : > { %2176 = vrot.lane.b32.xlu1 %v4325_v58, %s3480_s21  ;;  %2186 = vrot.lane.b32.xlu0 %v4325_v58, %s3476_s17 }
 0x50b   : > { %2156 = vrot.lane.b32.xlu1 %v4325_v58, %s3483_s27  ;;  %2166 = vrot.lane.b32.xlu0 %v4325_v58, %s3479_s20 }
 0x50f   : > { %2208 = vrot.lane.b32.xlu1 %v4339_v48, %s3475_s16  ;;  %2146 = vrot.lane.b32.xlu0 %v4325_v58, %s3471_s10 }
 0x513   : > { %2198 = vrot.lane.b32.xlu1 %v4339_v48, %s3477_s18  ;;  %2188 = vrot.lane.b32.xlu0 %v4339_v48, %s3476_s17 }
 0x517   : > { %2178 = vrot.lane.b32.xlu1 %v4339_v48, %s3480_s21  ;;  %2168 = vrot.lane.b32.xlu0 %v4339_v48, %s3479_s20 }
 0x51b   : > { %2158 = vrot.lane.b32.xlu1 %v4339_v48, %s3483_s27  ;;  %2148 = vrot.lane.b32.xlu0 %v4339_v48, %s3471_s10 }
 0x51f   : > { %2138 = vrot.lane.b32.xlu1 %v4339_v48, %s3473_s12  ;;  %2140 = vrot.lane.b32.xlu0 %v4081_v28, %s3473_s12 }
 0x523   : > { %2136 = vrot.lane.b32.xlu1 %v4325_v58, %s3473_s12  ;;  %2365 = vrot.lane.b32.xlu0 %v4081_v28, %s3477_s18 }
 0x527   : > { %2375 = vrot.lane.b32.xlu1 %v4081_v28, %s3475_s16  ;;  %2345 = vrot.lane.b32.xlu0 %v4081_v28, %s3480_s21 }
 0x52b   : > { %2355 = vrot.lane.b32.xlu1 %v4081_v28, %s3476_s17  ;;  %2325 = vrot.lane.b32.xlu0 %v4081_v28, %s3483_s27 }
 0x52f   : > { %2335 = vrot.lane.b32.xlu1 %v4081_v28, %s3479_s20 }
 0x533   : > { %2315 = vrot.lane.b32.xlu1 %v4081_v28, %s3471_s10 }
 0x575   : > { %v2197_v55 = vpop.permute.xlu1 %2196  ;;  %v2207_v59 = vpop.permute.xlu0 %2206 }
 0x579   : > { %v2177_v60 = vpop.permute.xlu1 %2176  ;;  %v2187_v61 = vpop.permute.xlu0 %2186 }
 0x57d   : > { %v2157_v18 = vpop.permute.xlu1 %2156  ;;  %v2167_v21 = vpop.permute.xlu0 %2166 }
 0x581   : > { %v2209_v23 = vpop.permute.xlu1 %2208  ;;  %v2147_v26 = vpop.permute.xlu0 %2146 }
 0x582   : > { %v2212_v27 = vsel %vm1334_vm12, %v2207_v59, %v2209_v23  ;;  %v2213_v29 = vsel %vm1334_vm12, %v2209_v23, %v2211_v49  ;;  %v2127_v49 = vld [vmem:[%s4705_s3 + $0x28] sm:$0xff] }
 0x583   : > { %2233 = vmatprep.subr.mxu0 %v2213_v29 }
 0x584   : > { %2234 = vmatpush1.msra.mxu0 %v2212_v27 }
 0x585   : > { %v2199_v22 = vpop.permute.xlu1 %2198  ;;  %v2189_v30 = vpop.permute.xlu0 %2188 }
 0x586   : > { %v2202_v31 = vsel %vm1323_vm11, %v2197_v55, %v2199_v22  ;;  %v2203_v1 = vsel %vm1323_vm11, %v2199_v22, %v2201_v50  ;;  %v2193_v10 = vsel %vm673_vm10, %v2189_v30, %v2191_v51  ;;  %v2192_v4 = vsel %vm673_vm10, %v2187_v61, %v2189_v30 }
 0x587   : > { %2235 = vmatprep.subr.mxu0 %v2203_v1 }
 0x588   : > { %2236 = vmatpush1.msra.mxu0 %v2202_v31 }
 0x589   : > { %v2179_v62 = vpop.permute.xlu1 %2178  ;;  %2237 = vmatprep.subr.mxu0 %v2193_v10  ;;  %v2169_v12 = vpop.permute.xlu0 %2168 }
 0x58a   : > { %v2182_v19 = vsel %vm1302_vm14, %v2177_v60, %v2179_v62  ;;  %2238 = vmatpush1.msra.mxu0 %v2192_v4  ;;  %v2183_v3 = vsel %vm1302_vm14, %v2179_v62, %v2181_v46  ;;  %v2173_v20 = vsel %vm1291_vm13, %v2169_v12, %v2171_v52  ;;  %v2172_v63 = vsel %vm1291_vm13, %v2167_v21, %v2169_v12 }
 0x58b   : > { %2239 = vmatprep.subr.mxu0 %v2183_v3 }
 0x58c   : > { %2240 = vmatpush1.msra.mxu0 %v2182_v19 }
 0x58d   : > { %v2159_v37 = vpop.permute.xlu1 %2158  ;;  %2241 = vmatprep.subr.mxu0 %v2173_v20  ;;  %v2149_v24 = vpop.permute.xlu0 %2148 }
 0x58e   : > { %v2162_v39 = vsel %vm477_vm15, %v2157_v18, %v2159_v37  ;;  %2242 = vmatpush1.msra.mxu0 %v2172_v63  ;;  %v2163_v32 = vsel %vm477_vm15, %v2159_v37, %v2161_v53  ;;  %v2153_v35 = vsel %vm373_vm4, %v2149_v24, %v2151_v54  ;;  %v2152_v56 = vsel %vm373_vm4, %v2147_v26, %v2149_v24 }
 0x58f   : > { %2243 = vmatprep.subr.mxu0 %v2163_v32 }
 0x590   : > { %2244 = vmatpush1.msra.mxu0 %v2162_v39 }
 0x591   : > { %v2139_v42 = vpop.permute.xlu1 %2138  ;;  %2245 = vmatprep.subr.mxu0 %v2153_v35  ;;  %v2141_v43 = vpop.permute.xlu0 %2140 }
 0x592   : > { %2246 = vmatpush1.msra.mxu0 %v2152_v56  ;;  %v2143_v45 = vsel %vm362_vm6, %v2139_v42, %v2141_v43 }
 0x593   : > { %2247 = vmatprep.subr.mxu0 %v2143_v45 }
 0x595   : > { %v2137_v47 = vpop.permute.xlu1 %2136  ;;  %v2366_v52 = vpop.permute.xlu0 %2365 }
 0x596   : > { %v2142_v8 = vsel %vm362_vm6, %v2137_v47, %v2139_v42 }
 0x597   : > { %2248 = vmatpush1.msra.mxu0 %v2142_v8  ;;  %v2292_v8 = vld [vmem:[%s4705_s3 + $0x30] sm:$0xff] }
 0x598   : > { %2249 = vmatprep.subr.mxu0 %v4339_v48  ;;  %v3502_v48 = vmov 7  }
 0x599   : > { %2250 = vmatpush1.msra.mxu0 %v4325_v58  ;;  %3428 = vset.pattern.permute.xlu0 %v3502_v48  ;;  %v2376_v51 = vpop.permute.xlu1 %2375  ;;  %v2346_v54 = vpop.permute.xlu0 %2345 }
 0x59a   : > { %3200 = vmatmul.mubr.msk.f32.vlgmr.msra.gmra.mxu0 %vm1513_vm0, %v2127_v49  ;;  %3243 = vmatprep.subr.mxu0 %v4081_v28  ;;  %v4463_v49 = vld [vmem:[#allocation2 + $0x8] sm:$0xff] }
 0x59d   : > { %v2356_v46 = vpop.permute.xlu1 %2355  ;;  %v2326_v59 = vpop.permute.xlu0 %2325 }
 0x5a1   : > { %v2336_v53 = vpop.permute.xlu1 %2335 }
 0x5a5   : > { %v2316_v55 = vpop.permute.xlu1 %2315 }
 0x65a   : > { %v4400_v50 = vpop.f32.mrf.mxu0 }
 0x65b   : > { %2361 = vrot.lane.b32.xlu1 %v4400_v50, %s3477_s18  ;;  %2371 = vrot.lane.b32.xlu0 %v4400_v50, %s3475_s16 }
 0x65c   : > { %v4414_v58 = vpop.f32.mrf.mxu0 }
 0x65f   : > { %2341 = vrot.lane.b32.xlu1 %v4400_v50, %s3480_s21  ;;  %2351 = vrot.lane.b32.xlu0 %v4400_v50, %s3476_s17 }
 0x663   : > { %2321 = vrot.lane.b32.xlu1 %v4400_v50, %s3483_s27  ;;  %2331 = vrot.lane.b32.xlu0 %v4400_v50, %s3479_s20 }
 0x667   : > { %2311 = vrot.lane.b32.xlu0 %v4400_v50, %s3471_s10  ;;  %2363 = vrot.lane.b32.xlu1 %v4414_v58, %s3477_s18 }
 0x66b   : > { %2343 = vrot.lane.b32.xlu1 %v4414_v58, %s3480_s21  ;;  %2373 = vrot.lane.b32.xlu0 %v4414_v58, %s3475_s16 }
 0x66f   : > { %2323 = vrot.lane.b32.xlu1 %v4414_v58, %s3483_s27  ;;  %2353 = vrot.lane.b32.xlu0 %v4414_v58, %s3476_s17 }
 0x673   : > { %2303 = vrot.lane.b32.xlu1 %v4414_v58, %s3473_s12  ;;  %2333 = vrot.lane.b32.xlu0 %v4414_v58, %s3479_s20 }
 0x677   : > { %2301 = vrot.lane.b32.xlu1 %v4400_v50, %s3473_s12  ;;  %2313 = vrot.lane.b32.xlu0 %v4414_v58, %s3471_s10 }
 0x67b   : > { %2305 = vrot.lane.b32.xlu0 %v4081_v28, %s3473_s12 }
 0x67f   : > { %2382 = vperm.xlu0 %3428, %v4175_v0  }
 0x683   : > { %3429 = vset.pattern.permute.xlu0 %v3491_v7 }
 0x6cd   : > { %v2362_v60 = vpop.permute.xlu1 %2361  ;;  %v2372_v61 = vpop.permute.xlu0 %2371 }
 0x6d1   : > { %v2342_v18 = vpop.permute.xlu1 %2341  ;;  %v2352_v21 = vpop.permute.xlu0 %2351 }
 0x6d5   : > { %v2322_v23 = vpop.permute.xlu1 %2321  ;;  %v2332_v26 = vpop.permute.xlu0 %2331 }
 0x6d9   : > { %v2312_v27 = vpop.permute.xlu0 %2311  ;;  %v2364_v29 = vpop.permute.xlu1 %2363 }
 0x6da   : > { %v2368_v30 = vsel %vm1323_vm11, %v2364_v29, %v2366_v52  ;;  %v2367_v31 = vsel %vm1323_vm11, %v2362_v60, %v2364_v29 }
 0x6dd   : > { %v2344_v28 = vpop.permute.xlu1 %2343  ;;  %v2374_v22 = vpop.permute.xlu0 %2373 }
 0x6de   : > { %v2377_v0 = vsel %vm1334_vm12, %v2372_v61, %v2374_v22  ;;  %v2378_v7 = vsel %vm1334_vm12, %v2374_v22, %v2376_v51  ;;  %v2348_v12 = vsel %vm1302_vm14, %v2344_v28, %v2346_v54  ;;  %v2347_v19 = vsel %vm1302_vm14, %v2342_v18, %v2344_v28  ;;  %v4469_v51 = vld [vmem:[%s4705_s3 + $0x38] ss:$8 sm:$0x3] }
 0x6df   : > { %2402 = vmatprep.subr.mxu1 %v2378_v7 }
 0x6e0   : > { %2403 = vmatpush1.msra.mxu1 %v2377_v0 }
 0x6e1   : > { %v2324_v1 = vpop.permute.xlu1 %2323  ;;  %2404 = vmatprep.subr.mxu1 %v2368_v30  ;;  %v2354_v10 = vpop.permute.xlu0 %2353 }
 0x6e2   : > { %v2357_v4 = vsel %vm673_vm10, %v2352_v21, %v2354_v10  ;;  %2405 = vmatpush1.msra.mxu1 %v2367_v31  ;;  %v2358_v62 = vsel %vm673_vm10, %v2354_v10, %v2356_v46  ;;  %v2328_v24 = vsel %vm477_vm15, %v2324_v1, %v2326_v59  ;;  %v2327_v39 = vsel %vm477_vm15, %v2322_v23, %v2324_v1 }
 0x6e3   : > { %2406 = vmatprep.subr.mxu1 %v2358_v62  ;;  %v2497_v46 = vrot.slane %v4469_v51, %v3611_v11  ;;  %v3504_v11 = vmov 12  }
 0x6e4   : > { %2407 = vmatpush1.msra.mxu1 %v2357_v4  ;;  %3430 = vset.pattern.permute.xlu1 %v3504_v11 }
 0x6e5   : > { %2408 = vmatprep.subr.mxu1 %v2348_v12  ;;  %v2334_v3 = vpop.permute.xlu0 %2333  ;;  %v2304_v20 = vpop.permute.xlu1 %2303  ;;  %2498 = vrot.lane.b32.xlu0 %v2497_v46, %s3489_s14  ;;  %s3503_s14 = smov 8  }
 0x6e6   : > { %v2337_v63 = vsel %vm1291_vm13, %v2332_v26, %v2334_v3  ;;  %2409 = vmatpush1.msra.mxu1 %v2347_v19  ;;  %v2338_v37 = vsel %vm1291_vm13, %v2334_v3, %v2336_v53  ;;  %v2783_v3 = vrot.slane %v4469_v51, %v3636_v14 }
 0x6e7   : > { %2410 = vmatprep.subr.mxu1 %v2338_v37  ;;  %v3506_v37 = vmov 10  }
 0x6e8   : > { %2411 = vmatpush1.msra.mxu1 %v2337_v63 }
 0x6e9   : > { %2412 = vmatprep.subr.mxu1 %v2328_v24  ;;  %v2314_v32 = vpop.permute.xlu0 %2313  ;;  %v2302_v42 = vpop.permute.xlu1 %2301  ;;  %v3507_v24 = vmov 11  }
 0x6ea   : > { %v2317_v35 = vsel %vm373_vm4, %v2312_v27, %v2314_v32  ;;  %2413 = vmatpush1.msra.mxu1 %v2327_v39  ;;  %v2318_v56 = vsel %vm373_vm4, %v2314_v32, %v2316_v55  ;;  %v2307_v47 = vsel %vm362_vm6, %v2302_v42, %v2304_v20 }
 0x6eb   : > { %2414 = vmatprep.subr.mxu1 %v2318_v56 }
 0x6ec   : > { %2415 = vmatpush1.msra.mxu1 %v2317_v35 }
 0x6ed   : > { %v2306_v43 = vpop.permute.xlu0 %2305 }
 0x6ee   : > { %v2308_v45 = vsel %vm362_vm6, %v2304_v20, %v2306_v43  ;;  %v4583_v20 = vld [vmem:[%s4706_s4] sm:$0xff] }
 0x6ef   : > { %2416 = vmatprep.subr.mxu1 %v2308_v45  ;;  %v1901_v63 = vrot.slane %v4583_v20, 1 }
 0x6f0   : > { %2417 = vmatpush1.msra.mxu1 %v2307_v47 }
 0x6f1   : > { %2418 = vmatprep.subr.mxu1 %v4414_v58  ;;  %v1903_v14 = vadd.f32 %v4583_v20, %v1901_v63 }
 0x6f2   : > { %2419 = vmatpush1.msra.mxu1 %v4400_v50 }
 0x6f3   : > { %3201 = vmatmul.mubr.msk.f32.vlgmr.msra.gmra.mxu1 %vm1513_vm0, %v2292_v8  ;;  %3256 = vmatprep.subr.mxu1 %v4463_v49 }
 0x6fa   : > { %v2383_v52 = vpop.permute.xlu0 %2382 }
 0x757   : > { %v4510_v61 = vpop.permute.xlu0 %2498 }
 0x7b3   : > { %v2454_v58 = vpop.f32.mrf.mxu1 }
 0x7b4   : > { %v2455_v53 = vadd.f32 %v2454_v58, %v2383_v52 }
 0x7b5   : > { %v2456_v50 = vpop.f32.mrf.mxu1 }
 0x7b6   : > { %v4474_v54 = vmax.f32 %v2455_v53, 0.0  ;;  %v2457_v55 = vadd.f32 %v2456_v50, %v2383_v52 }
 0x7b8   : > { %2461 = vst [vmem:[#allocation2 + $0x10] sm:$0xff] %v4474_v54  ;;  %v4477_v59 = vmax.f32 %v2457_v55, 0.0  ;;  %2481 = vrot.lane.b32.xlu0 %v4474_v54, %s3472_s11  ;;  %2487 = vrot.lane.b32.xlu1 %v4474_v54, %s3468_s30 }
 0x7ba   : > { %2462 = vst [vmem:[#allocation2] sm:$0xff] %v4477_v59 }
 0x7bc   : > { %2475 = vrot.lane.b32.xlu0 %v4474_v54, %s3471_s10  ;;  %2677 = vrot.lane.b32.xlu1 %v4474_v54, %s3476_s17 }
 0x7c0   : > { %2469 = vrot.lane.b32.xlu0 %v4474_v54, %s3473_s12  ;;  %2489 = vrot.lane.b32.xlu1 %v4477_v59, %s3468_s30 }
 0x7c4   : > { %2500 = vrot.lane.b32.xlu0 %v4474_v54, %s3483_s27  ;;  %2483 = vrot.lane.b32.xlu1 %v4477_v59, %s3472_s11 }
 0x7c8   : > { %2790 = vrot.lane.b32.xlu0 %v4474_v54, %s3481_s22  ;;  %2477 = vrot.lane.b32.xlu1 %v4477_v59, %s3471_s10 }
 0x7cc   : > { %2784 = vrot.lane.b32.xlu0 %v2497_v46, %s3503_s14  ;;  %2471 = vrot.lane.b32.xlu1 %v4477_v59, %s3473_s12 }
 0x7d0   : > { %2679 = vrot.lane.b32.xlu0 %v4477_v59, %s3476_s17  ;;  %2675 = vrot.lane.b32.xlu1 %v2497_v46, %s3482_s23 }
 0x7d4   : > { %2502 = vrot.lane.b32.xlu1 %v4477_v59, %s3483_s27 }
 0x7d8   : > { %2792 = vrot.lane.b32.xlu1 %v4477_v59, %s3481_s22 }
 0x82a   : > { %v2488_v60 = vpop.permute.xlu1 %2487  ;;  %v2482_v21 = vpop.permute.xlu0 %2481 }
 0x82e   : > { %v4512_v18 = vpop.permute.xlu1 %2677  ;;  %v2476_v28 = vpop.permute.xlu0 %2475 }
 0x832   : > { %v2490_v23 = vpop.permute.xlu1 %2489  ;;  %v2470_v7 = vpop.permute.xlu0 %2469 }
 0x833   : > { %2518 = vrot.lane.b32.xlu1 %v2490_v23, %s3483_s27  ;;  %v2491_v26 = vsel %vm395_vm2, %v2488_v60, %v2490_v23  ;;  %vm3505_vm2 = vmmov 0  }
 0x834   : > { %3257 = vmatpush3.msra.mxu1 %v2491_v26  ;;  %3253 = vmatprep.mubr.msk.f32.mxu0 %vm3505_vm2, %v4463_v49 }
 0x835   : > { %3258 = vmatprep.subr.mxu1 %v4463_v49  ;;  %3266 = vmatprep.mubr.msk.f32.mxu1 %vm3505_vm2, %v4463_v49 }
 0x836   : > { %v2484_v27 = vpop.permute.xlu1 %2483  ;;  %v4534_v10 = vpop.permute.xlu0 %2500 }
 0x837   : > { %2691 = vrot.lane.b32.xlu0 %v2484_v27, %s3476_s17  ;;  %2514 = vrot.lane.b32.xlu1 %v2484_v27, %s3483_s27  ;;  %v2485_v29 = vsel %vm384_vm5, %v2482_v21, %v2484_v27  ;;  %vm2788_vm5 = vcmask 64512  }
 0x838   : > { %3259 = vmatpush3.msra.mxu1 %v2485_v29 }
 0x839   : > { %3260 = vmatprep.subr.mxu1 %v4463_v49 }
 0x83a   : > { %v2478_v22 = vpop.permute.xlu1 %2477  ;;  %v2791_v62 = vpop.permute.xlu0 %2790 }
 0x83b   : > { %2687 = vrot.lane.b32.xlu0 %v2478_v22, %s3476_s17  ;;  %2510 = vrot.lane.b32.xlu1 %v2478_v22, %s3483_s27  ;;  %v2479_v0 = vsel %vm373_vm4, %v2476_v28, %v2478_v22  ;;  %vm2530_vm4 = vcmask 326656  }
 0x83c   : > { %3261 = vmatpush3.msra.mxu1 %v2479_v0 }
 0x83d   : > { %3262 = vmatprep.subr.mxu1 %v4463_v49 }
 0x83e   : > { %v2472_v30 = vpop.permute.xlu1 %2471  ;;  %v4593_v39 = vpop.permute.xlu0 %2784 }
 0x83f   : > { %2683 = vrot.lane.b32.xlu0 %v2472_v30, %s3476_s17  ;;  %2506 = vrot.lane.b32.xlu1 %v2472_v30, %s3483_s27  ;;  %v2473_v31 = vsel %vm362_vm6, %v2470_v7, %v2472_v30 }
 0x840   : > { %3263 = vmatpush3.msra.mxu1 %v2473_v31 }
 0x841   : > { %3264 = vmatprep.subr.mxu1 %v4463_v49 }
 0x842   : > { %3265 = vmatpush3.msra.mxu1 %v4474_v54  ;;  %v4530_v1 = vpop.permute.xlu1 %2675  ;;  %v2680_v32 = vpop.permute.xlu0 %2679 }
 0x843   : > { %2808 = vrot.lane.b32.xlu0 %v2490_v23, %s3481_s22  ;;  %2695 = vrot.lane.b32.xlu1 %v2490_v23, %s3476_s17 }
 0x844   : > { %3282 = vmatprep.subr.mxu1 %v4463_v49  ;;  %3267 = vmatmul.mubr.msk.f32.vlgmr.msra.gmra.mxu1 %vm2530_vm4, %v4469_v51 }
 0x845   : > { %3292 = vmatprep.mubr.msk.f32.mxu1 %vm3505_vm2, %v4463_v49 }
 0x846   : > { %v4537_v4 = vpop.permute.xlu1 %2502 }
 0x847   : > { %2804 = vrot.lane.b32.xlu0 %v2484_v27, %s3481_s22  ;;  %2800 = vrot.lane.b32.xlu1 %v2478_v22, %s3481_s22 }
 0x84a   : > { %v2793_v12 = vpop.permute.xlu1 %2792 }
 0x84b   : > { %v4542_v19 = vsel %vm793_vm8, %v2791_v62, %v2793_v12  ;;  %2913 = vrot.lane.b32.xlu0 %v2490_v23, %s3485_s29  ;;  %2909 = vrot.lane.b32.xlu1 %v2484_v27, %s3485_s29 }
 0x84f   : > { %2516 = vrot.lane.b32.xlu0 %v2491_v26, %s3483_s27  ;;  %2796 = vrot.lane.b32.xlu1 %v2472_v30, %s3481_s22 }
 0x853   : > { %2512 = vrot.lane.b32.xlu0 %v2485_v29, %s3483_s27  ;;  %2905 = vrot.lane.b32.xlu1 %v2478_v22, %s3485_s29 }
 0x857   : > { %2508 = vrot.lane.b32.xlu0 %v2479_v0, %s3483_s27  ;;  %2901 = vrot.lane.b32.xlu1 %v2472_v30, %s3485_s29 }
 0x85b   : > { %2504 = vrot.lane.b32.xlu0 %v2473_v31, %s3483_s27  ;;  %2689 = vrot.lane.b32.xlu1 %v2485_v29, %s3476_s17 }
 0x85f   : > { %2693 = vrot.lane.b32.xlu0 %v2491_v26, %s3476_s17  ;;  %2685 = vrot.lane.b32.xlu1 %v2479_v0, %s3476_s17 }
 0x863   : > { %2895 = vrot.lane.b32.xlu0 %v4474_v54, %s3485_s29  ;;  %2681 = vrot.lane.b32.xlu1 %v2473_v31, %s3476_s17 }
 0x867   : > { %2798 = vrot.lane.b32.xlu0 %v2479_v0, %s3481_s22  ;;  %2806 = vrot.lane.b32.xlu1 %v2491_v26, %s3481_s22 }
 0x86b   : > { %2907 = vrot.lane.b32.xlu0 %v2485_v29, %s3485_s29  ;;  %2802 = vrot.lane.b32.xlu1 %v2485_v29, %s3481_s22 }
 0x86f   : > { %2794 = vrot.lane.b32.xlu0 %v2473_v31, %s3481_s22  ;;  %2911 = vrot.lane.b32.xlu1 %v2491_v26, %s3485_s29 }
 0x873   : > { %2903 = vrot.lane.b32.xlu0 %v2479_v0, %s3485_s29  ;;  %2786 = vrot.lane.b32.xlu1 %v2783_v3, %s3503_s14  ;;  %v2520_v0 = vsel %vm477_vm15, %v4534_v10, %v4537_v4 }
 0x877   : > { %2899 = vrot.lane.b32.xlu0 %v2473_v31, %s3485_s29  ;;  %2897 = vrot.lane.b32.xlu1 %v4477_v59, %s3485_s29 }
 0x87b   : > { %2893 = vrot.lane.b32.xlu0 %v2783_v3, %s3476_s17  ;;  %2071 = vrot.lane.b32.xlu1 %v4583_v20, %s3473_s12  ;;  %s325_s17 = scalar_lea.vmem %s4707_s5, %s4713_s25 }
 0x87f   : > { %1906 = vperm.xlu0 %3429, %v1903_v14   ;;  %2064 = vperm.xlu1 %3430, %v4583_v20   ;;  %v2697_v14 = vsel %vm673_vm10, %v4512_v18, %v2680_v32 }
 0x883   : > { %3431 = vset.pattern.permute.xlu1 %v3506_v37  ;;  %3432 = vset.pattern.permute.xlu0 %v3506_v37 }
 0x884   : > { %2038 = vperm.xlu1 %3431, %v4583_v20  }
 0x888   : > { %3433 = vset.pattern.permute.xlu1 %v3507_v24 }
 0x889   : > { %2089 = vperm.xlu1 %3433, %v4583_v20  }
 0x8a5   : > { %v2519_v35 = vpop.permute.xlu1 %2518 }
 0x8a9   : > { %v2692_v56 = vpop.permute.xlu0 %2691  ;;  %v2515_v42 = vpop.permute.xlu1 %2514 }
 0x8ad   : > { %v2688_v43 = vpop.permute.xlu0 %2687  ;;  %v2511_v45 = vpop.permute.xlu1 %2510 }
 0x8b1   : > { %v2684_v47 = vpop.permute.xlu0 %2683  ;;  %v2507_v8 = vpop.permute.xlu1 %2506 }
 0x8b5   : > { %v2809_v51 = vpop.permute.xlu0 %2808  ;;  %v2696_v46 = vpop.permute.xlu1 %2695 }
 0x8b9   : > { %v2805_v52 = vpop.permute.xlu0 %2804  ;;  %v2801_v58 = vpop.permute.xlu1 %2800 }
 0x8bd   : > { %v4595_v53 = vpop.permute.xlu0 %2913  ;;  %v4597_v50 = vpop.permute.xlu1 %2909 }
 0x8c1   : > { %v2517_v54 = vpop.permute.xlu0 %2516  ;;  %v2797_v55 = vpop.permute.xlu1 %2796 }
 0x8c2   : > { %v2524_v59 = vsel %vm477_vm15, %v2517_v54, %v2519_v35 }
 0x8c3   : > { %3244 = vmatpush3.msra.mxu0 %v2524_v59 }
 0x8c4   : > { %3245 = vmatprep.subr.mxu0 %v4463_v49 }
 0x8c5   : > { %v2513_v11 = vpop.permute.xlu0 %2512  ;;  %v4601_v60 = vpop.permute.xlu1 %2905 }
 0x8c6   : > { %v2523_v21 = vsel %vm477_vm15, %v2513_v11, %v2515_v42 }
 0x8c7   : > { %3246 = vmatpush3.msra.mxu0 %v2523_v21 }
 0x8c8   : > { %3247 = vmatprep.subr.mxu0 %v4463_v49 }
 0x8c9   : > { %v2509_v23 = vpop.permute.xlu0 %2508  ;;  %v4605_v26 = vpop.permute.xlu1 %2901 }
 0x8ca   : > { %v2522_v27 = vsel %vm477_vm15, %v2509_v23, %v2511_v45 }
 0x8cb   : > { %3248 = vmatpush3.msra.mxu0 %v2522_v27 }
 0x8cc   : > { %3249 = vmatprep.subr.mxu0 %v4463_v49 }
 0x8cd   : > { %v2505_v29 = vpop.permute.xlu0 %2504  ;;  %v2690_v28 = vpop.permute.xlu1 %2689 }
 0x8ce   : > { %v2521_v22 = vsel %vm477_vm15, %v2505_v29, %v2507_v8  ;;  %v2700_v62 = vsel %vm673_vm10, %v2690_v28, %v2692_v56 }
 0x8cf   : > { %3250 = vmatpush3.msra.mxu0 %v2521_v22 }
 0x8d0   : > { %3251 = vmatprep.subr.mxu0 %v4463_v49 }
 0x8d1   : > { %v2694_v7 = vpop.permute.xlu0 %2693  ;;  %3252 = vmatpush3.msra.mxu0 %v2520_v0  ;;  %v2686_v30 = vpop.permute.xlu1 %2685 }
 0x8d2   : > { %v2701_v31 = vsel %vm673_vm10, %v2694_v7, %v2696_v46  ;;  %3254 = vmatmul.mubr.msk.f32.vlgmr.msra.gmra.mxu0 %vm2530_vm4, %v4510_v61  ;;  %3269 = vmatprep.subr.mxu0 %v4463_v49  ;;  %v2699_v12 = vsel %vm673_vm10, %v2686_v30, %v2688_v43 }
 0x8d3   : > { %3270 = vmatpush3.msra.mxu0 %v2701_v31  ;;  %3279 = vmatprep.mubr.msk.f32.mxu0 %vm3505_vm2, %v4463_v49 }
 0x8d4   : > { %3271 = vmatprep.subr.mxu0 %v4463_v49 }
 0x8d5   : > { %v2896_v10 = vpop.permute.xlu0 %2895  ;;  %3272 = vmatpush3.msra.mxu0 %v2700_v62  ;;  %v2682_v4 = vpop.permute.xlu1 %2681 }
 0x8d6   : > { %3273 = vmatprep.subr.mxu0 %v4463_v49  ;;  %v2698_v61 = vsel %vm673_vm10, %v2682_v4, %v2684_v47 }
 0x8d7   : > { %3274 = vmatpush3.msra.mxu0 %v2699_v12 }
 0x8d8   : > { %3275 = vmatprep.subr.mxu0 %v4463_v49 }
 0x8d9   : > { %v2799_v3 = vpop.permute.xlu0 %2798  ;;  %3276 = vmatpush3.msra.mxu0 %v2698_v61  ;;  %v2807_v63 = vpop.permute.xlu1 %2806 }
 0x8da   : > { %v2814_v37 = vsel %vm793_vm8, %v2807_v63, %v2809_v51  ;;  %3277 = vmatprep.subr.mxu0 %v4463_v49  ;;  %v2812_v32 = vsel %vm793_vm8, %v2799_v3, %v2801_v58 }
 0x8db   : > { %3278 = vmatpush3.msra.mxu0 %v2697_v14  ;;  %3283 = vmatpush3.msra.mxu1 %v2814_v37 }
 0x8dc   : > { %3280 = vmatmul.mubr.msk.f32.vlgmr.msra.gmra.mxu0 %vm2530_vm4, %v4530_v1  ;;  %3284 = vmatprep.subr.mxu1 %v4463_v49 }
 0x8dd   : > { %v2908_v24 = vpop.permute.xlu0 %2907  ;;  %v2803_v35 = vpop.permute.xlu1 %2802  ;;  %3295 = vmatprep.subr.mxu0 %v4463_v49  ;;  %3305 = vmatprep.mubr.msk.f32.mxu0 %vm3505_vm2, %v4463_v49 }
 0x8de   : > { %v2813_v18 = vsel %vm793_vm8, %v2803_v35, %v2805_v52  ;;  %v2918_v45 = vsel %vm921_vm3, %v2908_v24, %v4597_v50 }
 0x8df   : > { %3285 = vmatpush3.msra.mxu1 %v2813_v18 }
 0x8e0   : > { %3286 = vmatprep.subr.mxu1 %v4463_v49 }
 0x8e1   : > { %v2795_v56 = vpop.permute.xlu0 %2794  ;;  %3287 = vmatpush3.msra.mxu1 %v2812_v32  ;;  %v2912_v42 = vpop.permute.xlu1 %2911 }
 0x8e2   : > { %v2811_v1 = vsel %vm793_vm8, %v2795_v56, %v2797_v55  ;;  %v2919_v43 = vsel %vm921_vm3, %v2912_v42, %v4595_v53  ;;  %3288 = vmatprep.subr.mxu1 %v4463_v49 }
 0x8e3   : > { %3289 = vmatpush3.msra.mxu1 %v2811_v1  ;;  %3296 = vmatpush3.msra.mxu0 %v2919_v43 }
 0x8e4   : > { %3290 = vmatprep.subr.mxu1 %v4463_v49  ;;  %3297 = vmatprep.subr.mxu0 %v4463_v49 }
 0x8e5   : > { %v2904_v47 = vpop.permute.xlu0 %2903  ;;  %3291 = vmatpush3.msra.mxu1 %v4542_v19  ;;  %3298 = vmatpush3.msra.mxu0 %v2918_v45  ;;  %v2787_v8 = vpop.permute.xlu1 %2786 }
 0x8e6   : > { %v2917_v51 = vsel %vm921_vm3, %v2904_v47, %v4601_v60  ;;  %v2789_v46 = vsel %vm2788_vm5, %v4593_v39, %v2787_v8  ;;  %3299 = vmatprep.subr.mxu0 %v4463_v49 }
 0x8e7   : > { %3293 = vmatmul.mubr.msk.f32.vlgmr.msra.gmra.mxu1 %vm2530_vm4, %v2789_v46  ;;  %3300 = vmatpush3.msra.mxu0 %v2917_v51 }
 0x8e8   : > { %3301 = vmatprep.subr.mxu0 %v4463_v49 }
 0x8e9   : > { %v2900_v52 = vpop.permute.xlu0 %2899  ;;  %v2898_v58 = vpop.permute.xlu1 %2897 }
 0x8ea   : > { %v2916_v53 = vsel %vm921_vm3, %v2900_v52, %v4605_v26  ;;  %v2915_v19 = vsel %vm921_vm3, %v2896_v10, %v2898_v58 }
 0x8eb   : > { %3302 = vmatpush3.msra.mxu0 %v2916_v53 }
 0x8ec   : > { %3303 = vmatprep.subr.mxu0 %v4463_v49 }
 0x8ed   : > { %v2894_v50 = vpop.permute.xlu0 %2893  ;;  %3304 = vmatpush3.msra.mxu0 %v2915_v19  ;;  %v2072_v39 = vpop.permute.xlu1 %2071 }
 0x8ee   : > { %v2074_v54 = vadd.f32 %v4583_v20, %v2072_v39  ;;  %3306 = vmatmul.mubr.msk.f32.vlgmr.msra.gmra.mxu0 %vm2530_vm4, %v2894_v50 }
 0x8f0   : > { %2077 = vperm.xlu0 %3432, %v2074_v54  }
 0x8f4   : > { %3434 = vset.pattern.permute.xlu0 %v3502_v48 }
 0x8fa   : > { %v1907_v55 = vpop.permute.xlu0 %1906  ;;  %v2065_v59 = vpop.permute.xlu1 %2064 }
 0x8fb   : > { %v1909_v11 = vmul.f32 %v1907_v55, %v4242_v44  ;;  %v1910_v60 = vmul.f32 %v1907_v55, %v4247_v15  ;;  %v2067_v12 = vmul.f32 %v4310_v38, %v2065_v59 }
 0x8fd   : > { %v1913_v21 = vrot.slane %v1909_v11, 1  ;;  %v1914_v23 = vrot.slane %v1910_v60, 1  ;;  %v2069_v24 = vadd.f32 %v2067_v12, %v4294_v17 }
 0x8ff   : > { %v1917_v49 = vsub.f32 %v4256_v25, %v1913_v21  ;;  %v1918_v26 = vsub.f32 %v4258_v5, %v1914_v23  ;;  %v2039_v20 = vpop.permute.xlu1 %2038 }
 0x900   : > { %v2041_v27 = vmul.f32 %v4319_v41, %v2039_v20  ;;  %v2042_v29 = vmul.f32 %v4321_v9, %v2039_v20 }
 0x901   : > { %v1919_v48 = vmul.f32 0.01, %v1917_v49  ;;  %v1920_v28 = vmul.f32 0.01, %v1918_v26 }
 0x902   : > { %v2045_v44 = vsub.f32 %v2041_v27, %v4299_v13  ;;  %v2046_v15 = vsub.f32 %v2042_v29, %v4302_v6 }
 0x903   : > { %v1923_v22 = vcombine.low %v1919_v48, %v1920_v28 }
 0x904   : > { %v2047_v0 = vmul.f32 0.01, %v2045_v44  ;;  %v2048_v7 = vmul.f32 0.01, %v2046_v15  ;;  %v2671_v13 = vpop.f32.mrf.mxu1  ;;  %v2090_v4 = vpop.permute.xlu1 %2089 }
 0x905   : > { %v1930_v25 = vrot.slane %v1923_v22, %v4254_v57  ;;  %v2093_v61 = vmul.f32 %v4321_v9, %v2090_v4 }
 0x906   : > { %v2049_v5 = vadd.f32 %v2047_v0, %v4292_v2  ;;  %v2050_v30 = vadd.f32 %v2048_v7, %v4296_v33  ;;  %v3268_v6 = vpop.f32.mrf.mxu1  ;;  %v2068_v2 = vmul.f32 %v4317_v40, %v2065_v59  ;;  %v2092_v33 = vmul.f32 %v4319_v41, %v2090_v4 }
 0x907   : > { %v1931_v31 = vcombine.high %v1930_v25, %v1930_v25 }
 0x908   : > { %2100 = vst [vmem:[%s4315_s28] sm:$0xff] %v2049_v5  ;;  %2101 = vst [vmem:[%s4315_s28 + $0x8] sm:$0xff] %v2050_v30  ;;  %v2094_v3 = vsub.f32 %v2092_v33, %v2067_v12  ;;  %v2070_v35 = vadd.f32 %v2068_v2, %v4304_v16 }
 0x909   : > { %v1938_v62 = vrot.slane %v1931_v31, %v4254_v57  ;;  %v2095_v57 = vsub.f32 %v2093_v61, %v2068_v2 }
 0x90a   : > { %v2096_v63 = vmul.f32 0.01, %v2094_v3 }
 0x90b   : > { %v1940_v10 = vadd.f32 %v4237_v36, %v1938_v62  ;;  %v2097_v14 = vmul.f32 0.01, %v2095_v57 }
 0x90c   : > { %v2098_v36 = vadd.f32 %v4310_v38, %v2096_v63 }
 0x90d   : > { %3186 = vst.msk [vmem:[%s4267_s19 + $0x4] sm:$0x3] %vm4271_vm7, %v1940_v10  ;;  %v2099_v34 = vadd.f32 %v4317_v40, %v2097_v14 }
 0x90e   : > { %3198 = vst [vmem:[%s4315_s28 + $0x30] sm:$0xff] %v2098_v36 }
 0x90f   : > { %3199 = vst [vmem:[%s4315_s28 + $0x38] sm:$0xff] %v2099_v34 }
 0x96b   : > { %v2078_v37 = vpop.permute.xlu0 %2077 }
 0x96c   : > { %v2080_v18 = vmul.f32 %v4319_v41, %v2078_v37  ;;  %v2081_v32 = vmul.f32 %v4321_v9, %v2078_v37 }
 0x96e   : > { %v2082_v56 = vsub.f32 %v2069_v24, %v2080_v18  ;;  %v2083_v42 = vsub.f32 %v2070_v35, %v2081_v32 }
 0x970   : > { %v2084_v1 = vmul.f32 0.01, %v2082_v56  ;;  %v2085_v43 = vmul.f32 0.01, %v2083_v42 }
 0x972   : > { %v2086_v38 = vadd.f32 %v4319_v41, %v2084_v1  ;;  %v2087_v45 = vadd.f32 %v4321_v9, %v2085_v43 }
 0x974   : > { %3196 = vst [vmem:[%s4315_s28 + $0x20] sm:$0xff] %v2086_v38  ;;  %3197 = vst [vmem:[%s4315_s28 + $0x28] sm:$0xff] %v2087_v45 }
 0x992   : > { %v2599_v40 = vpop.f32.mrf.mxu0 }
 0x993   : > { %v2672_v51 = vadd.f32 %v2671_v13, %v2599_v40 }
 0x994   : > { %v3255_v47 = vpop.f32.mrf.mxu0 }
 0x99c   : > { %v2775_v8 = vpop.f32.mrf.mxu0 }
 0x99d   : > { %v2779_v52 = vadd.f32 %v2775_v8, %v2672_v51 }
 0x99e   : > { %v3281_v17 = vpop.f32.mrf.mxu0 }
 0x9a7   : > { %v2888_v16 = vpop.f32.mrf.mxu1 }
 0x9a8   : > { %v2892_v58 = vadd.f32 %v2888_v16, %v2779_v52 }
 0x9a9   : > { %v3294_v46 = vpop.f32.mrf.mxu1 }
 0x9ae   : > { %v2993_v53 = vpop.f32.mrf.mxu0 }
 0x9af   : > { %v2997_v19 = vadd.f32 %v2993_v53, %v2892_v58 }
 0x9b0   : > { %v3307_v50 = vpop.f32.mrf.mxu0 }
 0x9b1   : > { %v2999_v39 = vmin.f32 %v2997_v19, 20.0  ;;  %vm2998_vm6 = vcmp.gt.f32.partialorder %v2997_v19, 20.0 }
 0x9b3   : > { %v3000_v54 = vmul.f32 1.442695, %v2999_v39 }
 0x9b5   : > { %3452 = vpow2.f32 %v3000_v54 }
 0x9c2   : > { %v3453_v41 = vpop.eup %3452 }
 0x9c3   : > { %v3002_v9 = vadd.f32 1.0, %v3453_v41 }
 0x9c5   : > { %3454 = vlog2.f32 %v3002_v9 }
 0x9d2   : > { %v3455_v55 = vpop.eup %3454 }
 0x9d3   : > { %v3004_v59 = vmul.f32 0.6931472, %v3455_v55 }
 0x9d5   : > { %v3005_v11 = vsel %vm2998_vm6, %v2997_v19, %v3004_v59 }
 0x9d6   : > { %3006 = vst [vmem:[%s325_s17] sm:$0x1] %v3005_v11 }
 0x9d7 PF: > { %s18_s24 = sadd.s32 1, %s3465_s24  }
 0x9d8   : > { %p15_p4 = scmp.ge.s32.totalorder %s18_s24, 4  }
 0x9da   :  { %17 = sbr.rel (!%p15_p4) target bundleno = 1 (0x1), region = 114 }

</bundles_post_ra>
